<compile_context>
chip_gen: v7x
topology: tpu7x:2x2x1
jax: 0.10.0
libtpu: 0.0.40
codegen_flags: <defaults>
</compile_context>

<pallas_src>
import jax
import jax.numpy as jnp
from jax import lax
from jax.experimental import pallas as pl
from jax.experimental.pallas import tpu as pltpu


# ------------------------------ fused Pallas kernel ------------------------------

def _make_fused_kernel(W, conv_widths, pool):
    """W: raster width (original image width). conv_widths: flat widths of the three
    conv outputs.  pool: whether the 2x2 max pool is applied."""
    w1w, w2w, w3w = conv_widths
    hmax_w = w3w - 1          # width after horizontal pairwise max
    pool_w = w3w - W - 1      # width after vertical pairwise max

    def kernel(x_ref, w1_ref, b1_ref, w2_ref, b2_ref, w3_ref, b3_ref,
               wfc_ref, bfc_ref, o_ref):
        # x_ref:   (1, Cin, H*W)   channels-first flattened image (raster width W)
        # w*_ref:  (9, Cout, Cin)  3x3 conv weights, tap-major
        # b*_ref:  (Cout, 1)
        # wfc_ref: (C3, Wf, 5)     fc weights scattered into raster column positions
        # bfc_ref: (1, 5)
        # o_ref:   (1, 1, 5)

        def conv3x3_relu(x, w_ref, b_ref, wout):
            cout = w_ref.shape[1]
            acc = jnp.zeros((cout, wout), jnp.float32)
            for t in range(9):                      # 9 taps, unrolled
                off = (t // 3) * W + (t % 3)        # dy*W + dx (static column shift)
                acc = acc + jnp.dot(w_ref[t], x[:, off:off + wout],
                                    preferred_element_type=jnp.float32)
            return jnp.maximum(acc + b_ref[...], 0.0)

        a = conv3x3_relu(x_ref[0], w1_ref, b1_ref, w1w)   # (C1, 838)
        a = conv3x3_relu(a, w2_ref, b2_ref, w2w)          # (C2, 776)
        a = conv3x3_relu(a, w3_ref, b3_ref, w3w)          # (C3, 714)

        if pool:
            # 2x2 max pool as two shift+max steps on the resident raster.
            h = jnp.maximum(a[:, :hmax_w], a[:, 1:hmax_w + 1])
            a = jnp.maximum(h[:, :pool_w], h[:, W:W + pool_w])   # (C3, 683)
        # else: MaxPool2d(1) is the identity.

        # fc: weights were pre-scattered so unused raster columns have zero weight.
        acc = bfc_ref[...]                                  # (1, 5)
        for c in range(wfc_ref.shape[0]):
            acc = acc + jnp.dot(a[c:c + 1, :], wfc_ref[c],
                                preferred_element_type=jnp.float32)
        o_ref[0] = acc.astype(o_ref.dtype)

    return kernel


# ----------------------------------- wrapper --------------------------------------

def _conv_widths(H, W):
    HW = H * W
    return tuple(HW - (l + 1) * (2 * W + 2) for l in range(3))


def prepare_pallas_params(params, arr, H=30, W=30):
    """One-time weight re-layout (outside the hot path)."""
    C3 = arr[2]
    w3w = _conv_widths(H, W)[2]

    def prep_conv(w):          # (3,3,Cin,Cout) -> (9, Cout, Cin)
        kh, kw, cin, cout = w.shape
        return w.reshape(kh * kw, cin, cout).transpose(0, 2, 1)

    if arr[3] == "pool":
        Wf = w3w - W - 1
        Hp, Wp = (H - 6) // 2, (W - 6) // 2            # 12, 12
        w4 = params["wfc"].reshape(C3, Hp, Wp, 5)      # PyTorch NCHW flatten order
        cols = (2 * W * jnp.arange(Hp)[:, None] + 2 * jnp.arange(Wp)[None, :]).reshape(-1)
        wfc = jnp.zeros((C3, Wf, 5), jnp.float32).at[:, cols, :].set(
            w4.reshape(C3, Hp * Wp, 5))
    else:
        Wf = w3w
        Ho, Wo = H - 6, W - 6                          # 24, 24
        w4 = params["wfc"].reshape(C3, Ho, Wo, 5)
        cols = (W * jnp.arange(Ho)[:, None] + jnp.arange(Wo)[None, :]).reshape(-1)
        wfc = jnp.zeros((C3, Wf, 5), jnp.float32).at[:, cols, :].set(
            w4.reshape(C3, Ho * Wo, 5))

    return dict(
        w1=prep_conv(params["w1"]), b1=params["b1"].reshape(-1, 1),
        w2=prep_conv(params["w2"]), b2=params["b2"].reshape(-1, 1),
        w3=prep_conv(params["w3"]), b3=params["b3"].reshape(-1, 1),
        wfc=wfc, bfc=params["bfc"].reshape(1, 5))


def deep_cnn_forward(x_nchw, pparams, arr):
    """Fused Pallas implementation of DeepCNN.forward.  Input is NCHW like PyTorch."""
    N, Cin, H, W = x_nchw.shape
    HW = H * W
    xf = x_nchw.reshape(N, Cin, HW)          # NCHW flattens directly to flat rasters

    kernel = _make_fused_kernel(W, _conv_widths(H, W), arr[3] == "pool")
    p = pparams

    def full(shape):
        return pl.BlockSpec(shape, lambda n, _s=shape: (0,) * len(_s))

    out = pl.pallas_call(
        kernel,
        out_shape=jax.ShapeDtypeStruct((N, 1, 5), jnp.float32),
        grid=(N,),
        in_specs=[
            pl.BlockSpec((1, Cin, HW), lambda n: (n, 0, 0)),
            full(p["w1"].shape), full(p["b1"].shape),
            full(p["w2"].shape), full(p["b2"].shape),
            full(p["w3"].shape), full(p["b3"].shape),
            full(p["wfc"].shape), full(p["bfc"].shape),
        ],
        out_specs=pl.BlockSpec((1, 1, 5), lambda n: (n, 0, 0)),
        compiler_params=pltpu.CompilerParams(dimension_semantics=("parallel",)),
    )(xf, p["w1"], p["b1"], p["w2"], p["b2"], p["w3"], p["b3"], p["wfc"], p["bfc"])
    return out.reshape(N, 5)


# ------------------------------ parameter creation --------------------------------

def init_params(key, arr):
    """Deterministic synthetic params, PyTorch-default-style uniform bounds."""
    spatial = 12 if arr[3] == "pool" else 24
    fan_fc = arr[2] * spatial * spatial
    keys = jax.random.split(key, 8)

    def conv_init(kw, kb, cin, cout):
        bound = 1.0 / (9.0 * cin) ** 0.5
        w = jax.random.uniform(kw, (3, 3, cin, cout), jnp.float32, -bound, bound)
        b = jax.random.uniform(kb, (cout,), jnp.float32, -bound, bound)
        return w, b

    w1, b1 = conv_init(keys[0], keys[1], 3, arr[0])
    w2, b2 = conv_init(keys[2], keys[3], arr[0], arr[1])
    w3, b3 = conv_init(keys[4], keys[5], arr[1], arr[2])
    bound = 1.0 / float(fan_fc) ** 0.5
    wfc = jax.random.uniform(keys[6], (fan_fc, 5), jnp.float32, -bound, bound)
    bfc = jax.random.uniform(keys[7], (5,), jnp.float32, -bound, bound)
    return dict(w1=w1, b1=b1, w2=w2, b2=b2, w3=w3, b3=b3, wfc=wfc, bfc=bfc)


# ------------------------------ pure-JAX reference ---------------------------------

def reference_forward(x_nchw, params, arr):
    x = jnp.transpose(x_nchw, (0, 2, 3, 1))

    def conv(y, w, b):
        z = lax.conv_general_dilated(
            y, w, window_strides=(1, 1), padding="VALID",
            dimension_numbers=("NHWC", "HWIO", "NHWC"),
            precision=lax.Precision.HIGHEST)
        return jnp.maximum(z + b, 0.0)

    x = conv(x, params["w1"], params["b1"])
    x = conv(x, params["w2"], params["b2"])
    x = conv(x, params["w3"], params["b3"])
    if arr[3] == "pool":
        x = lax.reduce_window(x, -jnp.inf, lax.max,
                              (1, 2, 2, 1), (1, 2, 2, 1), "VALID")
    N = x.shape[0]
    x = jnp.transpose(x, (0, 3, 1, 2)).reshape(N, -1)
    return jnp.dot(x, params["wfc"], precision=lax.Precision.HIGHEST) + params["bfc"]


# ----------------------------------- main -------------------------------------------

if __name__ == "__main__":
    # arr = [conv1_out, conv2_out, conv3_out, 'pool'].  Spatial size is forced to 30x30
    # by fc1: 30 -(3x3)-> 28 -> 26 -> 24 -(pool2)-> 12, fc1 expects arr[2]*12*12 features.
    arr = [4, 8, 8, "pool"]
    key = jax.random.PRNGKey(0)
    kx, kp = jax.random.split(key)

    x = jax.random.normal(kx, (2, 3, 30, 30), jnp.float32)
    params = init_params(kp, arr)
    pparams = prepare_pallas_params(params, arr)     # one-time weight re-layout

    fwd = jax.jit(lambda xx, pp: deep_cnn_forward(xx, pp, arr))
    out = jax.block_until_ready(fwd(x, pparams))
    assert out.shape == (2, 5)

    ref = reference_forward(x, params, arr)
    if not jnp.allclose(out, ref, atol=1e-2, rtol=1e-2):
        raise AssertionError("Pallas output mismatch vs pure-JAX reference")

    print("KERNEL_OK")
</pallas_src>

<mosaic_0001>
module attributes {stable_mosaic.version = 11 : i64} {
  func.func @kernel(%arg0: i32, %arg1: memref<1x3x900xf32, #tpu.memory_space<vmem>>, %arg2: memref<9x4x3xf32, #tpu.memory_space<vmem>>, %arg3: memref<4x1xf32, #tpu.memory_space<vmem>>, %arg4: memref<9x8x4xf32, #tpu.memory_space<vmem>>, %arg5: memref<8x1xf32, #tpu.memory_space<vmem>>, %arg6: memref<9x8x8xf32, #tpu.memory_space<vmem>>, %arg7: memref<8x1xf32, #tpu.memory_space<vmem>>, %arg8: memref<8x683x5xf32, #tpu.memory_space<vmem>>, %arg9: memref<1x5xf32, #tpu.memory_space<vmem>>, %arg10: memref<1x1x5xf32, #tpu.memory_space<vmem>>) attributes {dimension_semantics = [#tpu.dimension_semantics<parallel>], iteration_bounds = array<i64: 2>, scalar_prefetch = 0 : i64, scratch_operands = 0 : i64, tpu.core_type = #tpu.core_type<tc>, window_params = [{transform_indices = @transform_0, window_bounds = array<i64: 1, 3, 900>}, {pipeline_mode = #tpu.pipeline_mode<synchronous>, transform_indices = @transform_1, window_bounds = array<i64: 9, 4, 3>}, {pipeline_mode = #tpu.pipeline_mode<synchronous>, transform_indices = @transform_2, window_bounds = array<i64: 4, 1>}, {pipeline_mode = #tpu.pipeline_mode<synchronous>, transform_indices = @transform_3, window_bounds = array<i64: 9, 8, 4>}, {pipeline_mode = #tpu.pipeline_mode<synchronous>, transform_indices = @transform_4, window_bounds = array<i64: 8, 1>}, {pipeline_mode = #tpu.pipeline_mode<synchronous>, transform_indices = @transform_5, window_bounds = array<i64: 9, 8, 8>}, {pipeline_mode = #tpu.pipeline_mode<synchronous>, transform_indices = @transform_6, window_bounds = array<i64: 8, 1>}, {pipeline_mode = #tpu.pipeline_mode<synchronous>, transform_indices = @transform_7, window_bounds = array<i64: 8, 683, 5>}, {pipeline_mode = #tpu.pipeline_mode<synchronous>, transform_indices = @transform_8, window_bounds = array<i64: 1, 5>}, {transform_indices = @transform_9, window_bounds = array<i64: 1, 1, 5>}]} {
    %c0 = arith.constant 0 : index
    %c0_0 = arith.constant 0 : index
    %c0_1 = arith.constant 0 : index
    %0 = vector.load %arg1[%c0, %c0_0, %c0_1] : memref<1x3x900xf32, #tpu.memory_space<vmem>>, vector<1x3x900xf32>
    %1 = vector.shape_cast %0 : vector<1x3x900xf32> to vector<3x900xf32>
    %cst = arith.constant 0.000000e+00 : f32
    %2 = vector.broadcast %cst : f32 to vector<4x838xf32>
    %c0_2 = arith.constant 0 : index
    %c0_3 = arith.constant 0 : index
    %c0_4 = arith.constant 0 : index
    %3 = vector.load %arg2[%c0_2, %c0_3, %c0_4] : memref<9x4x3xf32, #tpu.memory_space<vmem>>, vector<1x4x3xf32>
    %4 = vector.shape_cast %3 : vector<1x4x3xf32> to vector<4x3xf32>
    %5 = vector.extract_strided_slice %1 {offsets = [0, 0], sizes = [3, 838], strides = [1, 1]} : vector<3x900xf32> to vector<3x838xf32>
    %cst_5 = arith.constant dense<0.000000e+00> : vector<4x838xf32>
    %6 = tpu.matmul %4, %5, %cst_5 {dimension_numbers = #tpu.dot_dimension_numbers<[1], [0], [0], [1], [0, 0, 1, 1], [], []>} : vector<4x3xf32>, vector<3x838xf32>, vector<4x838xf32> -> vector<4x838xf32>
    %7 = arith.addf %2, %6 : vector<4x838xf32>
    %c1 = arith.constant 1 : index
    %c0_6 = arith.constant 0 : index
    %c0_7 = arith.constant 0 : index
    %8 = vector.load %arg2[%c1, %c0_6, %c0_7] : memref<9x4x3xf32, #tpu.memory_space<vmem>>, vector<1x4x3xf32>
    %9 = vector.shape_cast %8 : vector<1x4x3xf32> to vector<4x3xf32>
    %10 = vector.extract_strided_slice %1 {offsets = [0, 1], sizes = [3, 838], strides = [1, 1]} : vector<3x900xf32> to vector<3x838xf32>
    %cst_8 = arith.constant dense<0.000000e+00> : vector<4x838xf32>
    %11 = tpu.matmul %9, %10, %cst_8 {dimension_numbers = #tpu.dot_dimension_numbers<[1], [0], [0], [1], [0, 0, 1, 1], [], []>} : vector<4x3xf32>, vector<3x838xf32>, vector<4x838xf32> -> vector<4x838xf32>
    %12 = arith.addf %7, %11 : vector<4x838xf32>
    %c2 = arith.constant 2 : index
    %c0_9 = arith.constant 0 : index
    %c0_10 = arith.constant 0 : index
    %13 = vector.load %arg2[%c2, %c0_9, %c0_10] : memref<9x4x3xf32, #tpu.memory_space<vmem>>, vector<1x4x3xf32>
    %14 = vector.shape_cast %13 : vector<1x4x3xf32> to vector<4x3xf32>
    %15 = vector.extract_strided_slice %1 {offsets = [0, 2], sizes = [3, 838], strides = [1, 1]} : vector<3x900xf32> to vector<3x838xf32>
    %cst_11 = arith.constant dense<0.000000e+00> : vector<4x838xf32>
    %16 = tpu.matmul %14, %15, %cst_11 {dimension_numbers = #tpu.dot_dimension_numbers<[1], [0], [0], [1], [0, 0, 1, 1], [], []>} : vector<4x3xf32>, vector<3x838xf32>, vector<4x838xf32> -> vector<4x838xf32>
    %17 = arith.addf %12, %16 : vector<4x838xf32>
    %c3 = arith.constant 3 : index
    %c0_12 = arith.constant 0 : index
    %c0_13 = arith.constant 0 : index
    %18 = vector.load %arg2[%c3, %c0_12, %c0_13] : memref<9x4x3xf32, #tpu.memory_space<vmem>>, vector<1x4x3xf32>
    %19 = vector.shape_cast %18 : vector<1x4x3xf32> to vector<4x3xf32>
    %20 = vector.extract_strided_slice %1 {offsets = [0, 30], sizes = [3, 838], strides = [1, 1]} : vector<3x900xf32> to vector<3x838xf32>
    %cst_14 = arith.constant dense<0.000000e+00> : vector<4x838xf32>
    %21 = tpu.matmul %19, %20, %cst_14 {dimension_numbers = #tpu.dot_dimension_numbers<[1], [0], [0], [1], [0, 0, 1, 1], [], []>} : vector<4x3xf32>, vector<3x838xf32>, vector<4x838xf32> -> vector<4x838xf32>
    %22 = arith.addf %17, %21 : vector<4x838xf32>
    %c4 = arith.constant 4 : index
    %c0_15 = arith.constant 0 : index
    %c0_16 = arith.constant 0 : index
    %23 = vector.load %arg2[%c4, %c0_15, %c0_16] : memref<9x4x3xf32, #tpu.memory_space<vmem>>, vector<1x4x3xf32>
    %24 = vector.shape_cast %23 : vector<1x4x3xf32> to vector<4x3xf32>
    %25 = vector.extract_strided_slice %1 {offsets = [0, 31], sizes = [3, 838], strides = [1, 1]} : vector<3x900xf32> to vector<3x838xf32>
    %cst_17 = arith.constant dense<0.000000e+00> : vector<4x838xf32>
    %26 = tpu.matmul %24, %25, %cst_17 {dimension_numbers = #tpu.dot_dimension_numbers<[1], [0], [0], [1], [0, 0, 1, 1], [], []>} : vector<4x3xf32>, vector<3x838xf32>, vector<4x838xf32> -> vector<4x838xf32>
    %27 = arith.addf %22, %26 : vector<4x838xf32>
    %c5 = arith.constant 5 : index
    %c0_18 = arith.constant 0 : index
    %c0_19 = arith.constant 0 : index
    %28 = vector.load %arg2[%c5, %c0_18, %c0_19] : memref<9x4x3xf32, #tpu.memory_space<vmem>>, vector<1x4x3xf32>
    %29 = vector.shape_cast %28 : vector<1x4x3xf32> to vector<4x3xf32>
    %30 = vector.extract_strided_slice %1 {offsets = [0, 32], sizes = [3, 838], strides = [1, 1]} : vector<3x900xf32> to vector<3x838xf32>
    %cst_20 = arith.constant dense<0.000000e+00> : vector<4x838xf32>
    %31 = tpu.matmul %29, %30, %cst_20 {dimension_numbers = #tpu.dot_dimension_numbers<[1], [0], [0], [1], [0, 0, 1, 1], [], []>} : vector<4x3xf32>, vector<3x838xf32>, vector<4x838xf32> -> vector<4x838xf32>
    %32 = arith.addf %27, %31 : vector<4x838xf32>
    %c6 = arith.constant 6 : index
    %c0_21 = arith.constant 0 : index
    %c0_22 = arith.constant 0 : index
    %33 = vector.load %arg2[%c6, %c0_21, %c0_22] : memref<9x4x3xf32, #tpu.memory_space<vmem>>, vector<1x4x3xf32>
    %34 = vector.shape_cast %33 : vector<1x4x3xf32> to vector<4x3xf32>
    %35 = vector.extract_strided_slice %1 {offsets = [0, 60], sizes = [3, 838], strides = [1, 1]} : vector<3x900xf32> to vector<3x838xf32>
    %cst_23 = arith.constant dense<0.000000e+00> : vector<4x838xf32>
    %36 = tpu.matmul %34, %35, %cst_23 {dimension_numbers = #tpu.dot_dimension_numbers<[1], [0], [0], [1], [0, 0, 1, 1], [], []>} : vector<4x3xf32>, vector<3x838xf32>, vector<4x838xf32> -> vector<4x838xf32>
    %37 = arith.addf %32, %36 : vector<4x838xf32>
    %c7 = arith.constant 7 : index
    %c0_24 = arith.constant 0 : index
    %c0_25 = arith.constant 0 : index
    %38 = vector.load %arg2[%c7, %c0_24, %c0_25] : memref<9x4x3xf32, #tpu.memory_space<vmem>>, vector<1x4x3xf32>
    %39 = vector.shape_cast %38 : vector<1x4x3xf32> to vector<4x3xf32>
    %40 = vector.extract_strided_slice %1 {offsets = [0, 61], sizes = [3, 838], strides = [1, 1]} : vector<3x900xf32> to vector<3x838xf32>
    %cst_26 = arith.constant dense<0.000000e+00> : vector<4x838xf32>
    %41 = tpu.matmul %39, %40, %cst_26 {dimension_numbers = #tpu.dot_dimension_numbers<[1], [0], [0], [1], [0, 0, 1, 1], [], []>} : vector<4x3xf32>, vector<3x838xf32>, vector<4x838xf32> -> vector<4x838xf32>
    %42 = arith.addf %37, %41 : vector<4x838xf32>
    %c8 = arith.constant 8 : index
    %c0_27 = arith.constant 0 : index
    %c0_28 = arith.constant 0 : index
    %43 = vector.load %arg2[%c8, %c0_27, %c0_28] : memref<9x4x3xf32, #tpu.memory_space<vmem>>, vector<1x4x3xf32>
    %44 = vector.shape_cast %43 : vector<1x4x3xf32> to vector<4x3xf32>
    %45 = vector.extract_strided_slice %1 {offsets = [0, 62], sizes = [3, 838], strides = [1, 1]} : vector<3x900xf32> to vector<3x838xf32>
    %cst_29 = arith.constant dense<0.000000e+00> : vector<4x838xf32>
    %46 = tpu.matmul %44, %45, %cst_29 {dimension_numbers = #tpu.dot_dimension_numbers<[1], [0], [0], [1], [0, 0, 1, 1], [], []>} : vector<4x3xf32>, vector<3x838xf32>, vector<4x838xf32> -> vector<4x838xf32>
    %47 = arith.addf %42, %46 : vector<4x838xf32>
    %c0_30 = arith.constant 0 : index
    %c0_31 = arith.constant 0 : index
    %48 = vector.load %arg3[%c0_30, %c0_31] : memref<4x1xf32, #tpu.memory_space<vmem>>, vector<4x1xf32>
    %49 = vector.broadcast %48 : vector<4x1xf32> to vector<4x838xf32>
    %50 = arith.addf %47, %49 : vector<4x838xf32>
    %cst_32 = arith.constant 0.000000e+00 : f32
    %51 = vector.broadcast %cst_32 : f32 to vector<4x838xf32>
    %52 = arith.maximumf %50, %51 : vector<4x838xf32>
    %cst_33 = arith.constant 0.000000e+00 : f32
    %53 = vector.broadcast %cst_33 : f32 to vector<8x776xf32>
    %c0_34 = arith.constant 0 : index
    %c0_35 = arith.constant 0 : index
    %c0_36 = arith.constant 0 : index
    %54 = vector.load %arg4[%c0_34, %c0_35, %c0_36] : memref<9x8x4xf32, #tpu.memory_space<vmem>>, vector<1x8x4xf32>
    %55 = vector.shape_cast %54 : vector<1x8x4xf32> to vector<8x4xf32>
    %56 = vector.extract_strided_slice %52 {offsets = [0, 0], sizes = [4, 776], strides = [1, 1]} : vector<4x838xf32> to vector<4x776xf32>
    %cst_37 = arith.constant dense<0.000000e+00> : vector<8x776xf32>
    %57 = tpu.matmul %55, %56, %cst_37 {dimension_numbers = #tpu.dot_dimension_numbers<[1], [0], [0], [1], [0, 0, 1, 1], [], []>} : vector<8x4xf32>, vector<4x776xf32>, vector<8x776xf32> -> vector<8x776xf32>
    %58 = arith.addf %53, %57 : vector<8x776xf32>
    %c1_38 = arith.constant 1 : index
    %c0_39 = arith.constant 0 : index
    %c0_40 = arith.constant 0 : index
    %59 = vector.load %arg4[%c1_38, %c0_39, %c0_40] : memref<9x8x4xf32, #tpu.memory_space<vmem>>, vector<1x8x4xf32>
    %60 = vector.shape_cast %59 : vector<1x8x4xf32> to vector<8x4xf32>
    %61 = vector.extract_strided_slice %52 {offsets = [0, 1], sizes = [4, 776], strides = [1, 1]} : vector<4x838xf32> to vector<4x776xf32>
    %cst_41 = arith.constant dense<0.000000e+00> : vector<8x776xf32>
    %62 = tpu.matmul %60, %61, %cst_41 {dimension_numbers = #tpu.dot_dimension_numbers<[1], [0], [0], [1], [0, 0, 1, 1], [], []>} : vector<8x4xf32>, vector<4x776xf32>, vector<8x776xf32> -> vector<8x776xf32>
    %63 = arith.addf %58, %62 : vector<8x776xf32>
    %c2_42 = arith.constant 2 : index
    %c0_43 = arith.constant 0 : index
    %c0_44 = arith.constant 0 : index
    %64 = vector.load %arg4[%c2_42, %c0_43, %c0_44] : memref<9x8x4xf32, #tpu.memory_space<vmem>>, vector<1x8x4xf32>
    %65 = vector.shape_cast %64 : vector<1x8x4xf32> to vector<8x4xf32>
    %66 = vector.extract_strided_slice %52 {offsets = [0, 2], sizes = [4, 776], strides = [1, 1]} : vector<4x838xf32> to vector<4x776xf32>
    %cst_45 = arith.constant dense<0.000000e+00> : vector<8x776xf32>
    %67 = tpu.matmul %65, %66, %cst_45 {dimension_numbers = #tpu.dot_dimension_numbers<[1], [0], [0], [1], [0, 0, 1, 1], [], []>} : vector<8x4xf32>, vector<4x776xf32>, vector<8x776xf32> -> vector<8x776xf32>
    %68 = arith.addf %63, %67 : vector<8x776xf32>
    %c3_46 = arith.constant 3 : index
    %c0_47 = arith.constant 0 : index
    %c0_48 = arith.constant 0 : index
    %69 = vector.load %arg4[%c3_46, %c0_47, %c0_48] : memref<9x8x4xf32, #tpu.memory_space<vmem>>, vector<1x8x4xf32>
    %70 = vector.shape_cast %69 : vector<1x8x4xf32> to vector<8x4xf32>
    %71 = vector.extract_strided_slice %52 {offsets = [0, 30], sizes = [4, 776], strides = [1, 1]} : vector<4x838xf32> to vector<4x776xf32>
    %cst_49 = arith.constant dense<0.000000e+00> : vector<8x776xf32>
    %72 = tpu.matmul %70, %71, %cst_49 {dimension_numbers = #tpu.dot_dimension_numbers<[1], [0], [0], [1], [0, 0, 1, 1], [], []>} : vector<8x4xf32>, vector<4x776xf32>, vector<8x776xf32> -> vector<8x776xf32>
    %73 = arith.addf %68, %72 : vector<8x776xf32>
    %c4_50 = arith.constant 4 : index
    %c0_51 = arith.constant 0 : index
    %c0_52 = arith.constant 0 : index
    %74 = vector.load %arg4[%c4_50, %c0_51, %c0_52] : memref<9x8x4xf32, #tpu.memory_space<vmem>>, vector<1x8x4xf32>
    %75 = vector.shape_cast %74 : vector<1x8x4xf32> to vector<8x4xf32>
    %76 = vector.extract_strided_slice %52 {offsets = [0, 31], sizes = [4, 776], strides = [1, 1]} : vector<4x838xf32> to vector<4x776xf32>
    %cst_53 = arith.constant dense<0.000000e+00> : vector<8x776xf32>
    %77 = tpu.matmul %75, %76, %cst_53 {dimension_numbers = #tpu.dot_dimension_numbers<[1], [0], [0], [1], [0, 0, 1, 1], [], []>} : vector<8x4xf32>, vector<4x776xf32>, vector<8x776xf32> -> vector<8x776xf32>
    %78 = arith.addf %73, %77 : vector<8x776xf32>
    %c5_54 = arith.constant 5 : index
    %c0_55 = arith.constant 0 : index
    %c0_56 = arith.constant 0 : index
    %79 = vector.load %arg4[%c5_54, %c0_55, %c0_56] : memref<9x8x4xf32, #tpu.memory_space<vmem>>, vector<1x8x4xf32>
    %80 = vector.shape_cast %79 : vector<1x8x4xf32> to vector<8x4xf32>
    %81 = vector.extract_strided_slice %52 {offsets = [0, 32], sizes = [4, 776], strides = [1, 1]} : vector<4x838xf32> to vector<4x776xf32>
    %cst_57 = arith.constant dense<0.000000e+00> : vector<8x776xf32>
    %82 = tpu.matmul %80, %81, %cst_57 {dimension_numbers = #tpu.dot_dimension_numbers<[1], [0], [0], [1], [0, 0, 1, 1], [], []>} : vector<8x4xf32>, vector<4x776xf32>, vector<8x776xf32> -> vector<8x776xf32>
    %83 = arith.addf %78, %82 : vector<8x776xf32>
    %c6_58 = arith.constant 6 : index
    %c0_59 = arith.constant 0 : index
    %c0_60 = arith.constant 0 : index
    %84 = vector.load %arg4[%c6_58, %c0_59, %c0_60] : memref<9x8x4xf32, #tpu.memory_space<vmem>>, vector<1x8x4xf32>
    %85 = vector.shape_cast %84 : vector<1x8x4xf32> to vector<8x4xf32>
    %86 = vector.extract_strided_slice %52 {offsets = [0, 60], sizes = [4, 776], strides = [1, 1]} : vector<4x838xf32> to vector<4x776xf32>
    %cst_61 = arith.constant dense<0.000000e+00> : vector<8x776xf32>
    %87 = tpu.matmul %85, %86, %cst_61 {dimension_numbers = #tpu.dot_dimension_numbers<[1], [0], [0], [1], [0, 0, 1, 1], [], []>} : vector<8x4xf32>, vector<4x776xf32>, vector<8x776xf32> -> vector<8x776xf32>
    %88 = arith.addf %83, %87 : vector<8x776xf32>
    %c7_62 = arith.constant 7 : index
    %c0_63 = arith.constant 0 : index
    %c0_64 = arith.constant 0 : index
    %89 = vector.load %arg4[%c7_62, %c0_63, %c0_64] : memref<9x8x4xf32, #tpu.memory_space<vmem>>, vector<1x8x4xf32>
    %90 = vector.shape_cast %89 : vector<1x8x4xf32> to vector<8x4xf32>
    %91 = vector.extract_strided_slice %52 {offsets = [0, 61], sizes = [4, 776], strides = [1, 1]} : vector<4x838xf32> to vector<4x776xf32>
    %cst_65 = arith.constant dense<0.000000e+00> : vector<8x776xf32>
    %92 = tpu.matmul %90, %91, %cst_65 {dimension_numbers = #tpu.dot_dimension_numbers<[1], [0], [0], [1], [0, 0, 1, 1], [], []>} : vector<8x4xf32>, vector<4x776xf32>, vector<8x776xf32> -> vector<8x776xf32>
    %93 = arith.addf %88, %92 : vector<8x776xf32>
    %c8_66 = arith.constant 8 : index
    %c0_67 = arith.constant 0 : index
    %c0_68 = arith.constant 0 : index
    %94 = vector.load %arg4[%c8_66, %c0_67, %c0_68] : memref<9x8x4xf32, #tpu.memory_space<vmem>>, vector<1x8x4xf32>
    %95 = vector.shape_cast %94 : vector<1x8x4xf32> to vector<8x4xf32>
    %96 = vector.extract_strided_slice %52 {offsets = [0, 62], sizes = [4, 776], strides = [1, 1]} : vector<4x838xf32> to vector<4x776xf32>
    %cst_69 = arith.constant dense<0.000000e+00> : vector<8x776xf32>
    %97 = tpu.matmul %95, %96, %cst_69 {dimension_numbers = #tpu.dot_dimension_numbers<[1], [0], [0], [1], [0, 0, 1, 1], [], []>} : vector<8x4xf32>, vector<4x776xf32>, vector<8x776xf32> -> vector<8x776xf32>
    %98 = arith.addf %93, %97 : vector<8x776xf32>
    %c0_70 = arith.constant 0 : index
    %c0_71 = arith.constant 0 : index
    %99 = vector.load %arg5[%c0_70, %c0_71] : memref<8x1xf32, #tpu.memory_space<vmem>>, vector<8x1xf32>
    %100 = vector.broadcast %99 : vector<8x1xf32> to vector<8x776xf32>
    %101 = arith.addf %98, %100 : vector<8x776xf32>
    %cst_72 = arith.constant 0.000000e+00 : f32
    %102 = vector.broadcast %cst_72 : f32 to vector<8x776xf32>
    %103 = arith.maximumf %101, %102 : vector<8x776xf32>
    %cst_73 = arith.constant 0.000000e+00 : f32
    %104 = vector.broadcast %cst_73 : f32 to vector<8x714xf32>
    %c0_74 = arith.constant 0 : index
    %c0_75 = arith.constant 0 : index
    %c0_76 = arith.constant 0 : index
    %105 = vector.load %arg6[%c0_74, %c0_75, %c0_76] : memref<9x8x8xf32, #tpu.memory_space<vmem>>, vector<1x8x8xf32>
    %106 = vector.shape_cast %105 : vector<1x8x8xf32> to vector<8x8xf32>
    %107 = vector.extract_strided_slice %103 {offsets = [0, 0], sizes = [8, 714], strides = [1, 1]} : vector<8x776xf32> to vector<8x714xf32>
    %cst_77 = arith.constant dense<0.000000e+00> : vector<8x714xf32>
    %108 = tpu.matmul %106, %107, %cst_77 {dimension_numbers = #tpu.dot_dimension_numbers<[1], [0], [0], [1], [0, 0, 1, 1], [], []>} : vector<8x8xf32>, vector<8x714xf32>, vector<8x714xf32> -> vector<8x714xf32>
    %109 = arith.addf %104, %108 : vector<8x714xf32>
    %c1_78 = arith.constant 1 : index
    %c0_79 = arith.constant 0 : index
    %c0_80 = arith.constant 0 : index
    %110 = vector.load %arg6[%c1_78, %c0_79, %c0_80] : memref<9x8x8xf32, #tpu.memory_space<vmem>>, vector<1x8x8xf32>
    %111 = vector.shape_cast %110 : vector<1x8x8xf32> to vector<8x8xf32>
    %112 = vector.extract_strided_slice %103 {offsets = [0, 1], sizes = [8, 714], strides = [1, 1]} : vector<8x776xf32> to vector<8x714xf32>
    %cst_81 = arith.constant dense<0.000000e+00> : vector<8x714xf32>
    %113 = tpu.matmul %111, %112, %cst_81 {dimension_numbers = #tpu.dot_dimension_numbers<[1], [0], [0], [1], [0, 0, 1, 1], [], []>} : vector<8x8xf32>, vector<8x714xf32>, vector<8x714xf32> -> vector<8x714xf32>
    %114 = arith.addf %109, %113 : vector<8x714xf32>
    %c2_82 = arith.constant 2 : index
    %c0_83 = arith.constant 0 : index
    %c0_84 = arith.constant 0 : index
    %115 = vector.load %arg6[%c2_82, %c0_83, %c0_84] : memref<9x8x8xf32, #tpu.memory_space<vmem>>, vector<1x8x8xf32>
    %116 = vector.shape_cast %115 : vector<1x8x8xf32> to vector<8x8xf32>
    %117 = vector.extract_strided_slice %103 {offsets = [0, 2], sizes = [8, 714], strides = [1, 1]} : vector<8x776xf32> to vector<8x714xf32>
    %cst_85 = arith.constant dense<0.000000e+00> : vector<8x714xf32>
    %118 = tpu.matmul %116, %117, %cst_85 {dimension_numbers = #tpu.dot_dimension_numbers<[1], [0], [0], [1], [0, 0, 1, 1], [], []>} : vector<8x8xf32>, vector<8x714xf32>, vector<8x714xf32> -> vector<8x714xf32>
    %119 = arith.addf %114, %118 : vector<8x714xf32>
    %c3_86 = arith.constant 3 : index
    %c0_87 = arith.constant 0 : index
    %c0_88 = arith.constant 0 : index
    %120 = vector.load %arg6[%c3_86, %c0_87, %c0_88] : memref<9x8x8xf32, #tpu.memory_space<vmem>>, vector<1x8x8xf32>
    %121 = vector.shape_cast %120 : vector<1x8x8xf32> to vector<8x8xf32>
    %122 = vector.extract_strided_slice %103 {offsets = [0, 30], sizes = [8, 714], strides = [1, 1]} : vector<8x776xf32> to vector<8x714xf32>
    %cst_89 = arith.constant dense<0.000000e+00> : vector<8x714xf32>
    %123 = tpu.matmul %121, %122, %cst_89 {dimension_numbers = #tpu.dot_dimension_numbers<[1], [0], [0], [1], [0, 0, 1, 1], [], []>} : vector<8x8xf32>, vector<8x714xf32>, vector<8x714xf32> -> vector<8x714xf32>
    %124 = arith.addf %119, %123 : vector<8x714xf32>
    %c4_90 = arith.constant 4 : index
    %c0_91 = arith.constant 0 : index
    %c0_92 = arith.constant 0 : index
    %125 = vector.load %arg6[%c4_90, %c0_91, %c0_92] : memref<9x8x8xf32, #tpu.memory_space<vmem>>, vector<1x8x8xf32>
    %126 = vector.shape_cast %125 : vector<1x8x8xf32> to vector<8x8xf32>
    %127 = vector.extract_strided_slice %103 {offsets = [0, 31], sizes = [8, 714], strides = [1, 1]} : vector<8x776xf32> to vector<8x714xf32>
    %cst_93 = arith.constant dense<0.000000e+00> : vector<8x714xf32>
    %128 = tpu.matmul %126, %127, %cst_93 {dimension_numbers = #tpu.dot_dimension_numbers<[1], [0], [0], [1], [0, 0, 1, 1], [], []>} : vector<8x8xf32>, vector<8x714xf32>, vector<8x714xf32> -> vector<8x714xf32>
    %129 = arith.addf %124, %128 : vector<8x714xf32>
    %c5_94 = arith.constant 5 : index
    %c0_95 = arith.constant 0 : index
    %c0_96 = arith.constant 0 : index
    %130 = vector.load %arg6[%c5_94, %c0_95, %c0_96] : memref<9x8x8xf32, #tpu.memory_space<vmem>>, vector<1x8x8xf32>
    %131 = vector.shape_cast %130 : vector<1x8x8xf32> to vector<8x8xf32>
    %132 = vector.extract_strided_slice %103 {offsets = [0, 32], sizes = [8, 714], strides = [1, 1]} : vector<8x776xf32> to vector<8x714xf32>
    %cst_97 = arith.constant dense<0.000000e+00> : vector<8x714xf32>
    %133 = tpu.matmul %131, %132, %cst_97 {dimension_numbers = #tpu.dot_dimension_numbers<[1], [0], [0], [1], [0, 0, 1, 1], [], []>} : vector<8x8xf32>, vector<8x714xf32>, vector<8x714xf32> -> vector<8x714xf32>
    %134 = arith.addf %129, %133 : vector<8x714xf32>
    %c6_98 = arith.constant 6 : index
    %c0_99 = arith.constant 0 : index
    %c0_100 = arith.constant 0 : index
    %135 = vector.load %arg6[%c6_98, %c0_99, %c0_100] : memref<9x8x8xf32, #tpu.memory_space<vmem>>, vector<1x8x8xf32>
    %136 = vector.shape_cast %135 : vector<1x8x8xf32> to vector<8x8xf32>
    %137 = vector.extract_strided_slice %103 {offsets = [0, 60], sizes = [8, 714], strides = [1, 1]} : vector<8x776xf32> to vector<8x714xf32>
    %cst_101 = arith.constant dense<0.000000e+00> : vector<8x714xf32>
    %138 = tpu.matmul %136, %137, %cst_101 {dimension_numbers = #tpu.dot_dimension_numbers<[1], [0], [0], [1], [0, 0, 1, 1], [], []>} : vector<8x8xf32>, vector<8x714xf32>, vector<8x714xf32> -> vector<8x714xf32>
    %139 = arith.addf %134, %138 : vector<8x714xf32>
    %c7_102 = arith.constant 7 : index
    %c0_103 = arith.constant 0 : index
    %c0_104 = arith.constant 0 : index
    %140 = vector.load %arg6[%c7_102, %c0_103, %c0_104] : memref<9x8x8xf32, #tpu.memory_space<vmem>>, vector<1x8x8xf32>
    %141 = vector.shape_cast %140 : vector<1x8x8xf32> to vector<8x8xf32>
    %142 = vector.extract_strided_slice %103 {offsets = [0, 61], sizes = [8, 714], strides = [1, 1]} : vector<8x776xf32> to vector<8x714xf32>
    %cst_105 = arith.constant dense<0.000000e+00> : vector<8x714xf32>
    %143 = tpu.matmul %141, %142, %cst_105 {dimension_numbers = #tpu.dot_dimension_numbers<[1], [0], [0], [1], [0, 0, 1, 1], [], []>} : vector<8x8xf32>, vector<8x714xf32>, vector<8x714xf32> -> vector<8x714xf32>
    %144 = arith.addf %139, %143 : vector<8x714xf32>
    %c8_106 = arith.constant 8 : index
    %c0_107 = arith.constant 0 : index
    %c0_108 = arith.constant 0 : index
    %145 = vector.load %arg6[%c8_106, %c0_107, %c0_108] : memref<9x8x8xf32, #tpu.memory_space<vmem>>, vector<1x8x8xf32>
    %146 = vector.shape_cast %145 : vector<1x8x8xf32> to vector<8x8xf32>
    %147 = vector.extract_strided_slice %103 {offsets = [0, 62], sizes = [8, 714], strides = [1, 1]} : vector<8x776xf32> to vector<8x714xf32>
    %cst_109 = arith.constant dense<0.000000e+00> : vector<8x714xf32>
    %148 = tpu.matmul %146, %147, %cst_109 {dimension_numbers = #tpu.dot_dimension_numbers<[1], [0], [0], [1], [0, 0, 1, 1], [], []>} : vector<8x8xf32>, vector<8x714xf32>, vector<8x714xf32> -> vector<8x714xf32>
    %149 = arith.addf %144, %148 : vector<8x714xf32>
    %c0_110 = arith.constant 0 : index
    %c0_111 = arith.constant 0 : index
    %150 = vector.load %arg7[%c0_110, %c0_111] : memref<8x1xf32, #tpu.memory_space<vmem>>, vector<8x1xf32>
    %151 = vector.broadcast %150 : vector<8x1xf32> to vector<8x714xf32>
    %152 = arith.addf %149, %151 : vector<8x714xf32>
    %cst_112 = arith.constant 0.000000e+00 : f32
    %153 = vector.broadcast %cst_112 : f32 to vector<8x714xf32>
    %154 = arith.maximumf %152, %153 : vector<8x714xf32>
    %155 = vector.extract_strided_slice %154 {offsets = [0, 0], sizes = [8, 713], strides = [1, 1]} : vector<8x714xf32> to vector<8x713xf32>
    %156 = vector.extract_strided_slice %154 {offsets = [0, 1], sizes = [8, 713], strides = [1, 1]} : vector<8x714xf32> to vector<8x713xf32>
    %157 = arith.maximumf %155, %156 : vector<8x713xf32>
    %158 = vector.extract_strided_slice %157 {offsets = [0, 0], sizes = [8, 683], strides = [1, 1]} : vector<8x713xf32> to vector<8x683xf32>
    %159 = vector.extract_strided_slice %157 {offsets = [0, 30], sizes = [8, 683], strides = [1, 1]} : vector<8x713xf32> to vector<8x683xf32>
    %160 = arith.maximumf %158, %159 : vector<8x683xf32>
    %c0_113 = arith.constant 0 : index
    %c0_114 = arith.constant 0 : index
    %161 = vector.load %arg9[%c0_113, %c0_114] : memref<1x5xf32, #tpu.memory_space<vmem>>, vector<1x5xf32>
    %162 = vector.extract_strided_slice %160 {offsets = [0, 0], sizes = [1, 683], strides = [1, 1]} : vector<8x683xf32> to vector<1x683xf32>
    %c0_115 = arith.constant 0 : index
    %c0_116 = arith.constant 0 : index
    %c0_117 = arith.constant 0 : index
    %163 = vector.load %arg8[%c0_115, %c0_116, %c0_117] : memref<8x683x5xf32, #tpu.memory_space<vmem>>, vector<1x683x5xf32>
    %164 = vector.shape_cast %163 : vector<1x683x5xf32> to vector<683x5xf32>
    %cst_118 = arith.constant dense<0.000000e+00> : vector<1x5xf32>
    %165 = tpu.matmul %162, %164, %cst_118 {dimension_numbers = #tpu.dot_dimension_numbers<[1], [0], [0], [1], [0, 0, 1, 1], [], []>} : vector<1x683xf32>, vector<683x5xf32>, vector<1x5xf32> -> vector<1x5xf32>
    %166 = arith.addf %161, %165 : vector<1x5xf32>
    %167 = vector.extract_strided_slice %160 {offsets = [1, 0], sizes = [1, 683], strides = [1, 1]} : vector<8x683xf32> to vector<1x683xf32>
    %c1_119 = arith.constant 1 : index
    %c0_120 = arith.constant 0 : index
    %c0_121 = arith.constant 0 : index
    %168 = vector.load %arg8[%c1_119, %c0_120, %c0_121] : memref<8x683x5xf32, #tpu.memory_space<vmem>>, vector<1x683x5xf32>
    %169 = vector.shape_cast %168 : vector<1x683x5xf32> to vector<683x5xf32>
    %cst_122 = arith.constant dense<0.000000e+00> : vector<1x5xf32>
    %170 = tpu.matmul %167, %169, %cst_122 {dimension_numbers = #tpu.dot_dimension_numbers<[1], [0], [0], [1], [0, 0, 1, 1], [], []>} : vector<1x683xf32>, vector<683x5xf32>, vector<1x5xf32> -> vector<1x5xf32>
    %171 = arith.addf %166, %170 : vector<1x5xf32>
    %172 = vector.extract_strided_slice %160 {offsets = [2, 0], sizes = [1, 683], strides = [1, 1]} : vector<8x683xf32> to vector<1x683xf32>
    %c2_123 = arith.constant 2 : index
    %c0_124 = arith.constant 0 : index
    %c0_125 = arith.constant 0 : index
    %173 = vector.load %arg8[%c2_123, %c0_124, %c0_125] : memref<8x683x5xf32, #tpu.memory_space<vmem>>, vector<1x683x5xf32>
    %174 = vector.shape_cast %173 : vector<1x683x5xf32> to vector<683x5xf32>
    %cst_126 = arith.constant dense<0.000000e+00> : vector<1x5xf32>
    %175 = tpu.matmul %172, %174, %cst_126 {dimension_numbers = #tpu.dot_dimension_numbers<[1], [0], [0], [1], [0, 0, 1, 1], [], []>} : vector<1x683xf32>, vector<683x5xf32>, vector<1x5xf32> -> vector<1x5xf32>
    %176 = arith.addf %171, %175 : vector<1x5xf32>
    %177 = vector.extract_strided_slice %160 {offsets = [3, 0], sizes = [1, 683], strides = [1, 1]} : vector<8x683xf32> to vector<1x683xf32>
    %c3_127 = arith.constant 3 : index
    %c0_128 = arith.constant 0 : index
    %c0_129 = arith.constant 0 : index
    %178 = vector.load %arg8[%c3_127, %c0_128, %c0_129] : memref<8x683x5xf32, #tpu.memory_space<vmem>>, vector<1x683x5xf32>
    %179 = vector.shape_cast %178 : vector<1x683x5xf32> to vector<683x5xf32>
    %cst_130 = arith.constant dense<0.000000e+00> : vector<1x5xf32>
    %180 = tpu.matmul %177, %179, %cst_130 {dimension_numbers = #tpu.dot_dimension_numbers<[1], [0], [0], [1], [0, 0, 1, 1], [], []>} : vector<1x683xf32>, vector<683x5xf32>, vector<1x5xf32> -> vector<1x5xf32>
    %181 = arith.addf %176, %180 : vector<1x5xf32>
    %182 = vector.extract_strided_slice %160 {offsets = [4, 0], sizes = [1, 683], strides = [1, 1]} : vector<8x683xf32> to vector<1x683xf32>
    %c4_131 = arith.constant 4 : index
    %c0_132 = arith.constant 0 : index
    %c0_133 = arith.constant 0 : index
    %183 = vector.load %arg8[%c4_131, %c0_132, %c0_133] : memref<8x683x5xf32, #tpu.memory_space<vmem>>, vector<1x683x5xf32>
    %184 = vector.shape_cast %183 : vector<1x683x5xf32> to vector<683x5xf32>
    %cst_134 = arith.constant dense<0.000000e+00> : vector<1x5xf32>
    %185 = tpu.matmul %182, %184, %cst_134 {dimension_numbers = #tpu.dot_dimension_numbers<[1], [0], [0], [1], [0, 0, 1, 1], [], []>} : vector<1x683xf32>, vector<683x5xf32>, vector<1x5xf32> -> vector<1x5xf32>
    %186 = arith.addf %181, %185 : vector<1x5xf32>
    %187 = vector.extract_strided_slice %160 {offsets = [5, 0], sizes = [1, 683], strides = [1, 1]} : vector<8x683xf32> to vector<1x683xf32>
    %c5_135 = arith.constant 5 : index
    %c0_136 = arith.constant 0 : index
    %c0_137 = arith.constant 0 : index
    %188 = vector.load %arg8[%c5_135, %c0_136, %c0_137] : memref<8x683x5xf32, #tpu.memory_space<vmem>>, vector<1x683x5xf32>
    %189 = vector.shape_cast %188 : vector<1x683x5xf32> to vector<683x5xf32>
    %cst_138 = arith.constant dense<0.000000e+00> : vector<1x5xf32>
    %190 = tpu.matmul %187, %189, %cst_138 {dimension_numbers = #tpu.dot_dimension_numbers<[1], [0], [0], [1], [0, 0, 1, 1], [], []>} : vector<1x683xf32>, vector<683x5xf32>, vector<1x5xf32> -> vector<1x5xf32>
    %191 = arith.addf %186, %190 : vector<1x5xf32>
    %192 = vector.extract_strided_slice %160 {offsets = [6, 0], sizes = [1, 683], strides = [1, 1]} : vector<8x683xf32> to vector<1x683xf32>
    %c6_139 = arith.constant 6 : index
    %c0_140 = arith.constant 0 : index
    %c0_141 = arith.constant 0 : index
    %193 = vector.load %arg8[%c6_139, %c0_140, %c0_141] : memref<8x683x5xf32, #tpu.memory_space<vmem>>, vector<1x683x5xf32>
    %194 = vector.shape_cast %193 : vector<1x683x5xf32> to vector<683x5xf32>
    %cst_142 = arith.constant dense<0.000000e+00> : vector<1x5xf32>
    %195 = tpu.matmul %192, %194, %cst_142 {dimension_numbers = #tpu.dot_dimension_numbers<[1], [0], [0], [1], [0, 0, 1, 1], [], []>} : vector<1x683xf32>, vector<683x5xf32>, vector<1x5xf32> -> vector<1x5xf32>
    %196 = arith.addf %191, %195 : vector<1x5xf32>
    %197 = vector.extract_strided_slice %160 {offsets = [7, 0], sizes = [1, 683], strides = [1, 1]} : vector<8x683xf32> to vector<1x683xf32>
    %c7_143 = arith.constant 7 : index
    %c0_144 = arith.constant 0 : index
    %c0_145 = arith.constant 0 : index
    %198 = vector.load %arg8[%c7_143, %c0_144, %c0_145] : memref<8x683x5xf32, #tpu.memory_space<vmem>>, vector<1x683x5xf32>
    %199 = vector.shape_cast %198 : vector<1x683x5xf32> to vector<683x5xf32>
    %cst_146 = arith.constant dense<0.000000e+00> : vector<1x5xf32>
    %200 = tpu.matmul %197, %199, %cst_146 {dimension_numbers = #tpu.dot_dimension_numbers<[1], [0], [0], [1], [0, 0, 1, 1], [], []>} : vector<1x683xf32>, vector<683x5xf32>, vector<1x5xf32> -> vector<1x5xf32>
    %201 = arith.addf %196, %200 : vector<1x5xf32>
    %c0_147 = arith.constant 0 : index
    %c0_148 = arith.constant 0 : index
    %c0_149 = arith.constant 0 : index
    %202 = vector.load %arg10[%c0_147, %c0_148, %c0_149] : memref<1x1x5xf32, #tpu.memory_space<vmem>>, vector<1x1x5xf32>
    %203 = vector.shape_cast %202 : vector<1x1x5xf32> to vector<1x5xf32>
    %204 = vector.shape_cast %201 : vector<1x5xf32> to vector<1x1x5xf32>
    tpu.vector_store %arg10[%c0_147, %c0_148, %c0_149], %204 {strides = array<i32>} : memref<1x1x5xf32, #tpu.memory_space<vmem>>, vector<1x1x5xf32>,
    return
  }
  func.func @transform_0(%arg0: i32) -> (i32, i32, i32) {
    %c0_i32 = arith.constant 0 : i32
    %c0_i32_0 = arith.constant 0 : i32
    %c0_i32_1 = arith.constant 0 : i32
    return %arg0, %c0_i32, %c0_i32_0 : i32, i32, i32
  }
  func.func @transform_1(%arg0: i32) -> (i32, i32, i32) {
    %c0_i32 = arith.constant 0 : i32
    %c0_i32_0 = arith.constant 0 : i32
    %c0_i32_1 = arith.constant 0 : i32
    %c0_i32_2 = arith.constant 0 : i32
    return %c0_i32, %c0_i32_0, %c0_i32_1 : i32, i32, i32
  }
  func.func @transform_2(%arg0: i32) -> (i32, i32) {
    %c0_i32 = arith.constant 0 : i32
    %c0_i32_0 = arith.constant 0 : i32
    %c0_i32_1 = arith.constant 0 : i32
    return %c0_i32, %c0_i32_0 : i32, i32
  }
  func.func @transform_3(%arg0: i32) -> (i32, i32, i32) {
    %c0_i32 = arith.constant 0 : i32
    %c0_i32_0 = arith.constant 0 : i32
    %c0_i32_1 = arith.constant 0 : i32
    %c0_i32_2 = arith.constant 0 : i32
    return %c0_i32, %c0_i32_0, %c0_i32_1 : i32, i32, i32
  }
  func.func @transform_4(%arg0: i32) -> (i32, i32) {
    %c0_i32 = arith.constant 0 : i32
    %c0_i32_0 = arith.constant 0 : i32
    %c0_i32_1 = arith.constant 0 : i32
    return %c0_i32, %c0_i32_0 : i32, i32
  }
  func.func @transform_5(%arg0: i32) -> (i32, i32, i32) {
    %c0_i32 = arith.constant 0 : i32
    %c0_i32_0 = arith.constant 0 : i32
    %c0_i32_1 = arith.constant 0 : i32
    %c0_i32_2 = arith.constant 0 : i32
    return %c0_i32, %c0_i32_0, %c0_i32_1 : i32, i32, i32
  }
  func.func @transform_6(%arg0: i32) -> (i32, i32) {
    %c0_i32 = arith.constant 0 : i32
    %c0_i32_0 = arith.constant 0 : i32
    %c0_i32_1 = arith.constant 0 : i32
    return %c0_i32, %c0_i32_0 : i32, i32
  }
  func.func @transform_7(%arg0: i32) -> (i32, i32, i32) {
    %c0_i32 = arith.constant 0 : i32
    %c0_i32_0 = arith.constant 0 : i32
    %c0_i32_1 = arith.constant 0 : i32
    %c0_i32_2 = arith.constant 0 : i32
    return %c0_i32, %c0_i32_0, %c0_i32_1 : i32, i32, i32
  }
  func.func @transform_8(%arg0: i32) -> (i32, i32) {
    %c0_i32 = arith.constant 0 : i32
    %c0_i32_0 = arith.constant 0 : i32
    %c0_i32_1 = arith.constant 0 : i32
    return %c0_i32, %c0_i32_0 : i32, i32
  }
  func.func @transform_9(%arg0: i32) -> (i32, i32, i32) {
    %c0_i32 = arith.constant 0 : i32
    %c0_i32_0 = arith.constant 0 : i32
    %c0_i32_1 = arith.constant 0 : i32
    return %arg0, %c0_i32, %c0_i32_0 : i32, i32, i32
  }
}

</mosaic_0001>

<bundles_post_ra>
// kernel: _lambda_.1
= control target key start
LH: loop header
LB: loop body
LE: loop exit
PB: predicated region body
PF: predicated region fallthrough
CT: control target
= control target key end

     0   :  { %14 = vsyncpa [#allocation3], 0  ;;  %s17443_s0 = inlined_call_operand.vmem [shape: f32[2,3,900], index: 0, kind: input, shape index: {}]   ;;  %s17444_s1 = inlined_call_operand.vmem [shape: f32[9,4,3], index: 1, kind: input, shape index: {}]   ;;  %s17445_s2 = inlined_call_operand.vmem [shape: f32[4,1], index: 2, kind: input, shape index: {}]   ;;  %s17446_s3 = inlined_call_operand.vmem [shape: f32[9,8,4], index: 3, kind: input, shape index: {}]   ;;  %s17447_s4 = inlined_call_operand.vmem [shape: f32[8,1], index: 4, kind: input, shape index: {}]   ;;  %s17448_s5 = inlined_call_operand.vmem [shape: f32[9,8,8], index: 5, kind: input, shape index: {}]   ;;  %s17449_s6 = inlined_call_operand.vmem [shape: f32[8,1], index: 6, kind: input, shape index: {}]   ;;  %s17450_s7 = inlined_call_operand.vmem [shape: f32[8,683,5], index: 7, kind: input, shape index: {}]   ;;  %s17451_s8 = inlined_call_operand.vmem [shape: f32[1,5], index: 8, kind: input, shape index: {}]   ;;  %s17452_s9 = inlined_call_operand.hbm [shape: f32[2,1,5], index: 9, kind: output, shape index: {}]  }
   0x1   :  { %16 = vsyncpa [#allocation3 + $0x1], 0  ;;  %s13852_s30 = smov 0   ;;  %s13854_s10 = smov 0  }
   0x2   :  { %s13856_s11 = smov 0   ;;  %s13858_s12 = smov 0  }
   0x3 LB: > { %s13873_s13 = sadd.s32 4294967295, %s13786_s12   ;;  %s11132_s14 = sadd.s32 4294967294, %s13786_s12   ;;  %s13786_s12 = sphi %s13858_s12, %s17460_s12   ;;  %s13782_s11 = sphi %s13856_s11, %s17459_s11   ;;  %s13778_s10 = sphi %s13854_s10, %s17458_s10   ;;  %s13774_s30 = sphi %s13852_s30, %s17457_s30  }
   0x4   : > { %s13877_s15 = sadd.s32 1, %s13786_s12   ;;  %s223_s16 = sadd.s32 1, %s13782_s11 }
   0x5   : > { %s220_s17 = ssub.s32 %s13786_s12, %s13877_s15  ;;  %p233_p0 = scmp.ne.s32.totalorder %s13782_s11, %s13778_s10 }
   0x6   : > { %p221_p1 = scmp.eq.s32.totalorder %s220_s17, 0  ;;  %p234_p2 = scmp.eq.s32.totalorder %s13873_s13, 1 }
   0x7   : > { %p239_p3 = scmp.ne.s32.totalorder %s13778_s10, %s13774_s30  ;;  %p240_p4 = scmp.eq.s32.totalorder %s11132_s14, 1 }
   0x8   : > { %s13888_s18 = scalar_select %p221_p1, %s13782_s11, %s223_s16  }
   0x9   : > { %p13890_p5 = por %p234_p2, %p233_p0  ;;  %p13894_p6 = por %p240_p4, %p239_p3 }
   0xa   : > { %p11135_p7 = scmp.ge.s32.totalorder %s13786_s12, 1  ;;  %p290_p8 = scmp.lt.s32.totalorder %s13786_s12, 3 }
   0xc   : > { %p291_p9 = pnand %p11135_p7, %p290_p8 }
   0xd   : > { %p325_p10 = scmp.lt.s32.totalorder (!%p291_p9), %s13873_s13, 1  ;;  %v13788_v0 = vmov (!%p291_p9), 0.0   ;;  %s13789_s26 = smov (!%p291_p9), 127   ;;  %v13797_v9 = vmov (!%p291_p9), 0   ;;  %v3287_v10 = vld [vmem:[%s17445_s2] sm:$0xf] (!%p291_p9) }
   0xe   : > { %294 = sbr.rel (%p291_p9) target bundleno = 2235 (0x8bb), region = 56  ;;  %448 = vmatprep.mubr.f32.mxu0 (!%p291_p9), %v13788_v0  ;;  %519 = vmatprep.mubr.f32.mxu1 (!%p291_p9), %v13788_v0  ;;  %s13790_s27 = smov (!%p291_p9), 126   ;;  %vm358_vm0 = vcmask (!%p291_p9), 1039360   ;;  %vm369_vm1 = vcmask (!%p291_p9), 1042432   ;;  %v11138_v17 = vld [vmem:[%s17444_s1 + $0x4] sm:$0xf] (!%p291_p9) }
   0xf   : > { %s13791_s28 = smov (!%p291_p9), 98   ;;  %s13792_s29 = smov (!%p291_p9), 97   ;;  %13698 = vset.pattern.permute.xlu1 (!%p291_p9), %v13797_v9  ;;  %13699 = vset.pattern.permute.xlu0 (!%p291_p9), %v13797_v9  ;;  %vm365_vm2 = vcmask (!%p291_p9), 23552   ;;  %vm13798_vm3 = vmmov (!%p291_p9), 0   ;;  %v334_v28 = vld [vmem:[%s17444_s1] sm:$0xf] (!%p291_p9) }
  0x10   : > { %s13793_s14 = smov (!%p291_p9), 96   ;;  %s13794_s16 = smov (!%p291_p9), 68   ;;  %vm983_vm4 = vcmask (!%p291_p9), 1031168   ;;  %v11161_v38 = vld [vmem:[%s17444_s1 + $0x8] sm:$0xf] (!%p291_p9)  ;;  %vm1313_vm5 = vcmask (!%p291_p9), 801792  }
  0x11   : > { %s13795_s17 = smov (!%p291_p9), 67   ;;  %v11173_v47 = vld [vmem:[%s17444_s1 + $0xc] sm:$0xf] (!%p291_p9)  ;;  %vm1643_vm6 = vcmask (!%p291_p9), 793600   ;;  %v11185_v63 = vld [vmem:[%s17444_s1 + $0x10] sm:$0xf] (!%p291_p9) }
  0x12   : > { %vm1973_vm7 = vcmask (!%p291_p9), 785408   ;;  %vm2306_vm8 = vcmask (!%p291_p9), 556032   ;;  %vm2639_vm9 = vcmask (!%p291_p9), 547840   ;;  %vm2972_vm10 = vcmask (!%p291_p9), 539648  }
  0x13   : > { %vm3341_vm11 = vcmask (!%p291_p9), 1043456   ;;  %vm3337_vm12 = vcmask (!%p291_p9), 31744   ;;  %vm6294_vm13 = vcmask (!%p291_p9), 64512   ;;  %vm13800_vm14 = vmmov (!%p291_p9), 1  }
  0x14   : > { %vm15265_vm15 = vmpackc.low (!%p291_p9), %vm369_vm1, %vm13800_vm14 }
  0x15   : > { %s326_s21 = scalar_select %p325_p10, %s13873_s13, 1 }
  0x17   : > { %s12008_s22 = sshll.u32 %s326_s21, 5  ;;  %s13796_s21 = smov 66  }
  0x18   : > { %s329_s25 = scalar_lea.vmem %s17443_s0, %s12008_s22 }
  0x19   : > { %v13907_v1 = vld [vmem:[%s329_s25 + $0x10] sm:$0x77]  ;;  %v13909_v2 = vld [vmem:[%s329_s25 + $0x8] sm:$0x77]  ;;  %v13911_v3 = vld [vmem:[%s329_s25] sm:$0x77] }
  0x1a   : > { %352 = vrot.lane.b32.xlu0 %v13907_v1, %s13789_s26  ;;  %348 = vrot.lane.b32.xlu1 %v13909_v2, %s13789_s26  ;;  %v13919_v4 = vcombine.high %v13911_v3, %v13911_v3  ;;  %v13927_v5 = vcombine.high %v13909_v2, %v13909_v2  ;;  %v13931_v6 = vcombine.high %v13907_v1, %v13907_v1  ;;  %v13937_v7 = vld [vmem:[%s329_s25 + $0x18] sm:$0x77] }
  0x1b   : > { %v2289_v8 = vcombine.high %v13937_v7, %v13937_v7 }
  0x1e   : > { %344 = vrot.lane.b32.xlu0 %v13911_v3, %s13789_s26  ;;  %346 = vrot.lane.b32.xlu1 %v13919_v4, %s13789_s26 }
  0x22   : > { %350 = vrot.lane.b32.xlu0 %v13927_v5, %s13789_s26  ;;  %354 = vrot.lane.b32.xlu1 %v13931_v6, %s13789_s26 }
  0x26   : > { %356 = vrot.lane.b32.xlu0 %v13937_v7, %s13789_s26  ;;  %975 = vrot.lane.b32.xlu1 %v13927_v5, %s13790_s27 }
  0x2a   : > { %977 = vrot.lane.b32.xlu0 %v13907_v1, %s13790_s27  ;;  %971 = vrot.lane.b32.xlu1 %v13919_v4, %s13790_s27 }
  0x2e   : > { %973 = vrot.lane.b32.xlu0 %v13909_v2, %s13790_s27  ;;  %969 = vrot.lane.b32.xlu1 %v13911_v3, %s13790_s27 }
  0x32   : > { %979 = vrot.lane.b32.xlu0 %v13931_v6, %s13790_s27  ;;  %981 = vrot.lane.b32.xlu1 %v13937_v7, %s13790_s27 }
  0x36   : > { %1305 = vrot.lane.b32.xlu0 %v13927_v5, %s13791_s28  ;;  %1307 = vrot.lane.b32.xlu1 %v13907_v1, %s13791_s28 }
  0x3a   : > { %1301 = vrot.lane.b32.xlu0 %v13919_v4, %s13791_s28  ;;  %1303 = vrot.lane.b32.xlu1 %v13909_v2, %s13791_s28 }
  0x3e   : > { %1299 = vrot.lane.b32.xlu0 %v13911_v3, %s13791_s28  ;;  %1309 = vrot.lane.b32.xlu1 %v13931_v6, %s13791_s28 }
  0x42   : > { %1311 = vrot.lane.b32.xlu0 %v13937_v7, %s13791_s28  ;;  %1635 = vrot.lane.b32.xlu1 %v13927_v5, %s13792_s29 }
  0x46   : > { %1637 = vrot.lane.b32.xlu0 %v13907_v1, %s13792_s29  ;;  %1631 = vrot.lane.b32.xlu1 %v13919_v4, %s13792_s29 }
  0x4a   : > { %1633 = vrot.lane.b32.xlu0 %v13909_v2, %s13792_s29  ;;  %1629 = vrot.lane.b32.xlu1 %v13911_v3, %s13792_s29 }
  0x4e   : > { %1639 = vrot.lane.b32.xlu0 %v13931_v6, %s13792_s29  ;;  %1641 = vrot.lane.b32.xlu1 %v13937_v7, %s13792_s29 }
  0x52   : > { %1965 = vrot.lane.b32.xlu0 %v13927_v5, %s13793_s14  ;;  %1967 = vrot.lane.b32.xlu1 %v13907_v1, %s13793_s14 }
  0x56   : > { %1961 = vrot.lane.b32.xlu0 %v13919_v4, %s13793_s14  ;;  %1963 = vrot.lane.b32.xlu1 %v13909_v2, %s13793_s14 }
  0x5a   : > { %1959 = vrot.lane.b32.xlu0 %v13911_v3, %s13793_s14  ;;  %1969 = vrot.lane.b32.xlu1 %v13931_v6, %s13793_s14 }
  0x5e   : > { %1971 = vrot.lane.b32.xlu0 %v13937_v7, %s13793_s14  ;;  %2296 = vrot.lane.b32.xlu1 %v13927_v5, %s13794_s16 }
  0x62   : > { %2298 = vrot.lane.b32.xlu0 %v13907_v1, %s13794_s16  ;;  %2292 = vrot.lane.b32.xlu1 %v13919_v4, %s13794_s16 }
  0x66   : > { %2294 = vrot.lane.b32.xlu0 %v13909_v2, %s13794_s16  ;;  %2290 = vrot.lane.b32.xlu1 %v13911_v3, %s13794_s16 }
  0x6a   : > { %2300 = vrot.lane.b32.xlu0 %v13931_v6, %s13794_s16  ;;  %2302 = vrot.lane.b32.xlu1 %v13937_v7, %s13794_s16 }
  0x6e   : > { %2304 = vrot.lane.b32.xlu0 %v2289_v8, %s13794_s16  ;;  %2629 = vrot.lane.b32.xlu1 %v13927_v5, %s13795_s17 }
  0x72   : > { %2631 = vrot.lane.b32.xlu0 %v13907_v1, %s13795_s17  ;;  %2625 = vrot.lane.b32.xlu1 %v13919_v4, %s13795_s17 }
  0x76   : > { %2627 = vrot.lane.b32.xlu0 %v13909_v2, %s13795_s17  ;;  %2623 = vrot.lane.b32.xlu1 %v13911_v3, %s13795_s17 }
  0x7a   : > { %2633 = vrot.lane.b32.xlu0 %v13931_v6, %s13795_s17  ;;  %2635 = vrot.lane.b32.xlu1 %v13937_v7, %s13795_s17 }
  0x7e   : > { %2637 = vrot.lane.b32.xlu0 %v2289_v8, %s13795_s17  ;;  %2962 = vrot.lane.b32.xlu1 %v13927_v5, %s13796_s21 }
  0x82   : > { %2964 = vrot.lane.b32.xlu0 %v13907_v1, %s13796_s21  ;;  %2958 = vrot.lane.b32.xlu1 %v13919_v4, %s13796_s21 }
  0x86   : > { %2960 = vrot.lane.b32.xlu0 %v13909_v2, %s13796_s21  ;;  %2956 = vrot.lane.b32.xlu1 %v13911_v3, %s13796_s21 }
  0x8a   : > { %2966 = vrot.lane.b32.xlu0 %v13931_v6, %s13796_s21  ;;  %2968 = vrot.lane.b32.xlu1 %v13937_v7, %s13796_s21 }
  0x8c   : > { %v353_v11 = vpop.permute.xlu0 %352  ;;  %v349_v12 = vpop.permute.xlu1 %348 }
  0x8e   : > { %2970 = vrot.lane.b32.xlu0 %v2289_v8, %s13796_s21  ;;  %3290 = vperm.xlu1 %13698, %v3287_v10   ;;  %v11197_v10 = vld [vmem:[%s17444_s1 + $0x14] sm:$0xf] }
  0x90   : > { %v345_v13 = vpop.permute.xlu0 %344  ;;  %v347_v14 = vpop.permute.xlu1 %346 }
  0x91   : > { %v360_v15 = vsel %vm358_vm0, %v347_v14, %v349_v12  ;;  %v359_v16 = vsel %vm358_vm0, %v345_v13, %v347_v14 }
  0x92   : > { %11139 = vmatprep.subr.msk.mxu0 %vm369_vm1, %v360_v15 }
  0x93   : > { %11140 = vmatpush1.msk.msra.mxu0 %vm369_vm1, %v359_v16 }
  0x94   : > { %v351_v18 = vpop.permute.xlu0 %350  ;;  %v355_v19 = vpop.permute.xlu1 %354  ;;  %11141 = vmatmul.mubr.msk.f32.vlgmr.msra.gmra.mrb[0].mxu0 %vm365_vm2, %v11138_v17 }
  0x95   : > { %v362_v20 = vsel %vm358_vm0, %v351_v18, %v353_v11  ;;  %v361_v21 = vsel %vm358_vm0, %v349_v12, %v351_v18  ;;  %590 = vmatprep.mubr.f32.mxu0 %v13788_v0  ;;  %v363_v25 = vsel %vm358_vm0, %v353_v11, %v355_v19 }
  0x96   : > { %11142 = vmatprep.subr.msk.mxu1 %vm369_vm1, %v362_v20 }
  0x97   : > { %11143 = vmatpush1.msk.msra.mxu1 %vm369_vm1, %v361_v21 }
  0x98   : > { %11144 = vmatmul.mubr.msk.f32.vlgmr.msra.gmra.mrb[0].mxu1 %vm365_vm2, %v11138_v17  ;;  %12605 = vmatprep.subr.mxu1 %v13788_v0  ;;  %v357_v22 = vpop.permute.xlu0 %356  ;;  %v976_v23 = vpop.permute.xlu1 %975 }
  0x99   : > { %12606 = vmatpush3.msk.msra.mxu1 %vm369_vm1, %v357_v22  ;;  %v364_v24 = vsel %vm358_vm0, %v355_v19, %v357_v22  ;;  %12607 = vmatprep.mubr.msk.f32.mxu1 %vm13798_vm3, %v13788_v0 }
  0x9a   : > { %11145 = vmatprep.subr.msk.mxu0 %vm369_vm1, %v364_v24  ;;  %11153 = vmatprep.subr.msk.mxu1 %vm369_vm1, %v13927_v5 }
  0x9b   : > { %11146 = vmatpush1.msk.msra.mxu0 %vm369_vm1, %v363_v25  ;;  %v11209_v25 = vld [vmem:[%s17444_s1 + $0x18] sm:$0xf] }
  0x9c   : > { %12608 = vmatmul.mubr.msk.f32.vlgmr.msra.gmra.mrb[2].mxu1 %vm365_vm2, %v11138_v17  ;;  %v978_v26 = vpop.permute.xlu0 %977  ;;  %11147 = vmatmul.mubr.msk.f32.vlgmr.msra.gmra.mrb[2].mxu0 %vm365_vm2, %v11138_v17  ;;  %v972_v27 = vpop.permute.xlu1 %971 }
  0x9d   : > { %11150 = vmatprep.subr.msk.mxu0 %vm369_vm1, %v13919_v4  ;;  %11154 = vmatpush1.msk.msra.mxu1 %vm369_vm1, %v13909_v2  ;;  %v987_v31 = vsel %vm983_vm4, %v976_v23, %v978_v26 }
  0x9e   : > { %11151 = vmatpush1.msk.msra.mxu0 %vm369_vm1, %v13911_v3  ;;  %748 = vmatprep.mubr.f32.mxu0 %v13788_v0 }
  0x9f   : > { %819 = vmatprep.mubr.f32.mxu1 %v13788_v0  ;;  %12610 = vmatprep.subr.mxu1 %v13788_v0 }
  0xa0   : > { %11155 = vmatmul.mubr.msk.f32.vlgmr.msra.gmra.mrb[0].mxu1 %vm365_vm2, %v334_v28  ;;  %v974_v29 = vpop.permute.xlu0 %973  ;;  %11152 = vmatmul.mubr.msk.f32.vlgmr.msra.gmra.mrb[0].mxu0 %vm365_vm2, %v334_v28  ;;  %v970_v30 = vpop.permute.xlu1 %969 }
  0xa1   : > { %12611 = vmatpush3.msk.msra.mxu1 %vm369_vm1, %v13937_v7  ;;  %11156 = vmatprep.subr.msk.mxu0 %vm369_vm1, %v13931_v6  ;;  %v985_v32 = vsel %vm983_vm4, %v972_v27, %v974_v29  ;;  %v984_v33 = vsel %vm983_vm4, %v970_v30, %v972_v27  ;;  %v986_v36 = vsel %vm983_vm4, %v974_v29, %v976_v23 }
  0xa2   : > { %11157 = vmatpush1.msk.msra.mxu0 %vm369_vm1, %v13907_v1  ;;  %11165 = vmatprep.subr.msk.mxu1 %vm369_vm1, %v987_v31 }
  0xa3   : > { %11162 = vmatprep.subr.msk.mxu0 %vm369_vm1, %v985_v32  ;;  %890 = vmatprep.mubr.f32.mxu0 %v13788_v0 }
  0xa4   : > { %12612 = vmatprep.mubr.msk.f32.mxu1 %vm13798_vm3, %v13788_v0  ;;  %v980_v34 = vpop.permute.xlu0 %979  ;;  %11158 = vmatmul.mubr.msk.f32.vlgmr.msra.gmra.mrb[2].mxu0 %vm365_vm2, %v334_v28  ;;  %v982_v35 = vpop.permute.xlu1 %981 }
  0xa5   : > { %12613 = vmatmul.mubr.msk.f32.vlgmr.msra.gmra.mrb[4].mxu1 %vm365_vm2, %v334_v28  ;;  %11163 = vmatpush1.msk.msra.mxu0 %vm369_vm1, %v984_v33  ;;  %v989_v37 = vsel %vm983_vm4, %v980_v34, %v982_v35  ;;  %v988_v39 = vsel %vm983_vm4, %v978_v26, %v980_v34 }
  0xa6   : > { %11166 = vmatpush1.msk.msra.mxu1 %vm369_vm1, %v986_v36  ;;  %11168 = vmatprep.subr.msk.mxu0 %vm369_vm1, %v989_v37 }
  0xa7   : > { %1071 = vmatprep.mubr.f32.mxu0 %v13788_v0  ;;  %1142 = vmatprep.mubr.f32.mxu1 %v13788_v0 }
  0xa8   : > { %12615 = vmatprep.subr.mxu1 %v13788_v0  ;;  %v1306_v40 = vpop.permute.xlu0 %1305  ;;  %11164 = vmatmul.mubr.msk.f32.vlgmr.msra.gmra.mrb[0].mxu0 %vm365_vm2, %v11161_v38  ;;  %v1308_v41 = vpop.permute.xlu1 %1307 }
  0xa9   : > { %11167 = vmatmul.mubr.msk.f32.vlgmr.msra.gmra.mrb[0].mxu1 %vm365_vm2, %v11161_v38  ;;  %11169 = vmatpush1.msk.msra.mxu0 %vm369_vm1, %v988_v39  ;;  %v1317_v42 = vsel %vm1313_vm5, %v1306_v40, %v1308_v41 }
  0xaa   : > { %12616 = vmatpush3.msk.msra.mxu1 %vm369_vm1, %v982_v35  ;;  %12617 = vmatprep.mubr.msk.f32.mxu1 %vm13798_vm3, %v13788_v0 }
  0xab   : > { %11177 = vmatprep.subr.msk.mxu1 %vm369_vm1, %v1317_v42  ;;  %1213 = vmatprep.mubr.f32.mxu0 %v13788_v0 }
  0xac   : > { %v1302_v43 = vpop.permute.xlu0 %1301  ;;  %v1304_v44 = vpop.permute.xlu1 %1303  ;;  %11170 = vmatmul.mubr.msk.f32.vlgmr.msra.gmra.mrb[2].mxu0 %vm365_vm2, %v11161_v38 }
  0xad   : > { %v1316_v45 = vsel %vm1313_vm5, %v1304_v44, %v1306_v40  ;;  %12618 = vmatmul.mubr.msk.f32.vlgmr.msra.gmra.mrb[6].mxu1 %vm365_vm2, %v11161_v38  ;;  %v1315_v46 = vsel %vm1313_vm5, %v1302_v43, %v1304_v44  ;;  %1401 = vmatprep.mubr.f32.mxu0 %v13788_v0 }
  0xae   : > { %11174 = vmatprep.subr.msk.mxu0 %vm369_vm1, %v1315_v46  ;;  %11178 = vmatpush1.msk.msra.mxu1 %vm369_vm1, %v1316_v45 }
  0xaf   : > { %1472 = vmatprep.mubr.f32.mxu1 %v13788_v0  ;;  %12620 = vmatprep.subr.mxu1 %v13788_v0 }
  0xb0   : > { %v1300_v48 = vpop.permute.xlu0 %1299  ;;  %v1310_v49 = vpop.permute.xlu1 %1309 }
  0xb1   : > { %v1314_v50 = vsel %vm1313_vm5, %v1300_v48, %v1302_v43  ;;  %11179 = vmatmul.mubr.msk.f32.vlgmr.msra.gmra.mrb[0].mxu1 %vm365_vm2, %v11173_v47  ;;  %v1318_v54 = vsel %vm1313_vm5, %v1308_v41, %v1310_v49  ;;  %v11221_v41 = vld [vmem:[%s17444_s1 + $0x1c] sm:$0xf] }
  0xb2   : > { %11175 = vmatpush1.msk.msra.mxu0 %vm369_vm1, %v1314_v50  ;;  %12622 = vmatprep.mubr.msk.f32.mxu1 %vm13798_vm3, %v13788_v0 }
  0xb3   : > { %11176 = vmatmul.mubr.msk.f32.vlgmr.msra.gmra.mrb[0].mxu0 %vm365_vm2, %v11173_v47 }
  0xb4   : > { %v1312_v51 = vpop.permute.xlu0 %1311  ;;  %v1636_v52 = vpop.permute.xlu1 %1635  ;;  %1543 = vmatprep.mubr.f32.mxu0 %v13788_v0 }
  0xb5   : > { %12621 = vmatpush3.msk.msra.mxu1 %vm369_vm1, %v1312_v51  ;;  %v1319_v53 = vsel %vm1313_vm5, %v1310_v49, %v1312_v51 }
  0xb6   : > { %11180 = vmatprep.subr.msk.mxu0 %vm369_vm1, %v1319_v53  ;;  %12623 = vmatmul.mubr.msk.f32.vlgmr.msra.gmra.mrb[8].mxu1 %vm365_vm2, %v11173_v47 }
  0xb7   : > { %11181 = vmatpush1.msk.msra.mxu0 %vm369_vm1, %v1318_v54  ;;  %1802 = vmatprep.mubr.f32.mxu1 %v13788_v0 }
  0xb8   : > { %v1638_v55 = vpop.permute.xlu0 %1637  ;;  %v1632_v56 = vpop.permute.xlu1 %1631  ;;  %11182 = vmatmul.mubr.msk.f32.vlgmr.msra.gmra.mrb[2].mxu0 %vm365_vm2, %v11173_v47 }
  0xb9   : > { %v1647_v57 = vsel %vm1643_vm6, %v1636_v52, %v1638_v55  ;;  %1731 = vmatprep.mubr.f32.mxu0 %v13788_v0 }
  0xba   : > { %11189 = vmatprep.subr.msk.mxu1 %vm369_vm1, %v1647_v57  ;;  %v11233_v57 = vld [vmem:[%s17444_s1 + $0x20] sm:$0xf] }
  0xbc   : > { %v1634_v58 = vpop.permute.xlu0 %1633  ;;  %v1630_v59 = vpop.permute.xlu1 %1629 }
  0xbd   : > { %v1646_v60 = vsel %vm1643_vm6, %v1634_v58, %v1636_v52  ;;  %v1644_v61 = vsel %vm1643_vm6, %v1630_v59, %v1632_v56  ;;  %v1645_v62 = vsel %vm1643_vm6, %v1632_v56, %v1634_v58 }
  0xbe   : > { %11186 = vmatprep.subr.msk.mxu0 %vm369_vm1, %v1645_v62  ;;  %11190 = vmatpush1.msk.msra.mxu1 %vm369_vm1, %v1646_v60 }
  0xbf   : > { %11187 = vmatpush1.msk.msra.mxu0 %vm369_vm1, %v1644_v61  ;;  %12625 = vmatprep.subr.mxu1 %v13788_v0 }
  0xc0   : > { %v1640_v1 = vpop.permute.xlu0 %1639  ;;  %v1642_v2 = vpop.permute.xlu1 %1641  ;;  %11191 = vmatmul.mubr.msk.f32.vlgmr.msra.gmra.mrb[0].mxu1 %vm365_vm2, %v11185_v63  ;;  %11188 = vmatmul.mubr.msk.f32.vlgmr.msra.gmra.mrb[0].mxu0 %vm365_vm2, %v11185_v63 }
  0xc1   : > { %v1648_v3 = vsel %vm1643_vm6, %v1638_v55, %v1640_v1  ;;  %v1649_v4 = vsel %vm1643_vm6, %v1640_v1, %v1642_v2  ;;  %12626 = vmatpush3.msk.msra.mxu1 %vm369_vm1, %v1642_v2  ;;  %12627 = vmatprep.mubr.msk.f32.mxu1 %vm13798_vm3, %v13788_v0 }
  0xc2   : > { %11192 = vmatprep.subr.msk.mxu0 %vm369_vm1, %v1649_v4  ;;  %1873 = vmatprep.mubr.f32.mxu0 %v13788_v0 }
  0xc3   : > { %11193 = vmatpush1.msk.msra.mxu0 %vm369_vm1, %v1648_v3 }
  0xc4   : > { %v1966_v5 = vpop.permute.xlu0 %1965  ;;  %v1968_v6 = vpop.permute.xlu1 %1967  ;;  %12628 = vmatmul.mubr.msk.f32.vlgmr.msra.gmra.mrb[10].mxu1 %vm365_vm2, %v11185_v63  ;;  %11194 = vmatmul.mubr.msk.f32.vlgmr.msra.gmra.mrb[2].mxu0 %vm365_vm2, %v11185_v63 }
  0xc5   : > { %v1977_v7 = vsel %vm1973_vm7, %v1966_v5, %v1968_v6  ;;  %2132 = vmatprep.mubr.f32.mxu1 %v13788_v0  ;;  %2061 = vmatprep.mubr.f32.mxu0 %v13788_v0 }
  0xc6   : > { %11201 = vmatprep.subr.msk.mxu1 %vm369_vm1, %v1977_v7 }
  0xc8   : > { %v1962_v8 = vpop.permute.xlu0 %1961  ;;  %v1964_v9 = vpop.permute.xlu1 %1963 }
  0xc9   : > { %v1976_v11 = vsel %vm1973_vm7, %v1964_v9, %v1966_v5  ;;  %v1975_v12 = vsel %vm1973_vm7, %v1962_v8, %v1964_v9 }
  0xca   : > { %11198 = vmatprep.subr.msk.mxu0 %vm369_vm1, %v1975_v12  ;;  %11202 = vmatpush1.msk.msra.mxu1 %vm369_vm1, %v1976_v11 }
  0xcb   : > { %11203 = vmatmul.mubr.msk.f32.vlgmr.msra.gmra.mrb[0].mxu1 %vm365_vm2, %v11197_v10  ;;  %12630 = vmatprep.subr.mxu1 %v13788_v0 }
  0xcc   : > { %v1960_v13 = vpop.permute.xlu0 %1959  ;;  %v1970_v14 = vpop.permute.xlu1 %1969  ;;  %12632 = vmatprep.mubr.msk.f32.mxu1 %vm13798_vm3, %v13788_v0 }
  0xcd   : > { %v1974_v15 = vsel %vm1973_vm7, %v1960_v13, %v1962_v8  ;;  %v1978_v19 = vsel %vm1973_vm7, %v1968_v6, %v1970_v14 }
  0xce   : > { %11199 = vmatpush1.msk.msra.mxu0 %vm369_vm1, %v1974_v15 }
  0xcf   : > { %11200 = vmatmul.mubr.msk.f32.vlgmr.msra.gmra.mrb[0].mxu0 %vm365_vm2, %v11197_v10 }
  0xd0   : > { %v1972_v16 = vpop.permute.xlu0 %1971  ;;  %v2297_v17 = vpop.permute.xlu1 %2296  ;;  %2203 = vmatprep.mubr.f32.mxu0 %v13788_v0 }
  0xd1   : > { %12631 = vmatpush3.msk.msra.mxu1 %vm369_vm1, %v1972_v16  ;;  %v1979_v18 = vsel %vm1973_vm7, %v1970_v14, %v1972_v16 }
  0xd2   : > { %11204 = vmatprep.subr.msk.mxu0 %vm369_vm1, %v1979_v18  ;;  %12633 = vmatmul.mubr.msk.f32.vlgmr.msra.gmra.mrb[12].mxu1 %vm365_vm2, %v11197_v10 }
  0xd3   : > { %11205 = vmatpush1.msk.msra.mxu0 %vm369_vm1, %v1978_v19  ;;  %2466 = vmatprep.mubr.f32.mxu1 %v13788_v0 }
  0xd4   : > { %v2299_v20 = vpop.permute.xlu0 %2298  ;;  %v2293_v21 = vpop.permute.xlu1 %2292  ;;  %11206 = vmatmul.mubr.msk.f32.vlgmr.msra.gmra.mrb[2].mxu0 %vm365_vm2, %v11197_v10 }
  0xd5   : > { %v2310_v22 = vsel %vm2306_vm8, %v2297_v17, %v2299_v20  ;;  %2395 = vmatprep.mubr.f32.mxu0 %v13788_v0 }
  0xd6   : > { %11213 = vmatprep.subr.msk.mxu1 %vm369_vm1, %v2310_v22 }
  0xd8   : > { %v2295_v23 = vpop.permute.xlu0 %2294  ;;  %v2291_v24 = vpop.permute.xlu1 %2290 }
  0xd9   : > { %v2309_v26 = vsel %vm2306_vm8, %v2295_v23, %v2297_v17  ;;  %v2307_v27 = vsel %vm2306_vm8, %v2291_v24, %v2293_v21  ;;  %v2308_v28 = vsel %vm2306_vm8, %v2293_v21, %v2295_v23 }
  0xda   : > { %11210 = vmatprep.subr.msk.mxu0 %vm369_vm1, %v2308_v28  ;;  %11214 = vmatpush1.msk.msra.mxu1 %vm369_vm1, %v2309_v26 }
  0xdb   : > { %11211 = vmatpush1.msk.msra.mxu0 %vm369_vm1, %v2307_v27  ;;  %11215 = vmatmul.mubr.msk.f32.vlgmr.msra.gmra.mrb[0].mxu1 %vm365_vm2, %v11209_v25 }
  0xdc   : > { %v2301_v29 = vpop.permute.xlu0 %2300  ;;  %v2303_v30 = vpop.permute.xlu1 %2302  ;;  %11212 = vmatmul.mubr.msk.f32.vlgmr.msra.gmra.mrb[0].mxu0 %vm365_vm2, %v11209_v25  ;;  %12635 = vmatprep.subr.mxu1 %v13788_v0 }
  0xdd   : > { %v2311_v31 = vsel %vm2306_vm8, %v2299_v20, %v2301_v29  ;;  %v2312_v32 = vsel %vm2306_vm8, %v2301_v29, %v2303_v30  ;;  %12637 = vmatprep.mubr.msk.f32.mxu1 %vm13798_vm3, %v13788_v0  ;;  %2537 = vmatprep.mubr.f32.mxu0 %v13788_v0 }
  0xde   : > { %11216 = vmatprep.subr.msk.mxu0 %vm369_vm1, %v2312_v32 }
  0xdf   : > { %11217 = vmatpush1.msk.msra.mxu0 %vm369_vm1, %v2311_v31 }
  0xe0   : > { %v2305_v33 = vpop.permute.xlu0 %2304  ;;  %v2630_v34 = vpop.permute.xlu1 %2629  ;;  %11218 = vmatmul.mubr.msk.f32.vlgmr.msra.gmra.mrb[2].mxu0 %vm365_vm2, %v11209_v25 }
  0xe1   : > { %v2313_v35 = vsel %vm2306_vm8, %v2303_v30, %v2305_v33  ;;  %2728 = vmatprep.mubr.f32.mxu0 %v13788_v0 }
  0xe2   : > { %12636 = vmatpush3.msk.msra.mxu1 %vm369_vm1, %v2313_v35 }
  0xe3   : > { %12638 = vmatmul.mubr.msk.f32.vlgmr.msra.gmra.mrb[14].mxu1 %vm365_vm2, %v11209_v25 }
  0xe4   : > { %v2632_v36 = vpop.permute.xlu0 %2631  ;;  %v2626_v37 = vpop.permute.xlu1 %2625  ;;  %2799 = vmatprep.mubr.f32.mxu1 %v13788_v0 }
  0xe5   : > { %v2643_v38 = vsel %vm2639_vm9, %v2630_v34, %v2632_v36 }
  0xe6   : > { %11225 = vmatprep.subr.msk.mxu1 %vm369_vm1, %v2643_v38 }
  0xe8   : > { %v2628_v39 = vpop.permute.xlu0 %2627  ;;  %v2624_v40 = vpop.permute.xlu1 %2623 }
  0xe9   : > { %v2642_v42 = vsel %vm2639_vm9, %v2628_v39, %v2630_v34  ;;  %v2640_v43 = vsel %vm2639_vm9, %v2624_v40, %v2626_v37  ;;  %v2641_v44 = vsel %vm2639_vm9, %v2626_v37, %v2628_v39 }
  0xea   : > { %11222 = vmatprep.subr.msk.mxu0 %vm369_vm1, %v2641_v44  ;;  %11226 = vmatpush1.msk.msra.mxu1 %vm369_vm1, %v2642_v42 }
  0xeb   : > { %11223 = vmatpush1.msk.msra.mxu0 %vm369_vm1, %v2640_v43  ;;  %11227 = vmatmul.mubr.msk.f32.vlgmr.msra.gmra.mrb[0].mxu1 %vm365_vm2, %v11221_v41 }
  0xec   : > { %v2634_v45 = vpop.permute.xlu0 %2633  ;;  %v2636_v46 = vpop.permute.xlu1 %2635  ;;  %11224 = vmatmul.mubr.msk.f32.vlgmr.msra.gmra.mrb[0].mxu0 %vm365_vm2, %v11221_v41  ;;  %12640 = vmatprep.subr.mxu1 %v13788_v0 }
  0xed   : > { %v2644_v47 = vsel %vm2639_vm9, %v2632_v36, %v2634_v45  ;;  %v2645_v48 = vsel %vm2639_vm9, %v2634_v45, %v2636_v46  ;;  %12642 = vmatprep.mubr.msk.f32.mxu1 %vm13798_vm3, %v13788_v0  ;;  %2870 = vmatprep.mubr.f32.mxu0 %v13788_v0 }
  0xee   : > { %11228 = vmatprep.subr.msk.mxu0 %vm369_vm1, %v2645_v48 }
  0xef   : > { %11229 = vmatpush1.msk.msra.mxu0 %vm369_vm1, %v2644_v47 }
  0xf0   : > { %v2638_v49 = vpop.permute.xlu0 %2637  ;;  %v2963_v50 = vpop.permute.xlu1 %2962  ;;  %11230 = vmatmul.mubr.msk.f32.vlgmr.msra.gmra.mrb[2].mxu0 %vm365_vm2, %v11221_v41 }
  0xf1   : > { %v2646_v51 = vsel %vm2639_vm9, %v2636_v46, %v2638_v49  ;;  %3061 = vmatprep.mubr.f32.mxu0 %v13788_v0 }
  0xf2   : > { %12641 = vmatpush3.msk.msra.mxu1 %vm369_vm1, %v2646_v51  ;;  %v6242_v51 = vld [vmem:[%s17447_s4] sm:$0xff] }
  0xf3   : > { %12643 = vmatmul.mubr.msk.f32.vlgmr.msra.gmra.mrb[16].mxu1 %vm365_vm2, %v11221_v41 }
  0xf4   : > { %v2965_v52 = vpop.permute.xlu0 %2964  ;;  %v2959_v53 = vpop.permute.xlu1 %2958  ;;  %3132 = vmatprep.mubr.f32.mxu1 %v13788_v0 }
  0xf5   : > { %v2976_v54 = vsel %vm2972_vm10, %v2963_v50, %v2965_v52 }
  0xf6   : > { %11237 = vmatprep.subr.msk.mxu1 %vm369_vm1, %v2976_v54 }
  0xf8   : > { %v2961_v55 = vpop.permute.xlu0 %2960  ;;  %v2957_v56 = vpop.permute.xlu1 %2956 }
  0xf9   : > { %v2975_v58 = vsel %vm2972_vm10, %v2961_v55, %v2963_v50  ;;  %v2973_v59 = vsel %vm2972_vm10, %v2957_v56, %v2959_v53  ;;  %v2974_v60 = vsel %vm2972_vm10, %v2959_v53, %v2961_v55 }
  0xfa   : > { %11234 = vmatprep.subr.msk.mxu0 %vm369_vm1, %v2974_v60  ;;  %11238 = vmatpush1.msk.msra.mxu1 %vm369_vm1, %v2975_v58 }
  0xfb   : > { %11235 = vmatpush1.msk.msra.mxu0 %vm369_vm1, %v2973_v59  ;;  %11239 = vmatmul.mubr.msk.f32.vlgmr.msra.gmra.mrb[0].mxu1 %vm365_vm2, %v11233_v57 }
  0xfc   : > { %v2967_v61 = vpop.permute.xlu0 %2966  ;;  %11236 = vmatmul.mubr.msk.f32.vlgmr.msra.gmra.mrb[0].mxu0 %vm365_vm2, %v11233_v57  ;;  %v2969_v62 = vpop.permute.xlu1 %2968  ;;  %12645 = vmatprep.subr.mxu1 %v13788_v0 }
  0xfd   : > { %v2977_v63 = vsel %vm2972_vm10, %v2965_v52, %v2967_v61  ;;  %v2978_v1 = vsel %vm2972_vm10, %v2967_v61, %v2969_v62  ;;  %3203 = vmatprep.mubr.f32.mxu0 %v13788_v0  ;;  %12647 = vmatprep.mubr.msk.f32.mxu1 %vm13798_vm3, %v13788_v0 }
  0xfe   : > { %11240 = vmatprep.subr.msk.mxu0 %vm369_vm1, %v2978_v1 }
  0xff   : > { %11241 = vmatpush1.msk.msra.mxu0 %vm369_vm1, %v2977_v63 }
 0x100   : > { %v2971_v2 = vpop.permute.xlu0 %2970  ;;  %11242 = vmatmul.mubr.msk.f32.vlgmr.msra.gmra.mrb[2].mxu0 %vm365_vm2, %v11233_v57 }
 0x101   : > { %v2979_v3 = vsel %vm2972_vm10, %v2969_v62, %v2971_v2  ;;  %3420 = vmatprep.mubr.f32.mxu0 %v13788_v0  ;;  %v11245_v2 = vld [vmem:[%s17446_s3 + $0x8] sm:$0xff] }
 0x102   : > { %12646 = vmatpush3.msk.msra.mxu1 %vm369_vm1, %v2979_v3  ;;  %vm11062_vm1 = vcmask 32768  }
 0x103   : > { %12648 = vmatmul.mubr.msk.f32.vlgmr.msra.gmra.mrb[18].mxu1 %vm365_vm2, %v11233_v57 }
 0x104   : > { %3491 = vmatprep.mubr.f32.mxu1 %v13788_v0 }
 0x10d   : > { %v3291_v27 = vpop.permute.xlu1 %3290 }
 0x16f   : > { %v663_v4 = vpop.f32.mrb[2].mxu1 }
 0x170   : > { %v12609_v5 = vpop.f32.mrb[3].mxu1 }
 0x178   : > { %v963_v6 = vpop.f32.mrb[4].mxu1 }
 0x179   : > { %v964_v7 = vadd.f32 %v963_v6, %v663_v4  ;;  %v12614_v8 = vpop.f32.mrb[5].mxu1 }
 0x180   : > { %v1286_v9 = vpop.f32.mrb[6].mxu1 }
 0x181   : > { %v1296_v10 = vadd.f32 %v1286_v9, %v964_v7  ;;  %v12619_v11 = vpop.f32.mrb[7].mxu1 }
 0x189   : > { %v1616_v12 = vpop.f32.mrb[8].mxu1 }
 0x18a   : > { %v1626_v13 = vadd.f32 %v1616_v12, %v1296_v10  ;;  %v12624_v14 = vpop.f32.mrb[9].mxu1 }
 0x197   : > { %v1946_v15 = vpop.f32.mrb[10].mxu1 }
 0x198   : > { %v1956_v16 = vadd.f32 %v1946_v15, %v1626_v13  ;;  %v12629_v17 = vpop.f32.mrb[11].mxu1 }
 0x1a5   : > { %v2276_v18 = vpop.f32.mrb[12].mxu1 }
 0x1a6   : > { %v2286_v19 = vadd.f32 %v2276_v18, %v1956_v16  ;;  %v12634_v20 = vpop.f32.mrb[13].mxu1 }
 0x1b6   : > { %v2610_v21 = vpop.f32.mrb[14].mxu1 }
 0x1b7   : > { %v2620_v22 = vadd.f32 %v2610_v21, %v2286_v19  ;;  %v12639_v23 = vpop.f32.mrb[15].mxu1 }
 0x1c6   : > { %v2943_v24 = vpop.f32.mrb[16].mxu1 }
 0x1c7   : > { %v2953_v25 = vadd.f32 %v2943_v24, %v2620_v22  ;;  %v12644_v26 = vpop.f32.mrb[17].mxu1  ;;  %v3307_v22 = vld [vmem:[%s17446_s3] sm:$0xff] }
 0x1ce   : > { %v3134_v28 = vpop.f32.mrb[0].mxu1 }
 0x1cf   : > { %v3295_v29 = vadd.f32 %v3291_v27, %v3134_v28  ;;  %v3063_v30 = vpop.f32.mrb[0].mxu0  ;;  %v3136_v31 = vpop.f32.mrb[1].mxu1 }
 0x1d0   : > { %v3293_v32 = vadd.f32 %v3291_v27, %v3063_v30  ;;  %v3065_v33 = vpop.f32.mrb[1].mxu0  ;;  %v3296_v41 = vadd.f32 %v3291_v27, %v3136_v31  ;;  %v11268_v30 = vld [vmem:[%s17446_s3 + $0x10] sm:$0xff] }
 0x1d1   : > { %v14285_v34 = vmax.f32 %v3295_v29, 0.0  ;;  %v3294_v42 = vadd.f32 %v3291_v27, %v3065_v33 }
 0x1d2   : > { %v14287_v35 = vmax.f32 %v3293_v32, 0.0  ;;  %v14305_v43 = vmax.f32 %v3296_v41, 0.0  ;;  %v11280_v41 = vld [vmem:[%s17446_s3 + $0x18] sm:$0xff] }
 0x1d3   : > { %v3205_v36 = vpop.f32.mrb[2].mxu0  ;;  %3321 = vrot.lane.b32.xlu1 %v14285_v34, %s13789_s26  ;;  %v14307_v44 = vmax.f32 %v3294_v42, 0.0 }
 0x1d4   : > { %v3207_v37 = vpop.f32.mrb[3].mxu0  ;;  %3317 = vrot.lane.b32.xlu0 %v14287_v35, %s13789_s26  ;;  %v3297_v45 = vadd.f32 %v3291_v27, %v3205_v36 }
 0x1d5   : > { %v3298_v47 = vadd.f32 %v3291_v27, %v3207_v37 }
 0x1d6   : > { %v3276_v38 = vpop.f32.mrb[18].mxu1  ;;  %v14325_v46 = vmax.f32 %v3297_v45, 0.0 }
 0x1d7   : > { %v3286_v39 = vadd.f32 %v3276_v38, %v2953_v25  ;;  %3941 = vrot.lane.b32.xlu1 %v14287_v35, %s13790_s27  ;;  %v12649_v40 = vpop.f32.mrb[19].mxu1  ;;  %v14335_v48 = vmax.f32 %v3298_v47, 0.0 }
 0x1d8   : > { %3945 = vrot.lane.b32.xlu0 %v14285_v34, %s13790_s27 }
 0x1d9   : > { %v3299_v49 = vadd.f32 %v3291_v27, %v3286_v39 }
 0x1db   : > { %4274 = vrot.lane.b32.xlu1 %v14285_v34, %s13791_s28  ;;  %v14341_v50 = vmax.f32 %v3299_v49, 0.0 }
 0x1dc   : > { %4270 = vrot.lane.b32.xlu0 %v14287_v35, %s13791_s28 }
 0x1df   : > { %4599 = vrot.lane.b32.xlu1 %v14287_v35, %s13792_s29 }
 0x1e0   : > { %4603 = vrot.lane.b32.xlu0 %v14285_v34, %s13792_s29 }
 0x1e3   : > { %3323 = vrot.lane.b32.xlu1 %v14305_v43, %s13789_s26 }
 0x1e4   : > { %3319 = vrot.lane.b32.xlu0 %v14307_v44, %s13789_s26 }
 0x1e7   : > { %3943 = vrot.lane.b32.xlu1 %v14307_v44, %s13790_s27 }
 0x1e8   : > { %3947 = vrot.lane.b32.xlu0 %v14305_v43, %s13790_s27 }
 0x1eb   : > { %4276 = vrot.lane.b32.xlu1 %v14305_v43, %s13791_s28 }
 0x1ec   : > { %4272 = vrot.lane.b32.xlu0 %v14307_v44, %s13791_s28 }
 0x1ef   : > { %4601 = vrot.lane.b32.xlu1 %v14307_v44, %s13792_s29 }
 0x1f0   : > { %4605 = vrot.lane.b32.xlu0 %v14305_v43, %s13792_s29 }
 0x1f3   : > { %3949 = vrot.lane.b32.xlu1 %v14325_v46, %s13790_s27 }
 0x1f4   : > { %3325 = vrot.lane.b32.xlu0 %v14325_v46, %s13789_s26 }
 0x1f7   : > { %4607 = vrot.lane.b32.xlu1 %v14325_v46, %s13792_s29 }
 0x1f8   : > { %4278 = vrot.lane.b32.xlu0 %v14325_v46, %s13791_s28 }
 0x1fb   : > { %3327 = vrot.lane.b32.xlu1 %v14335_v48, %s13789_s26 }
 0x1fc   : > { %3951 = vrot.lane.b32.xlu0 %v14335_v48, %s13790_s27 }
 0x1ff   : > { %4280 = vrot.lane.b32.xlu1 %v14335_v48, %s13791_s28 }
 0x200   : > { %3329 = vrot.lane.b32.xlu0 %v14341_v50, %s13789_s26 }
 0x203   : > { %4932 = vrot.lane.b32.xlu1 %v14285_v34, %s13793_s14 }
 0x204   : > { %4609 = vrot.lane.b32.xlu0 %v14335_v48, %s13792_s29 }
 0x207   : > { %4934 = vrot.lane.b32.xlu1 %v14305_v43, %s13793_s14 }
 0x208   : > { %4930 = vrot.lane.b32.xlu0 %v14307_v44, %s13793_s14 }
 0x20b   : > { %4938 = vrot.lane.b32.xlu1 %v14335_v48, %s13793_s14 }
 0x20c   : > { %4928 = vrot.lane.b32.xlu0 %v14287_v35, %s13793_s14 }
 0x20f   : > { %3953 = vrot.lane.b32.xlu1 %v14341_v50, %s13790_s27 }
 0x210   : > { %4936 = vrot.lane.b32.xlu0 %v14325_v46, %s13793_s14 }
 0x213   : > { %5259 = vrot.lane.b32.xlu1 %v14307_v44, %s13794_s16 }
 0x214   : > { %5261 = vrot.lane.b32.xlu0 %v14285_v34, %s13794_s16 }
 0x217   : > { %5257 = vrot.lane.b32.xlu1 %v14287_v35, %s13794_s16 }
 0x218   : > { %4282 = vrot.lane.b32.xlu0 %v14341_v50, %s13791_s28 }
 0x21b   : > { %5265 = vrot.lane.b32.xlu1 %v14325_v46, %s13794_s16 }
 0x21c   : > { %5263 = vrot.lane.b32.xlu0 %v14305_v43, %s13794_s16 }
 0x21f   : > { %4611 = vrot.lane.b32.xlu1 %v14341_v50, %s13792_s29 }
 0x220   : > { %5267 = vrot.lane.b32.xlu0 %v14335_v48, %s13794_s16 }
 0x223   : > { %5590 = vrot.lane.b32.xlu1 %v14285_v34, %s13795_s17 }
 0x224   : > { %5588 = vrot.lane.b32.xlu0 %v14307_v44, %s13795_s17 }
 0x227   : > { %5592 = vrot.lane.b32.xlu1 %v14305_v43, %s13795_s17 }
 0x228   : > { %4940 = vrot.lane.b32.xlu0 %v14341_v50, %s13793_s14 }
 0x22b   : > { %5596 = vrot.lane.b32.xlu1 %v14335_v48, %s13795_s17 }
 0x22c   : > { %5586 = vrot.lane.b32.xlu0 %v14287_v35, %s13795_s17 }
 0x22f   : > { %5269 = vrot.lane.b32.xlu1 %v14341_v50, %s13794_s16 }
 0x230   : > { %5594 = vrot.lane.b32.xlu0 %v14325_v46, %s13795_s17 }
 0x233   : > { %5917 = vrot.lane.b32.xlu1 %v14307_v44, %s13796_s21 }
 0x234   : > { %5919 = vrot.lane.b32.xlu0 %v14285_v34, %s13796_s21 }
 0x237   : > { %5915 = vrot.lane.b32.xlu1 %v14287_v35, %s13796_s21 }
 0x238   : > { %5598 = vrot.lane.b32.xlu0 %v14341_v50, %s13795_s17 }
 0x23b   : > { %5923 = vrot.lane.b32.xlu1 %v14325_v46, %s13796_s21 }
 0x23c   : > { %5921 = vrot.lane.b32.xlu0 %v14305_v43, %s13796_s21 }
 0x23f   : > { %5927 = vrot.lane.b32.xlu1 %v14341_v50, %s13796_s21 }
 0x240   : > { %5925 = vrot.lane.b32.xlu0 %v14335_v48, %s13796_s21 }
 0x244   : > { %6245 = vperm.xlu0 %13699, %v6242_v51  }
 0x245   : > { %v3322_v52 = vpop.permute.xlu1 %3321 }
 0x246   : > { %v3318_v53 = vpop.permute.xlu0 %3317 }
 0x249   : > { %v14414_v54 = vpop.permute.xlu1 %3941 }
 0x24a   : > { %v14416_v55 = vpop.permute.xlu0 %3945 }
 0x24d   : > { %v14418_v56 = vpop.permute.xlu1 %4274 }
 0x24e   : > { %v14420_v57 = vpop.permute.xlu0 %4270 }
 0x251   : > { %v14422_v58 = vpop.permute.xlu1 %4599 }
 0x252   : > { %v14424_v59 = vpop.permute.xlu0 %4603 }
 0x255   : > { %v3324_v60 = vpop.permute.xlu1 %3323 }
 0x256   : > { %v3320_v61 = vpop.permute.xlu0 %3319  ;;  %v3333_v11 = vsel %vm358_vm0, %v3322_v52, %v3324_v60 }
 0x257   : > { %v3331_v62 = vsel %vm358_vm0, %v3318_v53, %v3320_v61  ;;  %v3332_v63 = vsel %vm358_vm0, %v3320_v61, %v3322_v52  ;;  %v11292_v52 = vld [vmem:[%s17446_s3 + $0x20] sm:$0xff] }
 0x258   : > { %11246 = vmatprep.subr.msk.mxu0 %vm3341_vm11, %v3332_v63  ;;  %v11304_v63 = vld [vmem:[%s17446_s3 + $0x28] sm:$0xff] }
 0x259   : > { %v14429_v1 = vpop.permute.xlu1 %3943  ;;  %11247 = vmatpush1.msk.msra.mxu0 %vm3341_vm11, %v3331_v62 }
 0x25a   : > { %v3948_v3 = vpop.permute.xlu0 %3947  ;;  %11248 = vmatmul.mubr.msk.f32.vlgmr.msra.gmra.mrb[4].mxu0 %vm3337_vm12, %v11245_v2  ;;  %v3956_v26 = vsel %vm983_vm4, %v14429_v1, %v14416_v55  ;;  %v3955_v31 = vsel %vm983_vm4, %v14414_v54, %v14429_v1 }
 0x25b   : > { %3562 = vmatprep.mubr.f32.mxu0 %v13788_v0  ;;  %v3957_v27 = vsel %vm983_vm4, %v14416_v55, %v3948_v3 }
 0x25d   : > { %v14437_v4 = vpop.permute.xlu1 %4276 }
 0x25e   : > { %v14439_v5 = vpop.permute.xlu0 %4272  ;;  %v4286_v37 = vsel %vm1313_vm5, %v14418_v56, %v14437_v4 }
 0x25f   : > { %v4285_v39 = vsel %vm1313_vm5, %v14439_v5, %v14418_v56  ;;  %v4284_v42 = vsel %vm1313_vm5, %v14420_v57, %v14439_v5 }
 0x261   : > { %v14441_v6 = vpop.permute.xlu1 %4601 }
 0x262   : > { %v14443_v7 = vpop.permute.xlu0 %4605  ;;  %v4613_v53 = vsel %vm1643_vm6, %v14422_v58, %v14441_v6 }
 0x265   : > { %v14445_v8 = vpop.permute.xlu1 %3949 }
 0x266   : > { %v3326_v9 = vpop.permute.xlu0 %3325  ;;  %v3958_v24 = vsel %vm983_vm4, %v3948_v3, %v14445_v8 }
 0x267   : > { %v3334_v10 = vsel %vm358_vm0, %v3324_v60, %v3326_v9 }
 0x268   : > { %11249 = vmatprep.subr.msk.mxu1 %vm3341_vm11, %v3334_v10 }
 0x269   : > { %v14450_v12 = vpop.permute.xlu1 %4607  ;;  %11250 = vmatpush1.msk.msra.mxu1 %vm3341_vm11, %v3333_v11  ;;  %v11316_v11 = vld [vmem:[%s17446_s3 + $0x30] sm:$0xff] }
 0x26a   : > { %v14453_v13 = vpop.permute.xlu0 %4278  ;;  %11251 = vmatmul.mubr.msk.f32.vlgmr.msra.gmra.mrb[20].mxu1 %vm3337_vm12, %v11245_v2  ;;  %12650 = vmatprep.subr.mxu1 %v13788_v0 }
 0x26b   : > { %12652 = vmatprep.mubr.msk.f32.mxu1 %vm13798_vm3, %v13788_v0 }
 0x26d   : > { %v3328_v14 = vpop.permute.xlu1 %3327 }
 0x26e   : > { %v3952_v15 = vpop.permute.xlu0 %3951  ;;  %v3335_v19 = vsel %vm358_vm0, %v3326_v9, %v3328_v14 }
 0x26f   : > { %v3959_v36 = vsel %vm983_vm4, %v14445_v8, %v3952_v15 }
 0x271   : > { %v14459_v16 = vpop.permute.xlu1 %4280 }
 0x272   : > { %v3330_v17 = vpop.permute.xlu0 %3329  ;;  %v4288_v47 = vsel %vm1313_vm5, %v14453_v13, %v14459_v16 }
 0x273   : > { %v3336_v18 = vsel %vm358_vm0, %v3328_v14, %v3330_v17  ;;  %12651 = vmatpush3.msk.msra.mxu1 %vm3341_vm11, %v3330_v17 }
 0x274   : > { %11252 = vmatprep.subr.msk.mxu0 %vm3341_vm11, %v3336_v18  ;;  %12653 = vmatmul.mubr.msk.f32.vlgmr.msra.gmra.mrb[22].mxu1 %vm3337_vm12, %v11245_v2 }
 0x275   : > { %11260 = vmatprep.subr.msk.mxu1 %vm3341_vm11, %v14305_v43  ;;  %v14468_v20 = vpop.permute.xlu1 %4932  ;;  %11253 = vmatpush1.msk.msra.mxu0 %vm3341_vm11, %v3335_v19 }
 0x276   : > { %11261 = vmatpush1.msk.msra.mxu1 %vm3341_vm11, %v14285_v34  ;;  %11254 = vmatmul.mubr.msk.f32.vlgmr.msra.gmra.mrb[6].mxu0 %vm3337_vm12, %v11245_v2  ;;  %v14474_v21 = vpop.permute.xlu0 %4609 }
 0x277   : > { %11257 = vmatprep.subr.msk.mxu0 %vm3341_vm11, %v14307_v44  ;;  %3791 = vmatprep.mubr.f32.mxu1 %v13788_v0  ;;  %v4617_v58 = vsel %vm1643_vm6, %v14450_v12, %v14474_v21 }
 0x278   : > { %11258 = vmatpush1.msk.msra.mxu0 %vm3341_vm11, %v14287_v35  ;;  %12655 = vmatprep.subr.mxu1 %v13788_v0  ;;  %v4287_v35 = vsel %vm1313_vm5, %v14437_v4, %v14453_v13 }
 0x279   : > { %11262 = vmatmul.mubr.msk.f32.vlgmr.msra.gmra.mrb[20].mxu1 %vm3337_vm12, %v3307_v22  ;;  %11263 = vmatprep.subr.msk.mxu0 %vm3341_vm11, %v14335_v48  ;;  %v14488_v23 = vpop.permute.xlu1 %4934  ;;  %v4615_v48 = vsel %vm1643_vm6, %v14424_v59, %v14443_v7 }
 0x27a   : > { %12656 = vmatpush3.msk.msra.mxu1 %vm3341_vm11, %v14341_v50  ;;  %3720 = vmatprep.mubr.f32.mxu0 %v13788_v0  ;;  %v14495_v25 = vpop.permute.xlu0 %4930  ;;  %v4614_v50 = vsel %vm1643_vm6, %v14441_v6, %v14424_v59  ;;  %v4944_v59 = vsel %vm1973_vm7, %v14468_v20, %v14488_v23 }
 0x27b   : > { %11272 = vmatprep.subr.msk.mxu1 %vm3341_vm11, %v3958_v24  ;;  %11259 = vmatmul.mubr.msk.f32.vlgmr.msra.gmra.mrb[4].mxu0 %vm3337_vm12, %v3307_v22  ;;  %v4943_v61 = vsel %vm1973_vm7, %v14495_v25, %v14468_v20 }
 0x27c   : > { %11264 = vmatpush1.msk.msra.mxu0 %vm3341_vm11, %v14325_v46  ;;  %12657 = vmatprep.mubr.msk.f32.mxu1 %vm13798_vm3, %v13788_v0  ;;  %v4616_v46 = vsel %vm1643_vm6, %v14443_v7, %v14450_v12 }
 0x27d   : > { %11269 = vmatprep.subr.msk.mxu0 %vm3341_vm11, %v3956_v26  ;;  %12658 = vmatmul.mubr.msk.f32.vlgmr.msra.gmra.mrb[24].mxu1 %vm3337_vm12, %v3307_v22  ;;  %v14510_v28 = vpop.permute.xlu1 %4938 }
 0x27e   : > { %11273 = vmatpush1.msk.msra.mxu1 %vm3341_vm11, %v3957_v27  ;;  %3862 = vmatprep.mubr.f32.mxu0 %v13788_v0  ;;  %v14514_v29 = vpop.permute.xlu0 %4928 }
 0x27f   : > { %11265 = vmatmul.mubr.msk.f32.vlgmr.msra.gmra.mrb[6].mxu0 %vm3337_vm12, %v3307_v22  ;;  %4113 = vmatprep.mubr.f32.mxu1 %v13788_v0  ;;  %v4942_v1 = vsel %vm1973_vm7, %v14514_v29, %v14495_v25  ;;  %v11328_v22 = vld [vmem:[%s17446_s3 + $0x38] sm:$0xff] }
 0x280   : > { %11270 = vmatpush1.msk.msra.mxu0 %vm3341_vm11, %v3955_v31  ;;  %4042 = vmatprep.mubr.f32.mxu0 %v13788_v0 }
 0x281   : > { %11274 = vmatmul.mubr.msk.f32.vlgmr.msra.gmra.mrb[20].mxu1 %vm3337_vm12, %v11268_v30  ;;  %v3954_v32 = vpop.permute.xlu1 %3953  ;;  %12660 = vmatprep.subr.mxu1 %v13788_v0 }
 0x282   : > { %v3960_v33 = vsel %vm983_vm4, %v3952_v15, %v3954_v32  ;;  %12661 = vmatpush3.msk.msra.mxu1 %vm3341_vm11, %v3954_v32  ;;  %v14530_v34 = vpop.permute.xlu0 %4936  ;;  %12662 = vmatprep.mubr.msk.f32.mxu1 %vm13798_vm3, %v13788_v0 }
 0x283   : > { %11271 = vmatmul.mubr.msk.f32.vlgmr.msra.gmra.mrb[4].mxu0 %vm3337_vm12, %v11268_v30  ;;  %11275 = vmatprep.subr.msk.mxu0 %vm3341_vm11, %v3960_v33  ;;  %v4945_v57 = vsel %vm1973_vm7, %v14488_v23, %v14530_v34  ;;  %v4946_v6 = vsel %vm1973_vm7, %v14530_v34, %v14510_v28  ;;  %v11340_v34 = vld [vmem:[%s17446_s3 + $0x40] sm:$0xff] }
 0x284   : > { %11284 = vmatprep.subr.msk.mxu1 %vm3341_vm11, %v4287_v35  ;;  %11276 = vmatpush1.msk.msra.mxu0 %vm3341_vm11, %v3959_v36 }
 0x285   : > { %12663 = vmatmul.mubr.msk.f32.vlgmr.msra.gmra.mrb[26].mxu1 %vm3337_vm12, %v11268_v30  ;;  %v14547_v38 = vpop.permute.xlu1 %5259  ;;  %4184 = vmatprep.mubr.f32.mxu0 %v13788_v0 }
 0x286   : > { %11285 = vmatpush1.msk.msra.mxu1 %vm3341_vm11, %v4286_v37  ;;  %11281 = vmatprep.subr.msk.mxu0 %vm3341_vm11, %v4285_v39  ;;  %v14555_v40 = vpop.permute.xlu0 %5261 }
 0x287   : > { %11277 = vmatmul.mubr.msk.f32.vlgmr.msra.gmra.mrb[6].mxu0 %vm3337_vm12, %v11268_v30  ;;  %4442 = vmatprep.mubr.f32.mxu1 %v13788_v0  ;;  %v5272_v9 = vsel %vm2306_vm8, %v14547_v38, %v14555_v40 }
 0x288   : > { %11282 = vmatpush1.msk.msra.mxu0 %vm3341_vm11, %v4284_v42  ;;  %4371 = vmatprep.mubr.f32.mxu0 %v13788_v0 }
 0x289   : > { %11286 = vmatmul.mubr.msk.f32.vlgmr.msra.gmra.mrb[20].mxu1 %vm3337_vm12, %v11280_v41  ;;  %v14568_v43 = vpop.permute.xlu1 %5257  ;;  %12665 = vmatprep.subr.mxu1 %v13788_v0 }
 0x28a   : > { %v4283_v44 = vpop.permute.xlu0 %4282  ;;  %12667 = vmatprep.mubr.msk.f32.mxu1 %vm13798_vm3, %v13788_v0  ;;  %v5271_v12 = vsel %vm2306_vm8, %v14568_v43, %v14547_v38 }
 0x28b   : > { %11283 = vmatmul.mubr.msk.f32.vlgmr.msra.gmra.mrb[4].mxu0 %vm3337_vm12, %v11280_v41  ;;  %v4289_v45 = vsel %vm1313_vm5, %v14459_v16, %v4283_v44  ;;  %12666 = vmatpush3.msk.msra.mxu1 %vm3341_vm11, %v4283_v44 }
 0x28c   : > { %11287 = vmatprep.subr.msk.mxu0 %vm3341_vm11, %v4289_v45  ;;  %11296 = vmatprep.subr.msk.mxu1 %vm3341_vm11, %v4616_v46 }
 0x28d   : > { %12668 = vmatmul.mubr.msk.f32.vlgmr.msra.gmra.mrb[28].mxu1 %vm3337_vm12, %v11280_v41  ;;  %v14589_v49 = vpop.permute.xlu1 %5265  ;;  %11288 = vmatpush1.msk.msra.mxu0 %vm3341_vm11, %v4288_v47 }
 0x28e   : > { %4513 = vmatprep.mubr.f32.mxu0 %v13788_v0  ;;  %11297 = vmatpush1.msk.msra.mxu1 %vm3341_vm11, %v4615_v48  ;;  %v5264_v51 = vpop.permute.xlu0 %5263 }
 0x28f   : > { %11289 = vmatmul.mubr.msk.f32.vlgmr.msra.gmra.mrb[6].mxu0 %vm3337_vm12, %v11280_v41  ;;  %11293 = vmatprep.subr.msk.mxu0 %vm3341_vm11, %v4614_v50  ;;  %v5274_v4 = vsel %vm2306_vm8, %v5264_v51, %v14589_v49  ;;  %v5273_v7 = vsel %vm2306_vm8, %v14555_v40, %v5264_v51 }
 0x290   : > { %11294 = vmatpush1.msk.msra.mxu0 %vm3341_vm11, %v4613_v53  ;;  %4771 = vmatprep.mubr.f32.mxu1 %v13788_v0 }
 0x291   : > { %11298 = vmatmul.mubr.msk.f32.vlgmr.msra.gmra.mrb[20].mxu1 %vm3337_vm12, %v11292_v52  ;;  %v4612_v54 = vpop.permute.xlu1 %4611  ;;  %4700 = vmatprep.mubr.f32.mxu0 %v13788_v0 }
 0x292   : > { %v4618_v55 = vsel %vm1643_vm6, %v14474_v21, %v4612_v54  ;;  %12670 = vmatprep.subr.mxu1 %v13788_v0  ;;  %v5268_v56 = vpop.permute.xlu0 %5267  ;;  %12672 = vmatprep.mubr.msk.f32.mxu1 %vm13798_vm3, %v13788_v0 }
 0x293   : > { %11295 = vmatmul.mubr.msk.f32.vlgmr.msra.gmra.mrb[4].mxu0 %vm3337_vm12, %v11292_v52  ;;  %12671 = vmatpush3.msk.msra.mxu1 %vm3341_vm11, %v4612_v54  ;;  %v5275_v17 = vsel %vm2306_vm8, %v14589_v49, %v5268_v56 }
 0x294   : > { %11299 = vmatprep.subr.msk.mxu0 %vm3341_vm11, %v4618_v55  ;;  %11308 = vmatprep.subr.msk.mxu1 %vm3341_vm11, %v4945_v57 }
 0x295   : > { %11300 = vmatpush1.msk.msra.mxu0 %vm3341_vm11, %v4617_v58  ;;  %12673 = vmatmul.mubr.msk.f32.vlgmr.msra.gmra.mrb[30].mxu1 %vm3337_vm12, %v11292_v52  ;;  %v5591_v60 = vpop.permute.xlu1 %5590 }
 0x296   : > { %11309 = vmatpush1.msk.msra.mxu1 %vm3341_vm11, %v4944_v59  ;;  %4842 = vmatprep.mubr.f32.mxu0 %v13788_v0  ;;  %v5589_v62 = vpop.permute.xlu0 %5588 }
 0x297   : > { %11305 = vmatprep.subr.msk.mxu0 %vm3341_vm11, %v4943_v61  ;;  %11301 = vmatmul.mubr.msk.f32.vlgmr.msra.gmra.mrb[6].mxu0 %vm3337_vm12, %v11292_v52  ;;  %v5601_v18 = vsel %vm2639_vm9, %v5589_v62, %v5591_v60 }
 0x298   : > { %11306 = vmatpush1.msk.msra.mxu0 %vm3341_vm11, %v4942_v1  ;;  %5100 = vmatprep.mubr.f32.mxu1 %v13788_v0 }
 0x299   : > { %11310 = vmatmul.mubr.msk.f32.vlgmr.msra.gmra.mrb[20].mxu1 %vm3337_vm12, %v11304_v63  ;;  %v5593_v2 = vpop.permute.xlu1 %5592  ;;  %5029 = vmatprep.mubr.f32.mxu0 %v13788_v0 }
 0x29a   : > { %12675 = vmatprep.subr.mxu1 %v13788_v0  ;;  %v4941_v3 = vpop.permute.xlu0 %4940  ;;  %12677 = vmatprep.mubr.msk.f32.mxu1 %vm13798_vm3, %v13788_v0  ;;  %v5602_v20 = vsel %vm2639_vm9, %v5591_v60, %v5593_v2 }
 0x29b   : > { %11307 = vmatmul.mubr.msk.f32.vlgmr.msra.gmra.mrb[4].mxu0 %vm3337_vm12, %v11304_v63  ;;  %v4947_v5 = vsel %vm1973_vm7, %v14510_v28, %v4941_v3  ;;  %12676 = vmatpush3.msk.msra.mxu1 %vm3341_vm11, %v4941_v3 }
 0x29c   : > { %11311 = vmatprep.subr.msk.mxu0 %vm3341_vm11, %v4947_v5  ;;  %11320 = vmatprep.subr.msk.mxu1 %vm3341_vm11, %v5274_v4 }
 0x29d   : > { %12678 = vmatmul.mubr.msk.f32.vlgmr.msra.gmra.mrb[32].mxu1 %vm3337_vm12, %v11304_v63  ;;  %v5597_v8 = vpop.permute.xlu1 %5596  ;;  %11312 = vmatpush1.msk.msra.mxu0 %vm3341_vm11, %v4946_v6 }
 0x29e   : > { %5171 = vmatprep.mubr.f32.mxu0 %v13788_v0  ;;  %11321 = vmatpush1.msk.msra.mxu1 %vm3341_vm11, %v5273_v7  ;;  %v5587_v10 = vpop.permute.xlu0 %5586 }
 0x29f   : > { %11313 = vmatmul.mubr.msk.f32.vlgmr.msra.gmra.mrb[6].mxu0 %vm3337_vm12, %v11304_v63  ;;  %11317 = vmatprep.subr.msk.mxu0 %vm3341_vm11, %v5272_v9  ;;  %v5600_v23 = vsel %vm2639_vm9, %v5587_v10, %v5589_v62 }
 0x2a0   : > { %11318 = vmatpush1.msk.msra.mxu0 %vm3341_vm11, %v5271_v12  ;;  %5429 = vmatprep.mubr.f32.mxu1 %v13788_v0 }
 0x2a1   : > { %11322 = vmatmul.mubr.msk.f32.vlgmr.msra.gmra.mrb[20].mxu1 %vm3337_vm12, %v11316_v11  ;;  %v5270_v13 = vpop.permute.xlu1 %5269  ;;  %5358 = vmatprep.mubr.f32.mxu0 %v13788_v0 }
 0x2a2   : > { %v5276_v14 = vsel %vm2306_vm8, %v5268_v56, %v5270_v13  ;;  %12680 = vmatprep.subr.mxu1 %v13788_v0  ;;  %v5595_v15 = vpop.permute.xlu0 %5594  ;;  %12682 = vmatprep.mubr.msk.f32.mxu1 %vm13798_vm3, %v13788_v0 }
 0x2a3   : > { %11319 = vmatmul.mubr.msk.f32.vlgmr.msra.gmra.mrb[4].mxu0 %vm3337_vm12, %v11316_v11  ;;  %12681 = vmatpush3.msk.msra.mxu1 %vm3341_vm11, %v5270_v13  ;;  %v5603_v16 = vsel %vm2639_vm9, %v5593_v2, %v5595_v15  ;;  %v5604_v27 = vsel %vm2639_vm9, %v5595_v15, %v5597_v8 }
 0x2a4   : > { %11323 = vmatprep.subr.msk.mxu0 %vm3341_vm11, %v5276_v14  ;;  %11332 = vmatprep.subr.msk.mxu1 %vm3341_vm11, %v5603_v16 }
 0x2a5   : > { %11324 = vmatpush1.msk.msra.mxu0 %vm3341_vm11, %v5275_v17  ;;  %12683 = vmatmul.mubr.msk.f32.vlgmr.msra.gmra.mrb[34].mxu1 %vm3337_vm12, %v11316_v11  ;;  %v5918_v19 = vpop.permute.xlu1 %5917 }
 0x2a6   : > { %5500 = vmatprep.mubr.f32.mxu0 %v13788_v0  ;;  %11329 = vmatprep.subr.msk.mxu0 %vm3341_vm11, %v5601_v18  ;;  %v5920_v21 = vpop.permute.xlu0 %5919 }
 0x2a7   : > { %11333 = vmatpush1.msk.msra.mxu1 %vm3341_vm11, %v5602_v20  ;;  %11325 = vmatmul.mubr.msk.f32.vlgmr.msra.gmra.mrb[6].mxu0 %vm3337_vm12, %v11316_v11  ;;  %v5930_v28 = vsel %vm2972_vm10, %v5918_v19, %v5920_v21 }
 0x2a8   : > { %11330 = vmatpush1.msk.msra.mxu0 %vm3341_vm11, %v5600_v23  ;;  %5758 = vmatprep.mubr.f32.mxu1 %v13788_v0  ;;  %v8466_v23 = vld [vmem:[%s17449_s6] sm:$0xff] }
 0x2a9   : > { %11334 = vmatmul.mubr.msk.f32.vlgmr.msra.gmra.mrb[20].mxu1 %vm3337_vm12, %v11328_v22  ;;  %v5916_v24 = vpop.permute.xlu1 %5915  ;;  %5687 = vmatprep.mubr.f32.mxu0 %v13788_v0 }
 0x2aa   : > { %12685 = vmatprep.subr.mxu1 %v13788_v0  ;;  %v5599_v25 = vpop.permute.xlu0 %5598  ;;  %12687 = vmatprep.mubr.msk.f32.mxu1 %vm13798_vm3, %v13788_v0  ;;  %v5929_v31 = vsel %vm2972_vm10, %v5916_v24, %v5918_v19 }
 0x2ab   : > { %11331 = vmatmul.mubr.msk.f32.vlgmr.msra.gmra.mrb[4].mxu0 %vm3337_vm12, %v11328_v22  ;;  %v5605_v26 = vsel %vm2639_vm9, %v5597_v8, %v5599_v25  ;;  %12686 = vmatpush3.msk.msra.mxu1 %vm3341_vm11, %v5599_v25 }
 0x2ac   : > { %11335 = vmatprep.subr.msk.mxu0 %vm3341_vm11, %v5605_v26  ;;  %5829 = vmatprep.mubr.f32.mxu0 %v13788_v0 }
 0x2ad   : > { %12688 = vmatmul.mubr.msk.f32.vlgmr.msra.gmra.mrb[36].mxu1 %vm3337_vm12, %v11328_v22  ;;  %v5924_v29 = vpop.permute.xlu1 %5923  ;;  %11336 = vmatpush1.msk.msra.mxu0 %vm3341_vm11, %v5604_v27 }
 0x2ae   : > { %11341 = vmatprep.subr.msk.mxu0 %vm3341_vm11, %v5930_v28  ;;  %v5922_v30 = vpop.permute.xlu0 %5921  ;;  %6087 = vmatprep.mubr.f32.mxu1 %v13788_v0 }
 0x2af   : > { %11337 = vmatmul.mubr.msk.f32.vlgmr.msra.gmra.mrb[6].mxu0 %vm3337_vm12, %v11328_v22  ;;  %v5931_v32 = vsel %vm2972_vm10, %v5920_v21, %v5922_v30  ;;  %v5932_v33 = vsel %vm2972_vm10, %v5922_v30, %v5924_v29 }
 0x2b0   : > { %11342 = vmatpush1.msk.msra.mxu0 %vm3341_vm11, %v5929_v31  ;;  %11344 = vmatprep.subr.msk.mxu1 %vm3341_vm11, %v5932_v33  ;;  %v11352_v31 = vld [vmem:[%s17448_s5 + $0x8] sm:$0xff] }
 0x2b1   : > { %v5928_v35 = vpop.permute.xlu1 %5927  ;;  %6016 = vmatprep.mubr.f32.mxu0 %v13788_v0  ;;  %11345 = vmatpush1.msk.msra.mxu1 %vm3341_vm11, %v5931_v32 }
 0x2b2   : > { %11346 = vmatmul.mubr.msk.f32.vlgmr.msra.gmra.mrb[20].mxu1 %vm3337_vm12, %v11340_v34  ;;  %12690 = vmatprep.subr.mxu1 %v13788_v0  ;;  %v5926_v36 = vpop.permute.xlu0 %5925 }
 0x2b3   : > { %11343 = vmatmul.mubr.msk.f32.vlgmr.msra.gmra.mrb[4].mxu0 %vm3337_vm12, %v11340_v34  ;;  %v5933_v37 = vsel %vm2972_vm10, %v5924_v29, %v5926_v36  ;;  %v5934_v38 = vsel %vm2972_vm10, %v5926_v36, %v5928_v35  ;;  %12691 = vmatpush3.msk.msra.mxu1 %vm3341_vm11, %v5928_v35 }
 0x2b4   : > { %11347 = vmatprep.subr.msk.mxu0 %vm3341_vm11, %v5934_v38  ;;  %6158 = vmatprep.mubr.f32.mxu0 %v13788_v0 }
 0x2b5   : > { %11348 = vmatpush1.msk.msra.mxu0 %vm3341_vm11, %v5933_v37  ;;  %12692 = vmatprep.mubr.msk.f32.mxu1 %vm13798_vm3, %v13788_v0 }
 0x2b6   : > { %12693 = vmatmul.mubr.msk.f32.vlgmr.msra.gmra.mrb[38].mxu1 %vm3337_vm12, %v11340_v34 }
 0x2b7   : > { %11349 = vmatmul.mubr.msk.f32.vlgmr.msra.gmra.mrb[6].mxu0 %vm3337_vm12, %v11340_v34  ;;  %6433 = vmatprep.mubr.f32.mxu1 %v13788_v0 }
 0x2b8   : > { %6362 = vmatprep.mubr.f32.mxu0 %v13788_v0 }
 0x2c3   : > { %v6246_v62 = vpop.permute.xlu0 %6245 }
 0x347   : > { %v3635_v39 = vpop.f32.mrb[22].mxu1 }
 0x348   : > { %v12654_v40 = vpop.f32.mrb[23].mxu1 }
 0x350   : > { %v3935_v41 = vpop.f32.mrb[24].mxu1 }
 0x351   : > { %v3936_v42 = vadd.f32 %v3935_v41, %v3635_v39  ;;  %v12659_v43 = vpop.f32.mrb[25].mxu1 }
 0x358   : > { %v4257_v44 = vpop.f32.mrb[26].mxu1 }
 0x359   : > { %v4267_v45 = vadd.f32 %v4257_v44, %v3936_v42  ;;  %v12664_v46 = vpop.f32.mrb[27].mxu1 }
 0x360   : > { %v4586_v47 = vpop.f32.mrb[28].mxu1 }
 0x361   : > { %v4596_v48 = vadd.f32 %v4586_v47, %v4267_v45  ;;  %v12669_v49 = vpop.f32.mrb[29].mxu1  ;;  %v6262_v47 = vld [vmem:[%s17448_s5] sm:$0xff] }
 0x368   : > { %v4915_v50 = vpop.f32.mrb[30].mxu1 }
 0x369   : > { %v4925_v51 = vadd.f32 %v4915_v50, %v4596_v48  ;;  %v12674_v52 = vpop.f32.mrb[31].mxu1 }
 0x370   : > { %v5244_v53 = vpop.f32.mrb[32].mxu1 }
 0x371   : > { %v5254_v54 = vadd.f32 %v5244_v53, %v4925_v51  ;;  %v12679_v55 = vpop.f32.mrb[33].mxu1 }
 0x378   : > { %v5573_v56 = vpop.f32.mrb[34].mxu1 }
 0x379   : > { %v5583_v57 = vadd.f32 %v5573_v56, %v5254_v54  ;;  %v12684_v58 = vpop.f32.mrb[35].mxu1  ;;  %v11359_v56 = vld [vmem:[%s17448_s5 + $0x10] sm:$0xff] }
 0x380   : > { %v5902_v59 = vpop.f32.mrb[36].mxu1 }
 0x381   : > { %v5912_v60 = vadd.f32 %v5902_v59, %v5583_v57  ;;  %v12689_v61 = vpop.f32.mrb[37].mxu1 }
 0x385   : > { %v6089_v63 = vpop.f32.mrb[20].mxu1 }
 0x386   : > { %v6018_v1 = vpop.f32.mrb[4].mxu0  ;;  %v6091_v2 = vpop.f32.mrb[21].mxu1  ;;  %v6250_v8 = vadd.f32 %v6246_v62, %v6089_v63 }
 0x387   : > { %v6248_v3 = vadd.f32 %v6246_v62, %v6018_v1  ;;  %v6020_v4 = vpop.f32.mrb[5].mxu0  ;;  %v6251_v16 = vadd.f32 %v6246_v62, %v6091_v2  ;;  %v11363_v2 = vld [vmem:[%s17448_s5 + $0x18] sm:$0xff] }
 0x388   : > { %v6249_v5 = vadd.f32 %v6246_v62, %v6020_v4  ;;  %v14756_v14 = vmax.f32 %v6250_v8, 0.0 }
 0x389   : > { %v14748_v6 = vmax.f32 %v6248_v3, 0.0  ;;  %v6231_v7 = vpop.f32.mrb[38].mxu1  ;;  %v14780_v18 = vmax.f32 %v6251_v16, 0.0 }
 0x38a   : > { %v14750_v9 = vmax.f32 %v6249_v5, 0.0  ;;  %v6160_v10 = vpop.f32.mrb[6].mxu0  ;;  %v6241_v11 = vadd.f32 %v6231_v7, %v5912_v60  ;;  %v12694_v12 = vpop.f32.mrb[39].mxu1 }
 0x38b   : > { %v6162_v13 = vpop.f32.mrb[7].mxu0  ;;  %6271 = vrot.lane.b32.xlu0 %v14748_v6, %s13789_s26  ;;  %v6252_v15 = vadd.f32 %v6246_v62, %v6160_v10  ;;  %v11367_v12 = vld [vmem:[%s17448_s5 + $0x20] sm:$0xff] }
 0x38c   : > { %6273 = vrot.lane.b32.xlu1 %v14750_v9, %s13789_s26  ;;  %v6253_v19 = vadd.f32 %v6246_v62, %v6162_v13  ;;  %v6254_v21 = vadd.f32 %v6246_v62, %v6241_v11 }
 0x38d   : > { %v14774_v17 = vmax.f32 %v6252_v15, 0.0 }
 0x38e   : > { %v14794_v20 = vmax.f32 %v6253_v19, 0.0  ;;  %v6261_v22 = vmax.f32 %v6254_v21, 0.0 }
 0x38f   : > { %6729 = vrot.lane.b32.xlu0 %v14748_v6, %s13790_s27 }
 0x390   : > { %6275 = vrot.lane.b32.xlu1 %v14756_v14, %s13789_s26 }
 0x393   : > { %6976 = vrot.lane.b32.xlu0 %v14748_v6, %s13791_s28 }
 0x394   : > { %6733 = vrot.lane.b32.xlu1 %v14756_v14, %s13790_s27 }
 0x397   : > { %6731 = vrot.lane.b32.xlu0 %v14750_v9, %s13790_s27 }
 0x398   : > { %6980 = vrot.lane.b32.xlu1 %v14756_v14, %s13791_s28 }
 0x39b   : > { %6978 = vrot.lane.b32.xlu0 %v14750_v9, %s13791_s28 }
 0x39c   : > { %7227 = vrot.lane.b32.xlu1 %v14756_v14, %s13792_s29 }
 0x39f   : > { %7225 = vrot.lane.b32.xlu0 %v14750_v9, %s13792_s29 }
 0x3a0   : > { %6279 = vrot.lane.b32.xlu1 %v14774_v17, %s13789_s26 }
 0x3a3   : > { %6277 = vrot.lane.b32.xlu0 %v14780_v18, %s13789_s26 }
 0x3a4   : > { %6737 = vrot.lane.b32.xlu1 %v14774_v17, %s13790_s27 }
 0x3a7   : > { %7223 = vrot.lane.b32.xlu0 %v14748_v6, %s13792_s29 }
 0x3a8   : > { %6984 = vrot.lane.b32.xlu1 %v14774_v17, %s13791_s28 }
 0x3ab   : > { %7472 = vrot.lane.b32.xlu0 %v14750_v9, %s13793_s14 }
 0x3ac   : > { %7231 = vrot.lane.b32.xlu1 %v14774_v17, %s13792_s29 }
 0x3af   : > { %6735 = vrot.lane.b32.xlu0 %v14780_v18, %s13790_s27 }
 0x3b0   : > { %6281 = vrot.lane.b32.xlu1 %v14794_v20, %s13789_s26 }
 0x3b3   : > { %6982 = vrot.lane.b32.xlu0 %v14780_v18, %s13791_s28 }
 0x3b4   : > { %7474 = vrot.lane.b32.xlu1 %v14756_v14, %s13793_s14 }
 0x3b7   : > { %7229 = vrot.lane.b32.xlu0 %v14780_v18, %s13792_s29 }
 0x3b8   : > { %7478 = vrot.lane.b32.xlu1 %v14774_v17, %s13793_s14 }
 0x3bb   : > { %7476 = vrot.lane.b32.xlu0 %v14780_v18, %s13793_s14 }
 0x3bc   : > { %7722 = vrot.lane.b32.xlu1 %v14756_v14, %s13794_s16 }
 0x3bf   : > { %7470 = vrot.lane.b32.xlu0 %v14748_v6, %s13793_s14 }
 0x3c0   : > { %6739 = vrot.lane.b32.xlu1 %v14794_v20, %s13790_s27  ;;  %s12005_s27 = sshll.u32 %s13873_s13, 4  ;;  %s13801_s13 = smov [#allocation2]  }
 0x3c1   : > { %s13728_s23 = sshll.u32 %s13801_s13, 4  ;;  %s13729_s23 = int_to_ptr.vmem [resolvable:$false] %s13728_s23 }
 0x3c2   : > { %s13730_s24 = scalar_lea.vmem %s13729_s23, 32 }
 0x3c3   : > { %7720 = vrot.lane.b32.xlu0 %v14750_v9, %s13794_s16 }
 0x3c4   : > { %7726 = vrot.lane.b32.xlu1 %v14774_v17, %s13794_s16 }
 0x3c7   : > { %7724 = vrot.lane.b32.xlu0 %v14780_v18, %s13794_s16 }
 0x3c8   : > { %6986 = vrot.lane.b32.xlu1 %v14794_v20, %s13791_s28 }
 0x3cb   : > { %7718 = vrot.lane.b32.xlu0 %v14748_v6, %s13794_s16 }
 0x3cc   : > { %7970 = vrot.lane.b32.xlu1 %v14750_v9, %s13795_s17 }
 0x3cf   : > { %7972 = vrot.lane.b32.xlu0 %v14756_v14, %s13795_s17 }
 0x3d0   : > { %7233 = vrot.lane.b32.xlu1 %v14794_v20, %s13792_s29 }
 0x3d3   : > { %7976 = vrot.lane.b32.xlu0 %v14774_v17, %s13795_s17 }
 0x3d4   : > { %7974 = vrot.lane.b32.xlu1 %v14780_v18, %s13795_s17 }
 0x3d7   : > { %7730 = vrot.lane.b32.xlu0 %v6261_v22, %s13794_s16 }
 0x3d8   : > { %7480 = vrot.lane.b32.xlu1 %v14794_v20, %s13793_s14 }
 0x3db   : > { %7978 = vrot.lane.b32.xlu0 %v14794_v20, %s13795_s17 }
 0x3dc   : > { %7968 = vrot.lane.b32.xlu1 %v14748_v6, %s13795_s17 }
 0x3df   : > { %8220 = vrot.lane.b32.xlu0 %v14750_v9, %s13796_s21 }
 0x3e0   : > { %7728 = vrot.lane.b32.xlu1 %v14794_v20, %s13794_s16 }
 0x3e3   : > { %8224 = vrot.lane.b32.xlu0 %v14780_v18, %s13796_s21 }
 0x3e4   : > { %8222 = vrot.lane.b32.xlu1 %v14756_v14, %s13796_s21 }
 0x3e7   : > { %8218 = vrot.lane.b32.xlu0 %v14748_v6, %s13796_s21 }
 0x3e8   : > { %7980 = vrot.lane.b32.xlu1 %v6261_v22, %s13795_s17 }
 0x3eb   : > { %8230 = vrot.lane.b32.xlu0 %v6261_v22, %s13796_s21  ;;  %v11371_v22 = vld [vmem:[%s17448_s5 + $0x28] sm:$0xff] }
 0x3ec   : > { %8226 = vrot.lane.b32.xlu1 %v14774_v17, %s13796_s21 }
 0x3f0   : > { %8228 = vrot.lane.b32.xlu1 %v14794_v20, %s13796_s21  ;;  %s17401_s21 = scalar_lea.hbm %s17452_s9, %s12005_s27 }
 0x3f4   : > { %8469 = vperm.xlu1 %13698, %v8466_v23  }
 0x3fd   : > { %v6272_v24 = vpop.permute.xlu0 %6271 }
 0x3fe   : > { %v6274_v25 = vpop.permute.xlu1 %6273 }
 0x3ff   : > { %v6283_v29 = vsel %vm358_vm0, %v6272_v24, %v6274_v25 }
 0x401   : > { %v14862_v26 = vpop.permute.xlu0 %6729 }
 0x402   : > { %v6276_v27 = vpop.permute.xlu1 %6275 }
 0x403   : > { %v6284_v28 = vsel %vm358_vm0, %v6274_v25, %v6276_v27 }
 0x404   : > { %6298 = vmatprep.subr.mxu0 %v6284_v28 }
 0x405   : > { %6299 = vmatpush1.msra.mxu0 %v6283_v29  ;;  %v14866_v30 = vpop.permute.xlu0 %6976 }
 0x406   : > { %v6734_v32 = vpop.permute.xlu1 %6733  ;;  %11353 = vmatmul.mubr.msk.f32.vlgmr.msra.gmra.mrb[8].mxu0 %vm6294_vm13, %v11352_v31 }
 0x407   : > { %6504 = vmatprep.mubr.f32.mxu0 %v13788_v0 }
 0x409   : > { %v6732_v33 = vpop.permute.xlu0 %6731 }
 0x40a   : > { %v14873_v34 = vpop.permute.xlu1 %6980  ;;  %v6742_v60 = vsel %vm983_vm4, %v6732_v33, %v6734_v32  ;;  %v6741_v62 = vsel %vm983_vm4, %v14862_v26, %v6732_v33 }
 0x40d   : > { %v14875_v35 = vpop.permute.xlu0 %6978 }
 0x40e   : > { %v14877_v36 = vpop.permute.xlu1 %7227  ;;  %v6989_v8 = vsel %vm1313_vm5, %v14875_v35, %v14873_v34 }
 0x411   : > { %v14879_v37 = vpop.permute.xlu0 %7225 }
 0x412   : > { %v6280_v38 = vpop.permute.xlu1 %6279 }
 0x415   : > { %v6278_v39 = vpop.permute.xlu0 %6277 }
 0x416   : > { %v6285_v40 = vsel %vm358_vm0, %v6276_v27, %v6278_v39  ;;  %v14882_v41 = vpop.permute.xlu1 %6737  ;;  %v6286_v42 = vsel %vm358_vm0, %v6278_v39, %v6280_v38 }
 0x417   : > { %6369 = vmatprep.subr.mxu1 %v6286_v42 }
 0x418   : > { %6370 = vmatpush1.msra.mxu1 %v6285_v40 }
 0x419   : > { %11354 = vmatmul.mubr.msk.f32.vlgmr.msra.gmra.mrb[40].mxu1 %vm6294_vm13, %v11352_v31  ;;  %6585 = vmatprep.subr.mxu1 %v14780_v18  ;;  %v14887_v43 = vpop.permute.xlu0 %7223  ;;  %v7236_v18 = vsel %vm1643_vm6, %v14879_v37, %v14877_v36 }
 0x41a   : > { %v14889_v44 = vpop.permute.xlu1 %6984  ;;  %6586 = vmatpush1.msra.mxu1 %v14756_v14  ;;  %6649 = vmatprep.mubr.f32.mxu1 %v13788_v0  ;;  %v7235_v19 = vsel %vm1643_vm6, %v14887_v43, %v14879_v37 }
 0x41d   : > { %v14893_v45 = vpop.permute.xlu0 %7472 }
 0x41e   : > { %v14895_v46 = vpop.permute.xlu1 %7231 }
 0x421   : > { %11357 = vmatmul.mubr.msk.f32.vlgmr.msra.gmra.mrb[40].mxu1 %vm6294_vm13, %v6262_v47  ;;  %v6736_v48 = vpop.permute.xlu0 %6735 }
 0x422   : > { %v6743_v49 = vsel %vm983_vm4, %v6734_v32, %v6736_v48  ;;  %v6282_v50 = vpop.permute.xlu1 %6281  ;;  %v6744_v51 = vsel %vm983_vm4, %v6736_v48, %v14882_v41  ;;  %6890 = vmatprep.mubr.f32.mxu1 %v13788_v0 }
 0x423   : > { %v6287_v52 = vsel %vm358_vm0, %v6280_v38, %v6282_v50  ;;  %6440 = vmatprep.subr.mxu0 %v6282_v50  ;;  %6826 = vmatprep.subr.mxu1 %v6744_v51 }
 0x424   : > { %6441 = vmatpush1.msra.mxu0 %v6287_v52  ;;  %6827 = vmatpush1.msra.mxu1 %v6743_v49 }
 0x425   : > { %11355 = vmatmul.mubr.msk.f32.vlgmr.msra.gmra.mrb[10].mxu0 %vm6294_vm13, %v11352_v31  ;;  %6514 = vmatprep.subr.mxu0 %v14750_v9  ;;  %v6983_v53 = vpop.permute.xlu0 %6982  ;;  %v6988_v9 = vsel %vm1313_vm5, %v14866_v30, %v14875_v35  ;;  %v11375_v31 = vld [vmem:[%s17448_s5 + $0x30] sm:$0xff] }
 0x426   : > { %v14908_v54 = vpop.permute.xlu1 %7474  ;;  %6515 = vmatpush1.msra.mxu0 %v14748_v6  ;;  %v6991_v55 = vsel %vm1313_vm5, %v6983_v53, %v14889_v44  ;;  %6578 = vmatprep.mubr.f32.mxu0 %v13788_v0  ;;  %v6990_v57 = vsel %vm1313_vm5, %v14873_v34, %v6983_v53 }
 0x427   : > { %6656 = vmatprep.subr.mxu0 %v14794_v20  ;;  %7073 = vmatprep.subr.mxu1 %v6991_v55  ;;  %v7483_v27 = vsel %vm1973_vm7, %v14893_v45, %v14908_v54 }
 0x429   : > { %11356 = vmatmul.mubr.msk.f32.vlgmr.msra.gmra.mrb[8].mxu0 %vm6294_vm13, %v6262_v47  ;;  %11361 = vmatmul.mubr.msk.f32.vlgmr.msra.gmra.mrb[40].mxu1 %vm6294_vm13, %v11359_v56  ;;  %v7230_v58 = vpop.permute.xlu0 %7229 }
 0x42a   : > { %6657 = vmatpush1.msra.mxu0 %v14774_v17  ;;  %7074 = vmatpush1.msra.mxu1 %v6990_v57  ;;  %v14923_v59 = vpop.permute.xlu1 %7478  ;;  %v7238_v61 = vsel %vm1643_vm6, %v7230_v58, %v14895_v46  ;;  %v7237_v3 = vsel %vm1643_vm6, %v14877_v36, %v7230_v58  ;;  %v11383_v58 = vld [vmem:[%s17448_s5 + $0x40] sm:$0xff] }
 0x42b   : > { %6755 = vmatprep.subr.mxu0 %v6742_v60  ;;  %7320 = vmatprep.subr.mxu1 %v7238_v61 }
 0x42c   : > { %6720 = vmatprep.mubr.f32.mxu0 %v13788_v0  ;;  %7137 = vmatprep.mubr.f32.mxu1 %v13788_v0 }
 0x42d   : > { %11358 = vmatmul.mubr.msk.f32.vlgmr.msra.gmra.mrb[10].mxu0 %vm6294_vm13, %v6262_v47  ;;  %v7477_v63 = vpop.permute.xlu0 %7476 }
 0x42e   : > { %6756 = vmatpush1.msra.mxu0 %v6741_v62  ;;  %v14933_v1 = vpop.permute.xlu1 %7722  ;;  %6819 = vmatprep.mubr.f32.mxu0 %v13788_v0  ;;  %v7485_v6 = vsel %vm1973_vm7, %v7477_v63, %v14923_v59  ;;  %v7484_v13 = vsel %vm1973_vm7, %v14908_v54, %v7477_v63 }
 0x431   : > { %11365 = vmatmul.mubr.msk.f32.vlgmr.msra.gmra.mrb[40].mxu1 %vm6294_vm13, %v11363_v2  ;;  %v7471_v4 = vpop.permute.xlu0 %7470  ;;  %11360 = vmatmul.mubr.msk.f32.vlgmr.msra.gmra.mrb[8].mxu0 %vm6294_vm13, %v11359_v56 }
 0x432   : > { %7321 = vmatpush1.msra.mxu1 %v7237_v3  ;;  %v6740_v5 = vpop.permute.xlu1 %6739  ;;  %6961 = vmatprep.mubr.f32.mxu0 %v13788_v0  ;;  %v7482_v28 = vsel %vm1973_vm7, %v7471_v4, %v14893_v45 }
 0x433   : > { %v6745_v7 = vsel %vm983_vm4, %v14882_v41, %v6740_v5  ;;  %7567 = vmatprep.subr.mxu1 %v7485_v6  ;;  %6897 = vmatprep.subr.mxu0 %v6740_v5  ;;  %v11379_v41 = vld [vmem:[%s17448_s5 + $0x38] sm:$0xff] }
 0x434   : > { %6898 = vmatpush1.msra.mxu0 %v6745_v7  ;;  %7384 = vmatprep.mubr.f32.mxu1 %v13788_v0 }
 0x435   : > { %7002 = vmatprep.subr.mxu0 %v6989_v8  ;;  %v14955_v10 = vpop.permute.xlu0 %7720  ;;  %11362 = vmatmul.mubr.msk.f32.vlgmr.msra.gmra.mrb[10].mxu0 %vm6294_vm13, %v11359_v56 }
 0x436   : > { %v14958_v11 = vpop.permute.xlu1 %7726  ;;  %7003 = vmatpush1.msra.mxu0 %v6988_v9  ;;  %7066 = vmatprep.mubr.f32.mxu0 %v13788_v0  ;;  %v7733_v37 = vsel %vm2306_vm8, %v14955_v10, %v14933_v1 }
 0x439   : > { %11369 = vmatmul.mubr.msk.f32.vlgmr.msra.gmra.mrb[40].mxu1 %vm6294_vm13, %v11367_v12  ;;  %v7725_v14 = vpop.permute.xlu0 %7724  ;;  %11364 = vmatmul.mubr.msk.f32.vlgmr.msra.gmra.mrb[8].mxu0 %vm6294_vm13, %v11363_v2 }
 0x43a   : > { %7568 = vmatpush1.msra.mxu1 %v7484_v13  ;;  %v6987_v15 = vpop.permute.xlu1 %6986  ;;  %v7735_v16 = vsel %vm2306_vm8, %v7725_v14, %v14958_v11  ;;  %7208 = vmatprep.mubr.f32.mxu0 %v13788_v0  ;;  %v7734_v23 = vsel %vm2306_vm8, %v14933_v1, %v7725_v14 }
 0x43b   : > { %v6992_v17 = vsel %vm1313_vm5, %v14889_v44, %v6987_v15  ;;  %7144 = vmatprep.subr.mxu0 %v6987_v15  ;;  %7818 = vmatprep.subr.mxu1 %v7735_v16 }
 0x43c   : > { %7145 = vmatpush1.msra.mxu0 %v6992_v17  ;;  %7631 = vmatprep.mubr.f32.mxu1 %v13788_v0 }
 0x43d   : > { %7249 = vmatprep.subr.mxu0 %v7236_v18  ;;  %v7719_v20 = vpop.permute.xlu0 %7718  ;;  %11366 = vmatmul.mubr.msk.f32.vlgmr.msra.gmra.mrb[10].mxu0 %vm6294_vm13, %v11363_v2 }
 0x43e   : > { %v7971_v21 = vpop.permute.xlu1 %7970  ;;  %7250 = vmatpush1.msra.mxu0 %v7235_v19  ;;  %7313 = vmatprep.mubr.f32.mxu0 %v13788_v0  ;;  %v7732_v38 = vsel %vm2306_vm8, %v7719_v20, %v14955_v10  ;;  %v8619_v19 = vld [vmem:[%s17450_s7 + $0x200] sm:$0xff]  ;;  %v8620_v20 = vld [vmem:[%s17450_s7 + $0x208] sm:$0xff] }
 0x441   : > { %11373 = vmatmul.mubr.msk.f32.vlgmr.msra.gmra.mrb[40].mxu1 %vm6294_vm13, %v11371_v22  ;;  %v7973_v24 = vpop.permute.xlu0 %7972  ;;  %11368 = vmatmul.mubr.msk.f32.vlgmr.msra.gmra.mrb[8].mxu0 %vm6294_vm13, %v11367_v12 }
 0x442   : > { %7819 = vmatpush1.msra.mxu1 %v7734_v23  ;;  %v7234_v25 = vpop.permute.xlu1 %7233  ;;  %7455 = vmatprep.mubr.f32.mxu0 %v13788_v0  ;;  %v7983_v47 = vsel %vm2639_vm9, %v7971_v21, %v7973_v24  ;;  %v12760_v23 = vpack.c.bf16 %v8620_v20, %v8619_v19  ;;  %v8632_v19 = vld [vmem:[%s17450_s7 + $0x268] sm:$0xff] }
 0x443   : > { %v7239_v26 = vsel %vm1643_vm6, %v14895_v46, %v7234_v25  ;;  %7391 = vmatprep.subr.mxu0 %v7234_v25  ;;  %7882 = vmatprep.mubr.f32.mxu1 %v13788_v0  ;;  %v8571_v25 = vld [vmem:[%s17450_s7 + $0x80] sm:$0xff] }
 0x444   : > { %7392 = vmatpush1.msra.mxu0 %v7239_v26  ;;  %v8572_v26 = vld [vmem:[%s17450_s7 + $0x88] sm:$0xff] }
 0x445   : > { %7496 = vmatprep.subr.mxu0 %v7483_v27  ;;  %v7977_v29 = vpop.permute.xlu0 %7976  ;;  %11370 = vmatmul.mubr.msk.f32.vlgmr.msra.gmra.mrb[10].mxu0 %vm6294_vm13, %v11367_v12  ;;  %v12695_v27 = vpack.c.bf16 %v8572_v26, %v8571_v25  ;;  %v8584_v25 = vld [vmem:[%s17450_s7 + $0xe8] sm:$0xff] }
 0x446   : > { %v7975_v30 = vpop.permute.xlu1 %7974  ;;  %7497 = vmatpush1.msra.mxu0 %v7482_v28  ;;  %7560 = vmatprep.mubr.f32.mxu0 %v13788_v0 }
 0x447   : > { %v7984_v32 = vsel %vm2639_vm9, %v7973_v24, %v7975_v30  ;;  %v7985_v33 = vsel %vm2639_vm9, %v7975_v30, %v7977_v29  ;;  %v8622_v24 = vld [vmem:[%s17450_s7 + $0x218] sm:$0xff]  ;;  %v8556_v30 = vld [vmem:[%s17450_s7 + $0x8] sm:$0xff] }
 0x448   : > { %8068 = vmatprep.subr.mxu1 %v7985_v33 }
 0x449   : > { %11377 = vmatmul.mubr.msk.f32.vlgmr.msra.gmra.mrb[40].mxu1 %vm6294_vm13, %v11375_v31  ;;  %v7731_v34 = vpop.permute.xlu0 %7730  ;;  %11372 = vmatmul.mubr.msk.f32.vlgmr.msra.gmra.mrb[8].mxu0 %vm6294_vm13, %v11371_v22 }
 0x44a   : > { %8069 = vmatpush1.msra.mxu1 %v7984_v32  ;;  %v7481_v35 = vpop.permute.xlu1 %7480  ;;  %7702 = vmatprep.mubr.f32.mxu0 %v13788_v0 }
 0x44b   : > { %v7486_v36 = vsel %vm1973_vm7, %v14923_v59, %v7481_v35  ;;  %7638 = vmatprep.subr.mxu0 %v7481_v35  ;;  %8132 = vmatprep.mubr.f32.mxu1 %v13788_v0  ;;  %v8624_v35 = vld [vmem:[%s17450_s7 + $0x228] sm:$0xff] }
 0x44c   : > { %7639 = vmatpush1.msra.mxu0 %v7486_v36 }
 0x44d   : > { %7747 = vmatprep.subr.mxu0 %v7733_v37  ;;  %v7979_v39 = vpop.permute.xlu0 %7978  ;;  %11374 = vmatmul.mubr.msk.f32.vlgmr.msra.gmra.mrb[10].mxu0 %vm6294_vm13, %v11371_v22  ;;  %v13799_v22 = vmov 0.0|0.0   ;;  %v8574_v37 = vld [vmem:[%s17450_s7 + $0x98] sm:$0xff] }
 0x44e   : > { %v7969_v40 = vpop.permute.xlu1 %7968  ;;  %7748 = vmatpush1.msra.mxu0 %v7732_v38  ;;  %7811 = vmatprep.mubr.f32.mxu0 %v13788_v0  ;;  %v7986_v53 = vsel %vm2639_vm9, %v7977_v29, %v7979_v39  ;;  %v8555_v29 = vld [vmem:[%s17450_s7] sm:$0xff] }
 0x44f   : > { %v7982_v48 = vsel %vm2639_vm9, %v7969_v40, %v7971_v21  ;;  %v8621_v21 = vld [vmem:[%s17450_s7 + $0x210] sm:$0xff]  ;;  %v12697_v36 = vpack.c.bf16 %v8556_v30, %v8555_v29  ;;  %v8558_v40 = vld [vmem:[%s17450_s7 + $0x18] sm:$0xff] }
 0x450   : > { %v12763_v28 = vpack.c.bf16 %v8622_v24, %v8621_v21  ;;  %v8565_v21 = vld [vmem:[%s17450_s7 + $0x50] sm:$0xff]  ;;  %v8583_v24 = vld [vmem:[%s17450_s7 + $0xe0] sm:$0xff]  ;;  %v8634_v29 = vld [vmem:[%s17450_s7 + $0x278] sm:$0xff] }
 0x451   : > { %v8221_v42 = vpop.permute.xlu0 %8220  ;;  %11376 = vmatmul.mubr.msk.f32.vlgmr.msra.gmra.mrb[8].mxu0 %vm6294_vm13, %v11375_v31  ;;  %11381 = vmatmul.mubr.msk.f32.vlgmr.msra.gmra.mrb[40].mxu1 %vm6294_vm13, %v11379_v41  ;;  %v12719_v30 = vpack.c.bf16 %v8584_v25, %v8583_v24 }
 0x452   : > { %v7729_v43 = vpop.permute.xlu1 %7728  ;;  %7953 = vmatprep.mubr.f32.mxu0 %v13788_v0  ;;  %8382 = vmatprep.mubr.f32.mxu1 %v13788_v0 }
 0x453   : > { %v7736_v44 = vsel %vm2306_vm8, %v14958_v11, %v7729_v43  ;;  %v7737_v45 = vsel %vm2306_vm8, %v7729_v43, %v7731_v34  ;;  %v8623_v34 = vld [vmem:[%s17450_s7 + $0x220] sm:$0xff] }
 0x454   : > { %7889 = vmatprep.subr.mxu0 %v7737_v45  ;;  %v12766_v43 = vpack.c.bf16 %v8624_v35, %v8623_v34  ;;  %v8635_v34 = vld [vmem:[%s17450_s7 + $0x280] sm:$0xff]  ;;  %v8636_v35 = vld [vmem:[%s17450_s7 + $0x288] sm:$0xff] }
 0x455   : > { %7890 = vmatpush1.msra.mxu0 %v7736_v44  ;;  %v8225_v46 = vpop.permute.xlu0 %8224  ;;  %v8625_v44 = vld [vmem:[%s17450_s7 + $0x230] sm:$0xff] }
 0x456   : > { %v8223_v49 = vpop.permute.xlu1 %8222  ;;  %11378 = vmatmul.mubr.msk.f32.vlgmr.msra.gmra.mrb[10].mxu0 %vm6294_vm13, %v11375_v31  ;;  %7997 = vmatprep.subr.mxu0 %v7983_v47  ;;  %v8573_v31 = vld [vmem:[%s17450_s7 + $0x90] sm:$0xff] }
 0x457   : > { %7998 = vmatpush1.msra.mxu0 %v7982_v48  ;;  %8061 = vmatprep.mubr.f32.mxu0 %v13788_v0  ;;  %v8233_v54 = vsel %vm2972_vm10, %v8221_v42, %v8223_v49  ;;  %v8234_v59 = vsel %vm2972_vm10, %v8223_v49, %v8225_v46  ;;  %v12699_v38 = vpack.c.bf16 %v8574_v37, %v8573_v31  ;;  %v8559_v48 = vld [vmem:[%s17450_s7 + $0x20] sm:$0xff]  ;;  %v8560_v49 = vld [vmem:[%s17450_s7 + $0x28] sm:$0xff] }
 0x458   : > { %v8567_v37 = vld [vmem:[%s17450_s7 + $0x60] sm:$0xff] }
 0x459   : > { %v8219_v51 = vpop.permute.xlu0 %8218 }
 0x45a   : > { %v7981_v50 = vpop.permute.xlu1 %7980  ;;  %11380 = vmatmul.mubr.msk.f32.vlgmr.msra.gmra.mrb[8].mxu0 %vm6294_vm13, %v11379_v41  ;;  %v8232_v55 = vsel %vm2972_vm10, %v8219_v51, %v8221_v42  ;;  %v8576_v42 = vld [vmem:[%s17450_s7 + $0xa8] sm:$0xff]  ;;  %v8578_v51 = vld [vmem:[%s17450_s7 + $0xb8] sm:$0xff] }
 0x45b   : > { %v7987_v52 = vsel %vm2639_vm9, %v7979_v39, %v7981_v50  ;;  %8203 = vmatprep.mubr.f32.mxu0 %v13788_v0  ;;  %v8557_v39 = vld [vmem:[%s17450_s7 + $0x10] sm:$0xff] }
 0x45c   : > { %8139 = vmatprep.subr.mxu0 %v7987_v52  ;;  %v12701_v45 = vpack.c.bf16 %v8558_v40, %v8557_v39  ;;  %v8577_v50 = vld [vmem:[%s17450_s7 + $0xb0] sm:$0xff] }
 0x45d   : > { %8140 = vmatpush1.msra.mxu0 %v7986_v53  ;;  %v8231_v60 = vpop.permute.xlu0 %8230  ;;  %v8627_v53 = vld [vmem:[%s17450_s7 + $0x240] sm:$0xff]  ;;  %v8585_v40 = vld [vmem:[%s17450_s7 + $0xf0] sm:$0xff] }
 0x45e   : > { %v8227_v56 = vpop.permute.xlu1 %8226  ;;  %11382 = vmatmul.mubr.msk.f32.vlgmr.msra.gmra.mrb[10].mxu0 %vm6294_vm13, %v11379_v41  ;;  %8247 = vmatprep.subr.mxu0 %v8233_v54  ;;  %v8575_v41 = vld [vmem:[%s17450_s7 + $0xa0] sm:$0xff]  ;;  %v12705_v54 = vpack.c.bf16 %v8560_v49, %v8559_v48 }
 0x45f   : > { %8248 = vmatpush1.msra.mxu0 %v8232_v55  ;;  %v8235_v57 = vsel %vm2972_vm10, %v8225_v46, %v8227_v56  ;;  %8311 = vmatprep.mubr.f32.mxu0 %v13788_v0  ;;  %v8626_v46 = vld [vmem:[%s17450_s7 + $0x238] sm:$0xff]  ;;  %v12703_v47 = vpack.c.bf16 %v8576_v42, %v8575_v41  ;;  %v8628_v55 = vld [vmem:[%s17450_s7 + $0x248] sm:$0xff]  ;;  %v8637_v42 = vld [vmem:[%s17450_s7 + $0x290] sm:$0xff] }
 0x460   : > { %8318 = vmatprep.subr.mxu1 %v8235_v57  ;;  %v12769_v52 = vpack.c.bf16 %v8626_v46, %v8625_v44  ;;  %v8561_v57 = vld [vmem:[%s17450_s7 + $0x30] sm:$0xff]  ;;  %v8586_v41 = vld [vmem:[%s17450_s7 + $0xf8] sm:$0xff]  ;;  %v8603_v49 = vld [vmem:[%s17450_s7 + $0x180] sm:$0xff] }
 0x461   : > { %8319 = vmatpush1.msra.mxu1 %v8234_v59  ;;  %v8579_v59 = vld [vmem:[%s17450_s7 + $0xc0] sm:$0xff]  ;;  %v8638_v44 = vld [vmem:[%s17450_s7 + $0x298] sm:$0xff] }
 0x462   : > { %v8229_v61 = vpop.permute.xlu1 %8228  ;;  %11384 = vmatmul.mubr.msk.f32.vlgmr.msra.gmra.mrb[8].mxu0 %vm6294_vm13, %v11383_v58  ;;  %11385 = vmatmul.mubr.msk.f32.vlgmr.msra.gmra.mrb[40].mxu1 %vm6294_vm13, %v11383_v58  ;;  %v8570_v46 = vld [vmem:[%s17450_s7 + $0x78] sm:$0xff] }
 0x463   : > { %v8236_v62 = vsel %vm2972_vm10, %v8227_v56, %v8229_v61  ;;  %v8237_v63 = vsel %vm2972_vm10, %v8229_v61, %v8231_v60  ;;  %8453 = vmatprep.mubr.f32.mxu0 %v13788_v0  ;;  %12696 = vmatprep.subr.bf16.mxu1 %v12695_v27  ;;  %v12707_v56 = vpack.c.bf16 %v8578_v51, %v8577_v50  ;;  %v8580_v60 = vld [vmem:[%s17450_s7 + $0xc8] sm:$0xff]  ;;  %v8639_v51 = vld [vmem:[%s17450_s7 + $0x2a0] sm:$0xff] }
 0x464   : > { %8389 = vmatprep.subr.mxu0 %v8237_v63  ;;  %12698 = vmatpush3.bf16.msra.mxu1 %v12697_v36  ;;  %v12772_v61 = vpack.c.bf16 %v8628_v55, %v8627_v53  ;;  %v12784_v36 = vpack.c.bf16 %v8636_v35, %v8635_v34  ;;  %v8604_v50 = vld [vmem:[%s17450_s7 + $0x188] sm:$0xff]  ;;  %v8589_v35 = vld [vmem:[%s17450_s7 + $0x110] sm:$0xff] }
 0x465   : > { %8390 = vmatpush1.msra.mxu0 %v8236_v62  ;;  %12700 = vmatprep.subr.bf16.mxu1 %v12699_v38  ;;  %v8629_v62 = vld [vmem:[%s17450_s7 + $0x250] sm:$0xff]  ;;  %v8568_v38 = vld [vmem:[%s17450_s7 + $0x68] sm:$0xff] }
 0x466   : > { %11386 = vmatmul.mubr.msk.f32.vlgmr.msra.gmra.mrb[10].mxu0 %vm6294_vm13, %v11383_v58  ;;  %12759 = vmatprep.subr.bf16.mxu0 %v13799_v22  ;;  %v8562_v58 = vld [vmem:[%s17450_s7 + $0x38] sm:$0xff]  ;;  %v12721_v39 = vpack.c.bf16 %v8568_v38, %v8567_v37  ;;  %v8640_v53 = vld [vmem:[%s17450_s7 + $0x2a8] sm:$0x7]  ;;  %v8607_v37 = vld [vmem:[%s17450_s7 + $0x1a0] sm:$0xff] }
 0x467   : > { %12761 = vmatpush1.bf16.msra.mxu0 %v12760_v23  ;;  %v12709_v63 = vpack.c.bf16 %v8562_v58, %v8561_v57  ;;  %v8566_v23 = vld [vmem:[%s17450_s7 + $0x58] sm:$0xff]  ;;  %v8608_v38 = vld [vmem:[%s17450_s7 + $0x1a8] sm:$0xff]  ;;  %v11933_v57 = vld [vmem:[%s17450_s7 + $0x1350] sm:$0xff] }
 0x468   : > { %12762 = vmatprep.subr.bf16.mxu0 %v13799_v22  ;;  %12702 = vmatpush3.bf16.msra.mxu1 %v12701_v45  ;;  %v12717_v27 = vpack.c.bf16 %v8566_v23, %v8565_v21  ;;  %v8569_v45 = vld [vmem:[%s17450_s7 + $0x70] sm:$0xff] }
 0x469   : > { %12704 = vmatprep.subr.bf16.mxu1 %v12703_v47  ;;  %v12787_v47 = vpack.c.bf16 %v8638_v44, %v8637_v42  ;;  %v12725_v48 = vpack.c.bf16 %v8570_v46, %v8569_v45  ;;  %v11455_v45 = vld [vmem:[%s17450_s7 + $0x4c0] sm:$0xff]  ;;  %v11456_v46 = vld [vmem:[%s17450_s7 + $0x4c8] sm:$0xff] }
 0x46b   : > { %12764 = vmatpush1.bf16.msra.mxu0 %v12763_v28  ;;  %v8633_v28 = vld [vmem:[%s17450_s7 + $0x270] sm:$0xff] }
 0x46c   : > { %12765 = vmatprep.subr.bf16.mxu0 %v13799_v22  ;;  %12706 = vmatpush3.bf16.msra.mxu1 %v12705_v54  ;;  %v12781_v31 = vpack.c.bf16 %v8634_v29, %v8633_v28  ;;  %v11453_v28 = vld [vmem:[%s17450_s7 + $0x4b0] sm:$0xff]  ;;  %v11454_v29 = vld [vmem:[%s17450_s7 + $0x4b8] sm:$0xff] }
 0x46d   : > { %12708 = vmatprep.subr.bf16.mxu1 %v12707_v56  ;;  %v12790_v56 = vpack.c.bf16 %v8640_v53, %v8639_v51  ;;  %v8609_v51 = vld [vmem:[%s17450_s7 + $0x1b0] sm:$0xff]  ;;  %v12861_v53 = vpack.c.bf16 %v11456_v46, %v11455_v45  ;;  %v11406_v45 = vld [vmem:[%s17450_s7 + $0x338] sm:$0xff] }
 0x46f   : > { %12767 = vmatpush1.bf16.msra.mxu0 %v12766_v43  ;;  %v12723_v43 = vpack.c.bf16 %v8586_v41, %v8585_v40  ;;  %v12858_v41 = vpack.c.bf16 %v11454_v29, %v11453_v28  ;;  %v8599_v28 = vld [vmem:[%s17450_s7 + $0x160] sm:$0xff]  ;;  %v8600_v29 = vld [vmem:[%s17450_s7 + $0x168] sm:$0xff] }
 0x470   : > { %12768 = vmatprep.subr.bf16.mxu0 %v13799_v22  ;;  %12710 = vmatpush3.bf16.msra.mxu1 %v12709_v63 }
 0x473   : > { %v8470_v1 = vpop.permute.xlu1 %8469  ;;  %12770 = vmatpush1.bf16.msra.mxu0 %v12769_v52  ;;  %v12727_v52 = vpack.c.bf16 %v8604_v50, %v8603_v49  ;;  %v8591_v49 = vld [vmem:[%s17450_s7 + $0x120] sm:$0xff]  ;;  %v8592_v50 = vld [vmem:[%s17450_s7 + $0x128] sm:$0xff] }
 0x474   : > { %12771 = vmatprep.subr.bf16.mxu0 %v13799_v22 }
 0x477   : > { %12773 = vmatpush1.bf16.msra.mxu0 %v12772_v61 }
 0x478   : > { %12774 = vmatprep.subr.bf16.mxu0 %v13799_v22 }
 0x535   : > { %v8313_v2 = vpop.f32.mrb[8].mxu0  ;;  %v8384_v3 = vpop.f32.mrb[40].mxu1 }
 0x536   : > { %v15051_v4 = vadd.f32 %v8470_v1, %v8313_v2  ;;  %v15053_v5 = vadd.f32 %v8470_v1, %v8384_v3  ;;  %v8315_v6 = vpop.f32.mrb[9].mxu0  ;;  %v8386_v7 = vpop.f32.mrb[41].mxu1  ;;  %v12711_v2 = vpack.c.bf16 %v8580_v60, %v8579_v59  ;;  %v8563_v3 = vld [vmem:[%s17450_s7 + $0x40] sm:$0xff] }
 0x537   : > { %v15055_v8 = vadd.f32 %v8470_v1, %v8315_v6  ;;  %v15057_v9 = vadd.f32 %v8470_v1, %v8386_v7  ;;  %v8564_v6 = vld [vmem:[%s17450_s7 + $0x48] sm:$0xff]  ;;  %v8581_v7 = vld [vmem:[%s17450_s7 + $0xd0] sm:$0xff] }
 0x538   : > { %v8478_v10 = vmax.f32 %v15051_v4, 0.0  ;;  %v8480_v0 = vmax.f32 %v15053_v5, 0.0  ;;  %12712 = vmatprep.subr.bf16.mxu1 %v12711_v2 }
 0x539   : > { %v8479_v11 = vmax.f32 %v15055_v8, 0.0  ;;  %v8481_v12 = vmax.f32 %v15057_v9, 0.0  ;;  %v8455_v13 = vpop.f32.mrb[10].mxu0 }
 0x53a   : > { %v15063_v14 = vadd.f32 %v8470_v1, %v8455_v13  ;;  %v8457_v15 = vpop.f32.mrb[11].mxu0  ;;  %v8582_v13 = vld [vmem:[%s17450_s7 + $0xd8] sm:$0xff] }
 0x53b   : > { %v13700_v16 = vpack.i.bf16 %v8480_v0, %v8479_v11  ;;  %v13705_v17 = vpack.i.bf16 %v8478_v10, %v8481_v12  ;;  %v15073_v18 = vadd.f32 %v8470_v1, %v8457_v15  ;;  %v8630_v1 = vld [vmem:[%s17450_s7 + $0x258] sm:$0xff]  ;;  %v12715_v20 = vpack.c.bf16 %v8582_v13, %v8581_v7 }
 0x53c   : > { %v8482_v32 = vmax.f32 %v15063_v14, 0.0  ;;  %v12775_v15 = vpack.c.bf16 %v8630_v1, %v8629_v62  ;;  %v8587_v14 = vld [vmem:[%s17450_s7 + $0x100] sm:$0xff] }
 0x53d   : > { %13706 = vrot.lane.b32.xlu1 %v13705_v17, %s13789_s26  ;;  %13701 = vrot.lane.b32.xlu0 %v13700_v16, %s13789_s26  ;;  %v8483_v33 = vmax.f32 %v15073_v18, 0.0  ;;  %v8631_v16 = vld [vmem:[%s17450_s7 + $0x260] sm:$0xff]  ;;  %v12713_v17 = vpack.c.bf16 %v8564_v6, %v8563_v3  ;;  %v8588_v18 = vld [vmem:[%s17450_s7 + $0x108] sm:$0xff] }
 0x53e   : > { %12776 = vmatpush1.bf16.msra.mxu0 %v12775_v15  ;;  %v12778_v26 = vpack.c.bf16 %v8632_v19, %v8631_v16  ;;  %v8606_v19 = vld [vmem:[%s17450_s7 + $0x198] sm:$0xff] }
 0x53f   : > { %12714 = vmatpush3.bf16.msra.mxu1 %v12713_v17  ;;  %12777 = vmatprep.subr.bf16.mxu0 %v13799_v22 }
 0x540   : > { %12716 = vmatprep.subr.bf16.mxu1 %v12715_v20 }
 0x541   : > { %8498 = vrot.lane.b32.xlu0 %v8482_v32, %s13789_s26  ;;  %8500 = vrot.lane.b32.xlu1 %v8483_v33, %s13789_s26 }
 0x542   : > { %12779 = vmatpush1.bf16.msra.mxu0 %v12778_v26 }
 0x543   : > { %12718 = vmatpush3.bf16.msra.mxu1 %v12717_v27  ;;  %12780 = vmatprep.subr.bf16.mxu0 %v13799_v22  ;;  %v12729_v27 = vpack.c.bf16 %v8588_v18, %v8587_v14  ;;  %v8598_v14 = vld [vmem:[%s17450_s7 + $0x158] sm:$0xff]  ;;  %v8615_v18 = vld [vmem:[%s17450_s7 + $0x1e0] sm:$0xff] }
 0x544   : > { %12720 = vmatprep.subr.bf16.mxu1 %v12719_v30 }
 0x546   : > { %12782 = vmatpush1.bf16.msra.mxu0 %v12781_v31 }
 0x547   : > { %12783 = vmatprep.subr.bf16.mxu0 %v13799_v22  ;;  %12722 = vmatpush3.bf16.msra.mxu1 %v12721_v39 }
 0x548   : > { %12724 = vmatprep.subr.bf16.mxu1 %v12723_v43 }
 0x54a   : > { %12785 = vmatpush1.bf16.msra.mxu0 %v12784_v36  ;;  %v8590_v36 = vld [vmem:[%s17450_s7 + $0x118] sm:$0xff] }
 0x54b   : > { %12786 = vmatprep.subr.bf16.mxu0 %v13799_v22  ;;  %12726 = vmatpush3.bf16.msra.mxu1 %v12725_v48  ;;  %v12733_v44 = vpack.c.bf16 %v8590_v36, %v8589_v35  ;;  %v12735_v48 = vpack.c.bf16 %v8608_v38, %v8607_v37  ;;  %v12753_v36 = vpack.c.bf16 %v8600_v29, %v8599_v28  ;;  %v11465_v37 = vld [vmem:[%s17450_s7 + $0x510] sm:$0xff]  ;;  %v11466_v38 = vld [vmem:[%s17450_s7 + $0x518] sm:$0xff] }
 0x54c   : > { %12728 = vmatprep.subr.bf16.mxu1 %v12727_v52  ;;  %v8610_v52 = vld [vmem:[%s17450_s7 + $0x1b8] sm:$0xff]  ;;  %v12876_v46 = vpack.c.bf16 %v11466_v38, %v11465_v37  ;;  %v11397_v28 = vld [vmem:[%s17450_s7 + $0x2f0] sm:$0xff] }
 0x54d   : > { %v11398_v29 = vld [vmem:[%s17450_s7 + $0x2f8] sm:$0xff]  ;;  %v11543_v38 = vld [vmem:[%s17450_s7 + $0x770] sm:$0xff] }
 0x54e   : > { %12788 = vmatpush1.bf16.msra.mxu0 %v12787_v47  ;;  %v12811_v37 = vpack.c.bf16 %v11398_v29, %v11397_v28  ;;  %v11554_v28 = vld [vmem:[%s17450_s7 + $0x7c8] sm:$0xff] }
 0x54f   : > { %12789 = vmatprep.subr.bf16.mxu0 %v13799_v22 }
 0x552   : > { %12792 = vmatpush1.bf16.msk.msra.mxu0 %vm15265_vm15, %v12790_v56  ;;  %v11458_v56 = vld [vmem:[%s17450_s7 + $0x4d8] sm:$0xff] }
 0x553   : > { %12857 = vmatprep.subr.bf16.mxu0 %v13799_v22 }
 0x5af   : > { %v13707_v54 = vpop.permute.xlu1 %13706  ;;  %v13702_v55 = vpop.permute.xlu0 %13701 }
 0x5b0   : > { %v13709_v58 = vunpack.i.h.bf16 %v13707_v54  ;;  %v13708_v59 = vunpack.i.l.bf16 %v13707_v54  ;;  %v13704_v60 = vunpack.i.h.bf16 %v13702_v55  ;;  %v13703_v61 = vunpack.i.l.bf16 %v13702_v55  ;;  %v11457_v55 = vld [vmem:[%s17450_s7 + $0x4d0] sm:$0xff] }
 0x5b1   : > { %v12737_v54 = vpack.c.bf16 %v8592_v50, %v8591_v49  ;;  %v11468_v49 = vld [vmem:[%s17450_s7 + $0x528] sm:$0xff] }
 0x5b2   : > { %v8504_v62 = vsel %vm358_vm0, %v13704_v60, %v13708_v59  ;;  %v8502_v63 = vsel %vm358_vm0, %v13709_v58, %v13703_v61  ;;  %v8503_v1 = vsel %vm358_vm0, %v13703_v61, %v13704_v60  ;;  %v12739_v58 = vpack.c.bf16 %v8610_v52, %v8609_v51  ;;  %v8594_v60 = vld [vmem:[%s17450_s7 + $0x138] sm:$0xff]  ;;  %v8611_v61 = vld [vmem:[%s17450_s7 + $0x1c0] sm:$0xff]  ;;  %v11389_v51 = vld [vmem:[%s17450_s7 + $0x2b0] sm:$0xff] }
 0x5b3   : > { %v15277_v2 = vmax.f32 %v8480_v0, %v8504_v62  ;;  %v8513_v3 = vmax.f32 %v8478_v10, %v8502_v63  ;;  %v8514_v6 = vmax.f32 %v8479_v11, %v8503_v1  ;;  %v8501_v7 = vpop.permute.xlu1 %8500  ;;  %v8499_v13 = vpop.permute.xlu0 %8498  ;;  %v8612_v62 = vld [vmem:[%s17450_s7 + $0x1c8] sm:$0xff]  ;;  %v12864_v63 = vpack.c.bf16 %v11458_v56, %v11457_v55  ;;  %v11390_v52 = vld [vmem:[%s17450_s7 + $0x2b8] sm:$0xff] }
 0x5b4   : > { %v8505_v15 = vsel %vm358_vm0, %v13708_v59, %v8499_v13  ;;  %v8506_v16 = vsel %vm358_vm0, %v8499_v13, %v8501_v7  ;;  %v8518_v8 = vmax.f32 %v8483_v33, %v8501_v7  ;;  %vm8641_vm0 = vcmask 351232   ;;  %v8605_v33 = vld [vmem:[%s17450_s7 + $0x190] sm:$0xff]  ;;  %v8595_v13 = vld [vmem:[%s17450_s7 + $0x140] sm:$0xff]  ;;  %v11408_v55 = vld [vmem:[%s17450_s7 + $0x348] sm:$0xff] }
 0x5b5   : > { %v8516_v17 = vmax.f32 %v8481_v12, %v8505_v15  ;;  %v8517_v5 = vmax.f32 %v8482_v32, %v8506_v16  ;;  %8525 = vrot.lane.b32.xlu1 %v8513_v3, %s13791_s28  ;;  %v13710_v4 = vpack.i.bf16 %v15277_v2, %v8514_v6  ;;  %v12731_v34 = vpack.c.bf16 %v8606_v19, %v8605_v33  ;;  %v8593_v59 = vld [vmem:[%s17450_s7 + $0x130] sm:$0xff]  ;;  %v8596_v15 = vld [vmem:[%s17450_s7 + $0x148] sm:$0xff] }
 0x5b6   : > { %v12741_v1 = vpack.c.bf16 %v8594_v60, %v8593_v59  ;;  %v12743_v7 = vpack.c.bf16 %v8612_v62, %v8611_v61  ;;  %v8613_v16 = vld [vmem:[%s17450_s7 + $0x1d0] sm:$0xff]  ;;  %v11391_v59 = vld [vmem:[%s17450_s7 + $0x2c0] sm:$0xff]  ;;  %v11392_v60 = vld [vmem:[%s17450_s7 + $0x2c8] sm:$0xff] }
 0x5b7   : > { %13711 = vrot.lane.b32.xlu0 %v13710_v4, %s13791_s28  ;;  %v13715_v10 = vpack.i.bf16 %v8517_v5, %v8516_v17  ;;  %v12745_v4 = vpack.c.bf16 %v8596_v15, %v8595_v13  ;;  %v11409_v62 = vld [vmem:[%s17450_s7 + $0x350] sm:$0xff]  ;;  %v11394_v15 = vld [vmem:[%s17450_s7 + $0x2d8] sm:$0xff] }
 0x5b8   : > { %v11393_v13 = vld [vmem:[%s17450_s7 + $0x2d0] sm:$0xff] }
 0x5b9   : > { %8535 = vrot.lane.b32.xlu1 %v8518_v8, %s13791_s28 }
 0x5bb   : > { %13716 = vrot.lane.b32.xlu0 %v13715_v10, %s13791_s28  ;;  %v11462_v10 = vld [vmem:[%s17450_s7 + $0x4f8] sm:$0xff]  ;;  %s323_s28 = sand.u32 1, %s13778_s10  }
 0x5bc   : > { %s324_s29 = scalar_lea.vmem [#allocation2], %s323_s28  ;;  %s11065_s26 = scalar_lea.sflag [#allocation3], %s323_s28 }
 0x5bd   : > { %s11077_s14 = sshll.u32 %s324_s29, 4  ;;  %s17403_s14 = int_to_ptr.vmem [resolvable:$true] %s11077_s14 }
 0x5be   : > { %s13724_s22 = scalar_lea.vmem %s17403_s14, 16  ;;  %p13731_p0 = scmp.lt.s32.totalorder %s17403_s14, %s13729_s23 }
 0x5bf   : > { %p13725_p11 = scmp.ne.s32.totalorder %s17403_s14, %s13724_s22  ;;  %p13732_p1 = scmp.lt.s32.totalorder %s13730_s24, %s13724_s22 }
 0x5c1   : > { %p13726_p12 = pnand %p13725_p11, %p13890_p5  ;;  %p13733_p2 = por %p13732_p1, %p13731_p0 }
 0x5c3   : > { %p13727_p13 = pneg %p13726_p12 }
 0x5c5   : > { %p13734_p3 = pnand %p13733_p2, %p13727_p13 }
 0x627   : > { %v8526_v0 = vpop.permute.xlu1 %8525 }
 0x629   : > { %v15296_v9 = vpop.permute.xlu0 %13711 }
 0x62a   : > { %v13714_v11 = vunpack.i.h.bf16 %v15296_v9  ;;  %v13713_v12 = vunpack.i.l.bf16 %v15296_v9  ;;  %v11469_v9 = vld [vmem:[%s17450_s7 + $0x530] sm:$0xff] }
 0x62b   : > { %v8536_v32 = vpop.permute.xlu1 %8535 }
 0x62c   : > { %v8537_v20 = vsel %vm1313_vm5, %v8526_v0, %v13713_v12  ;;  %v8538_v21 = vsel %vm1313_vm5, %v13713_v12, %v13714_v11  ;;  %v15316_v23 = vmax.f32 %v8518_v8, %v8536_v32  ;;  %v11461_v8 = vld [vmem:[%s17450_s7 + $0x4f0] sm:$0xff] }
 0x62d   : > { %v15318_v24 = vmax.f32 %v8513_v3, %v8537_v20  ;;  %v15320_v25 = vmax.f32 %v8514_v6, %v8538_v21  ;;  %v15322_v26 = vpop.permute.xlu0 %13716  ;;  %v11459_v3 = vld [vmem:[%s17450_s7 + $0x4e0] sm:$0xff]  ;;  %v11460_v6 = vld [vmem:[%s17450_s7 + $0x4e8] sm:$0xff]  ;;  %v8597_v12 = vld [vmem:[%s17450_s7 + $0x150] sm:$0xff]  ;;  %v12870_v33 = vpack.c.bf16 %v11462_v10, %v11461_v8 }
 0x62e   : > { %v13719_v30 = vunpack.i.h.bf16 %v15322_v26  ;;  %v13718_v31 = vunpack.i.l.bf16 %v15322_v26  ;;  %11388 = vmatprep.mubr.msk.f32.mxu0 %vm8641_vm0, %v15316_v23  ;;  %v8956_v47 = vrot.slane %v15316_v23, 1  ;;  %v12749_v19 = vpack.c.bf16 %v8598_v14, %v8597_v12  ;;  %v11463_v20 = vld [vmem:[%s17450_s7 + $0x500] sm:$0xff]  ;;  %v11464_v21 = vld [vmem:[%s17450_s7 + $0x508] sm:$0xff]  ;;  %v11473_v8 = vld [vmem:[%s17450_s7 + $0x550] sm:$0xff] }
 0x62f   : > { %8712 = vmatprep.mubr.f32.mxu1 %v15320_v25  ;;  %v12873_v35 = vpack.c.bf16 %v11464_v21, %v11463_v20  ;;  %v8952_v61 = vrot.slane %v15320_v25, 1  ;;  %v11474_v10 = vld [vmem:[%s17450_s7 + $0x558] sm:$0x7]  ;;  %v11395_v12 = vld [vmem:[%s17450_s7 + $0x2e0] sm:$0xff]  ;;  %v11396_v14 = vld [vmem:[%s17450_s7 + $0x2e8] sm:$0xff] }
 0x630   : > { %v8540_v39 = vsel %vm1313_vm5, %v13718_v31, %v13719_v30  ;;  %v8541_v40 = vsel %vm1313_vm5, %v13719_v30, %v8536_v32  ;;  %8713 = vmatmul.mubr.f32.vlgmr.msra.gmra.mrb[42].mxu1 %v15318_v24  ;;  %v8616_v32 = vld [vmem:[%s17450_s7 + $0x1e8] sm:$0xff]  ;;  %v8617_v30 = vld [vmem:[%s17450_s7 + $0x1f0] sm:$0xff]  ;;  %v11541_v20 = vld [vmem:[%s17450_s7 + $0x760] sm:$0xff] }
 0x631   : > { %v15352_v42 = vmax.f32 %v8516_v17, %v8540_v39  ;;  %v15354_v43 = vmax.f32 %v8517_v5, %v8541_v40  ;;  %12730 = vmatpush3.bf16.msra.mxu1 %v12729_v27  ;;  %v8614_v17 = vld [vmem:[%s17450_s7 + $0x1d8] sm:$0xff]  ;;  %v12867_v5 = vpack.c.bf16 %v11460_v6, %v11459_v3  ;;  %v12751_v27 = vpack.c.bf16 %v8616_v32, %v8615_v18  ;;  %v8601_v40 = vld [vmem:[%s17450_s7 + $0x170] sm:$0xff]  ;;  %v11471_v3 = vld [vmem:[%s17450_s7 + $0x540] sm:$0xff] }
 0x632   : > { %12732 = vmatprep.subr.bf16.mxu1 %v12731_v34  ;;  %v12747_v0 = vpack.c.bf16 %v8614_v17, %v8613_v16  ;;  %v8618_v34 = vld [vmem:[%s17450_s7 + $0x1f8] sm:$0xff]  ;;  %v11472_v6 = vld [vmem:[%s17450_s7 + $0x548] sm:$0xff]  ;;  %v11411_v16 = vld [vmem:[%s17450_s7 + $0x360] sm:$0xff] }
 0x633   : > { %8782 = vmatprep.mubr.f32.mxu1 %v15352_v42  ;;  %8853 = vmatmul.mubr.f32.vlgmr.msra.gmra.mrb[12].mxu0 %v15354_v43  ;;  %v12755_v39 = vpack.c.bf16 %v8618_v34, %v8617_v30  ;;  %v11412_v17 = vld [vmem:[%s17450_s7 + $0x368] sm:$0xff]  ;;  %v11413_v18 = vld [vmem:[%s17450_s7 + $0x370] sm:$0xff]  ;;  %v11414_v32 = vld [vmem:[%s17450_s7 + $0x378] sm:$0xff] }
 0x634   : > { %12859 = vmatpush1.bf16.msra.mxu0 %v12858_v41  ;;  %11476 = vmatprep.mubr.msk.f32.mxu0 %vm8641_vm0, %v8956_v47  ;;  %v8602_v41 = vld [vmem:[%s17450_s7 + $0x178] sm:$0xff]  ;;  %v11542_v21 = vld [vmem:[%s17450_s7 + $0x768] sm:$0xff]  ;;  %v11415_v30 = vld [vmem:[%s17450_s7 + $0x380] sm:$0xff] }
 0x635   : > { %12734 = vmatpush3.bf16.msra.mxu1 %v12733_v44  ;;  %12860 = vmatprep.subr.bf16.mxu0 %v13799_v22  ;;  %v11405_v44 = vld [vmem:[%s17450_s7 + $0x330] sm:$0xff]  ;;  %v12757_v47 = vpack.c.bf16 %v8602_v41, %v8601_v40  ;;  %v11416_v34 = vld [vmem:[%s17450_s7 + $0x388] sm:$0xff]  ;;  %v9270_v40 = vrot.slane %v15316_v23, 2 }
 0x636   : > { %12736 = vmatprep.subr.bf16.mxu1 %v12735_v48  ;;  %v11467_v48 = vld [vmem:[%s17450_s7 + $0x520] sm:$0xff]  ;;  %v12793_v50 = vpack.c.bf16 %v11406_v45, %v11405_v44  ;;  %v12813_v41 = vpack.c.bf16 %v11416_v34, %v11415_v30  ;;  %v11400_v45 = vld [vmem:[%s17450_s7 + $0x308] sm:$0xff]  ;;  %v11425_v30 = vld [vmem:[%s17450_s7 + $0x3d0] sm:$0xff] }
 0x637   : > { %v12879_v56 = vpack.c.bf16 %v11468_v49, %v11467_v48  ;;  %v11399_v44 = vld [vmem:[%s17450_s7 + $0x300] sm:$0xff]  ;;  %v11426_v34 = vld [vmem:[%s17450_s7 + $0x3d8] sm:$0xff] }
 0x638   : > { %12862 = vmatpush1.bf16.msra.mxu0 %v12861_v53  ;;  %v8539_v53 = vsel %vm1313_vm5, %v13714_v11, %v13718_v31  ;;  %v11470_v11 = vld [vmem:[%s17450_s7 + $0x538] sm:$0xff]  ;;  %v12815_v49 = vpack.c.bf16 %v11400_v45, %v11399_v44  ;;  %v11427_v44 = vld [vmem:[%s17450_s7 + $0x3e0] sm:$0xff]  ;;  %v11428_v45 = vld [vmem:[%s17450_s7 + $0x3e8] sm:$0xff] }
 0x639   : > { %12738 = vmatpush3.bf16.msra.mxu1 %v12737_v54  ;;  %12863 = vmatprep.subr.bf16.mxu0 %v13799_v22  ;;  %v11407_v54 = vld [vmem:[%s17450_s7 + $0x340] sm:$0xff]  ;;  %v15505_v26 = vmax.f32 %v15277_v2, %v8539_v53  ;;  %v11410_v2 = vld [vmem:[%s17450_s7 + $0x358] sm:$0xff]  ;;  %v11401_v53 = vld [vmem:[%s17450_s7 + $0x310] sm:$0xff] }
 0x63a   : > { %12740 = vmatprep.subr.bf16.mxu1 %v12739_v58  ;;  %v12795_v58 = vpack.c.bf16 %v11390_v52, %v11389_v51  ;;  %v12797_v31 = vpack.c.bf16 %v11408_v55, %v11407_v54  ;;  %v11546_v51 = vld [vmem:[%s17450_s7 + $0x788] sm:$0xff]  ;;  %v11402_v54 = vld [vmem:[%s17450_s7 + $0x318] sm:$0xff]  ;;  %v11419_v55 = vld [vmem:[%s17450_s7 + $0x3a0] sm:$0xff] }
 0x63c   : > { %12865 = vmatpush1.bf16.msra.mxu0 %v12864_v63  ;;  %v12882_v63 = vpack.c.bf16 %v11470_v11, %v11469_v9  ;;  %v12819_v9 = vpack.c.bf16 %v11402_v54, %v11401_v53  ;;  %v11547_v11 = vld [vmem:[%s17450_s7 + $0x790] sm:$0xff]  ;;  %v11430_v54 = vld [vmem:[%s17450_s7 + $0x3f8] sm:$0xff] }
 0x63d   : > { %12742 = vmatpush3.bf16.msra.mxu1 %v12741_v1  ;;  %12866 = vmatprep.subr.bf16.mxu0 %v13799_v22  ;;  %v12799_v1 = vpack.c.bf16 %v11392_v60, %v11391_v59  ;;  %v11403_v60 = vld [vmem:[%s17450_s7 + $0x320] sm:$0xff]  ;;  %v11429_v53 = vld [vmem:[%s17450_s7 + $0x3f0] sm:$0xff] }
 0x63e   : > { %12744 = vmatprep.subr.bf16.mxu1 %v12743_v7  ;;  %v12801_v7 = vpack.c.bf16 %v11410_v2, %v11409_v62  ;;  %v11437_v62 = vld [vmem:[%s17450_s7 + $0x430] sm:$0xff]  ;;  %v11438_v2 = vld [vmem:[%s17450_s7 + $0x438] sm:$0xff] }
 0x640   : > { %12868 = vmatpush1.bf16.msra.mxu0 %v12867_v5  ;;  %v12885_v5 = vpack.c.bf16 %v11472_v6, %v11471_v3  ;;  %v11549_v3 = vld [vmem:[%s17450_s7 + $0x7a0] sm:$0xff]  ;;  %v11550_v6 = vld [vmem:[%s17450_s7 + $0x7a8] sm:$0xff] }
 0x641   : > { %12746 = vmatpush3.bf16.msra.mxu1 %v12745_v4  ;;  %12869 = vmatprep.subr.bf16.mxu0 %v13799_v22  ;;  %v12803_v4 = vpack.c.bf16 %v11394_v15, %v11393_v13  ;;  %v11421_v13 = vld [vmem:[%s17450_s7 + $0x3b0] sm:$0xff]  ;;  %v11422_v15 = vld [vmem:[%s17450_s7 + $0x3b8] sm:$0xff] }
 0x642   : > { %12748 = vmatprep.subr.bf16.mxu1 %v12747_v0  ;;  %v12805_v0 = vpack.c.bf16 %v11412_v17, %v11411_v16  ;;  %v11439_v16 = vld [vmem:[%s17450_s7 + $0x440] sm:$0xff]  ;;  %v11440_v17 = vld [vmem:[%s17450_s7 + $0x448] sm:$0xff] }
 0x644   : > { %12871 = vmatpush1.bf16.msra.mxu0 %v12870_v33  ;;  %v12888_v33 = vpack.c.bf16 %v11474_v10, %v11473_v8  ;;  %v11551_v8 = vld [vmem:[%s17450_s7 + $0x7b0] sm:$0xff]  ;;  %v11552_v10 = vld [vmem:[%s17450_s7 + $0x7b8] sm:$0xff] }
 0x645   : > { %12750 = vmatpush3.bf16.msra.mxu1 %v12749_v19  ;;  %12872 = vmatprep.subr.bf16.mxu0 %v13799_v22  ;;  %v12807_v19 = vpack.c.bf16 %v11396_v14, %v11395_v12  ;;  %v12829_v12 = vpack.c.bf16 %v11440_v17, %v11439_v16  ;;  %v11423_v14 = vld [vmem:[%s17450_s7 + $0x3c0] sm:$0xff]  ;;  %v11452_v17 = vld [vmem:[%s17450_s7 + $0x4a8] sm:$0xff] }
 0x646   : > { %12752 = vmatprep.subr.bf16.mxu1 %v12751_v27  ;;  %v12809_v27 = vpack.c.bf16 %v11414_v32, %v11413_v18  ;;  %v11424_v18 = vld [vmem:[%s17450_s7 + $0x3c8] sm:$0xff]  ;;  %v8954_v32 = vrot.slane %v15352_v42, 1  ;;  %v11451_v16 = vld [vmem:[%s17450_s7 + $0x4a0] sm:$0xff] }
 0x648   : > { %12874 = vmatpush1.bf16.msra.mxu0 %v12873_v35  ;;  %v12956_v35 = vpack.c.bf16 %v11542_v21, %v11541_v20  ;;  %v12971_v20 = vpack.c.bf16 %v11552_v10, %v11551_v8  ;;  %v12831_v21 = vpack.c.bf16 %v11424_v18, %v11423_v14  ;;  %v11629_v8 = vld [vmem:[%s17450_s7 + $0xa10] sm:$0xff]  ;;  %v11630_v10 = vld [vmem:[%s17450_s7 + $0xa18] sm:$0xff]  ;;  %v11436_v14 = vld [vmem:[%s17450_s7 + $0x428] sm:$0xff] }
 0x649   : > { %12754 = vmatpush3.bf16.msra.mxu1 %v12753_v36  ;;  %12875 = vmatprep.subr.bf16.mxu0 %v13799_v22  ;;  %v8955_v36 = vrot.slane %v15354_v43, 1  ;;  %v11493_v18 = vld [vmem:[%s17450_s7 + $0x5e0] sm:$0xff] }
 0x64a   : > { %12756 = vmatprep.subr.bf16.mxu1 %v12755_v39  ;;  %v11544_v39 = vld [vmem:[%s17450_s7 + $0x778] sm:$0xff] }
 0x64b   : > { %v12959_v48 = vpack.c.bf16 %v11544_v39, %v11543_v38  ;;  %v12835_v38 = vpack.c.bf16 %v11426_v34, %v11425_v30  ;;  %v11555_v39 = vld [vmem:[%s17450_s7 + $0x7d0] sm:$0xff]  ;;  %v11477_v30 = vld [vmem:[%s17450_s7 + $0x560] sm:$0xff]  ;;  %v11478_v34 = vld [vmem:[%s17450_s7 + $0x568] sm:$0xff] }
 0x64c   : > { %12877 = vmatpush1.bf16.msra.mxu0 %v12876_v46  ;;  %v11417_v46 = vld [vmem:[%s17450_s7 + $0x390] sm:$0xff] }
 0x64d   : > { %12758 = vmatpush3.bf16.msra.mxu1 %v12757_v47  ;;  %12878 = vmatprep.subr.bf16.mxu0 %v13799_v22  ;;  %v11418_v47 = vld [vmem:[%s17450_s7 + $0x398] sm:$0xff] }
 0x64e   : > { %12794 = vmatprep.subr.bf16.mxu1 %v12793_v50  ;;  %v11545_v50 = vld [vmem:[%s17450_s7 + $0x780] sm:$0xff]  ;;  %v12817_v52 = vpack.c.bf16 %v11418_v47, %v11417_v46  ;;  %v11445_v46 = vld [vmem:[%s17450_s7 + $0x470] sm:$0xff]  ;;  %v11446_v47 = vld [vmem:[%s17450_s7 + $0x478] sm:$0xff] }
 0x650   : > { %8783 = vmatmul.mubr.f32.vlgmr.msra.gmra.mrb[44].mxu1 %v15505_v26  ;;  %12880 = vmatpush1.bf16.msra.mxu0 %v12879_v56  ;;  %v11420_v56 = vld [vmem:[%s17450_s7 + $0x3a8] sm:$0xff] }
 0x651   : > { %12796 = vmatpush3.bf16.msra.mxu1 %v12795_v58  ;;  %9031 = vmatprep.mubr.f32.mxu1 %v8952_v61  ;;  %v12962_v58 = vpack.c.bf16 %v11546_v51, %v11545_v50  ;;  %v12821_v59 = vpack.c.bf16 %v11420_v56, %v11419_v55  ;;  %v11404_v61 = vld [vmem:[%s17450_s7 + $0x328] sm:$0xff]  ;;  %v11557_v50 = vld [vmem:[%s17450_s7 + $0x7e0] sm:$0xff] }
 0x652   : > { %12881 = vmatprep.subr.bf16.mxu0 %v13799_v22  ;;  %12798 = vmatprep.subr.bf16.mxu1 %v12797_v31  ;;  %v11548_v31 = vld [vmem:[%s17450_s7 + $0x798] sm:$0xff]  ;;  %v11558_v51 = vld [vmem:[%s17450_s7 + $0x7e8] sm:$0xff]  ;;  %v11447_v55 = vld [vmem:[%s17450_s7 + $0x480] sm:$0xff] }
 0x653   : > { %v11448_v56 = vld [vmem:[%s17450_s7 + $0x488] sm:$0xff] }
 0x654   : > { %12883 = vmatpush1.bf16.msra.mxu0 %v12882_v63  ;;  %v12965_v63 = vpack.c.bf16 %v11548_v31, %v11547_v11  ;;  %v11559_v11 = vld [vmem:[%s17450_s7 + $0x7f0] sm:$0xff]  ;;  %v11560_v31 = vld [vmem:[%s17450_s7 + $0x7f8] sm:$0xff] }
 0x655   : > { %12800 = vmatpush3.bf16.msra.mxu1 %v12799_v1  ;;  %12884 = vmatprep.subr.bf16.mxu0 %v13799_v22  ;;  %v12823_v1 = vpack.c.bf16 %v11404_v61, %v11403_v60  ;;  %v11431_v60 = vld [vmem:[%s17450_s7 + $0x400] sm:$0xff]  ;;  %v11432_v61 = vld [vmem:[%s17450_s7 + $0x408] sm:$0xff] }
 0x656   : > { %12802 = vmatprep.subr.bf16.mxu1 %v12801_v7  ;;  %v12825_v7 = vpack.c.bf16 %v11438_v2, %v11437_v62  ;;  %v11449_v62 = vld [vmem:[%s17450_s7 + $0x490] sm:$0xff]  ;;  %v11450_v2 = vld [vmem:[%s17450_s7 + $0x498] sm:$0xff] }
 0x658   : > { %12886 = vmatpush1.bf16.msra.mxu0 %v12885_v5  ;;  %v12968_v5 = vpack.c.bf16 %v11550_v6, %v11549_v3  ;;  %v11561_v3 = vld [vmem:[%s17450_s7 + $0x800] sm:$0xff]  ;;  %v11562_v6 = vld [vmem:[%s17450_s7 + $0x808] sm:$0x7] }
 0x659   : > { %12804 = vmatpush3.bf16.msra.mxu1 %v12803_v4  ;;  %12887 = vmatprep.subr.bf16.mxu0 %v13799_v22  ;;  %v12827_v4 = vpack.c.bf16 %v11422_v15, %v11421_v13  ;;  %v11433_v13 = vld [vmem:[%s17450_s7 + $0x410] sm:$0xff]  ;;  %v11434_v15 = vld [vmem:[%s17450_s7 + $0x418] sm:$0xff] }
 0x65a   : > { %12806 = vmatprep.subr.bf16.mxu1 %v12805_v0  ;;  %v8951_v0 = vrot.slane %v15318_v24, 1 }
 0x65c   : > { %12890 = vmatpush1.bf16.msk.msra.mxu0 %vm15265_vm15, %v12888_v33  ;;  %v11441_v33 = vld [vmem:[%s17450_s7 + $0x450] sm:$0xff] }
 0x65d   : > { %12808 = vmatpush3.bf16.msra.mxu1 %v12807_v19  ;;  %12955 = vmatprep.subr.bf16.mxu0 %v13799_v22  ;;  %v11442_v19 = vld [vmem:[%s17450_s7 + $0x458] sm:$0xff] }
 0x65e   : > { %12810 = vmatprep.subr.bf16.mxu1 %v12809_v27  ;;  %v11553_v27 = vld [vmem:[%s17450_s7 + $0x7c0] sm:$0xff]  ;;  %v12833_v29 = vpack.c.bf16 %v11442_v19, %v11441_v33  ;;  %v13054_v33 = vpack.c.bf16 %v11630_v10, %v11629_v8  ;;  %v9269_v19 = vrot.slane %v15354_v43, 2 }
 0x65f   : > { %9172 = vmatmul.mubr.f32.vlgmr.msra.gmra.mrb[12].mxu0 %v8955_v36  ;;  %v11444_v36 = vld [vmem:[%s17450_s7 + $0x468] sm:$0xff] }
 0x660   : > { %12957 = vmatpush1.bf16.msra.mxu0 %v12956_v35  ;;  %11564 = vmatprep.mubr.msk.f32.mxu0 %vm8641_vm0, %v9270_v40  ;;  %v11443_v35 = vld [vmem:[%s17450_s7 + $0x460] sm:$0xff]  ;;  %v11556_v40 = vld [vmem:[%s17450_s7 + $0x7d8] sm:$0xff] }
 0x661   : > { %12812 = vmatpush3.bf16.msra.mxu1 %v12811_v37  ;;  %12958 = vmatprep.subr.bf16.mxu0 %v13799_v22  ;;  %v12974_v37 = vpack.c.bf16 %v11554_v28, %v11553_v27  ;;  %v11632_v27 = vld [vmem:[%s17450_s7 + $0xa28] sm:$0xff]  ;;  %v9584_v28 = vrot.slane %v15316_v23, 3 }
 0x662   : > { %12814 = vmatprep.subr.bf16.mxu1 %v12813_v41  ;;  %v12837_v41 = vpack.c.bf16 %v11444_v36, %v11443_v35  ;;  %v11495_v35 = vld [vmem:[%s17450_s7 + $0x5f0] sm:$0xff]  ;;  %v11496_v36 = vld [vmem:[%s17450_s7 + $0x5f8] sm:$0xff] }
 0x664   : > { %12960 = vmatpush1.bf16.msra.mxu0 %v12959_v48  ;;  %v12977_v48 = vpack.c.bf16 %v11556_v40, %v11555_v39  ;;  %v11633_v39 = vld [vmem:[%s17450_s7 + $0xa30] sm:$0xff]  ;;  %v11634_v40 = vld [vmem:[%s17450_s7 + $0xa38] sm:$0xff] }
 0x665   : > { %12816 = vmatpush3.bf16.msra.mxu1 %v12815_v49  ;;  %12961 = vmatprep.subr.bf16.mxu0 %v13799_v22  ;;  %v12839_v49 = vpack.c.bf16 %v11428_v45, %v11427_v44  ;;  %v12895_v44 = vpack.c.bf16 %v11496_v36, %v11495_v35  ;;  %v11479_v45 = vld [vmem:[%s17450_s7 + $0x570] sm:$0xff]  ;;  %v11508_v36 = vld [vmem:[%s17450_s7 + $0x658] sm:$0xff] }
 0x666   : > { %12818 = vmatprep.subr.bf16.mxu1 %v12817_v52  ;;  %v12841_v52 = vpack.c.bf16 %v11446_v47, %v11445_v46  ;;  %v11480_v46 = vld [vmem:[%s17450_s7 + $0x578] sm:$0xff]  ;;  %v9266_v47 = vrot.slane %v15320_v25, 2  ;;  %v11507_v35 = vld [vmem:[%s17450_s7 + $0x650] sm:$0xff] }
 0x668   : > { %12963 = vmatpush1.bf16.msra.mxu0 %v12962_v58  ;;  %v12980_v58 = vpack.c.bf16 %v11558_v51, %v11557_v50  ;;  %v13060_v50 = vpack.c.bf16 %v11634_v40, %v11633_v39  ;;  %v12897_v51 = vpack.c.bf16 %v11480_v46, %v11479_v45  ;;  %v11645_v39 = vld [vmem:[%s17450_s7 + $0xa90] sm:$0xff]  ;;  %v11646_v40 = vld [vmem:[%s17450_s7 + $0xa98] sm:$0xff]  ;;  %v11525_v46 = vld [vmem:[%s17450_s7 + $0x6e0] sm:$0xff] }
 0x669   : > { %12820 = vmatpush3.bf16.msra.mxu1 %v12819_v9  ;;  %12964 = vmatprep.subr.bf16.mxu0 %v13799_v22  ;;  %v12843_v9 = vpack.c.bf16 %v11430_v54, %v11429_v53  ;;  %v11636_v53 = vld [vmem:[%s17450_s7 + $0xa48] sm:$0xff]  ;;  %v11492_v45 = vld [vmem:[%s17450_s7 + $0x5d8] sm:$0xff] }
 0x66a   : > { %12822 = vmatprep.subr.bf16.mxu1 %v12821_v59  ;;  %v12845_v59 = vpack.c.bf16 %v11448_v56, %v11447_v55  ;;  %v11481_v55 = vld [vmem:[%s17450_s7 + $0x580] sm:$0xff]  ;;  %v11482_v56 = vld [vmem:[%s17450_s7 + $0x588] sm:$0xff] }
 0x66c   : > { %12966 = vmatpush1.bf16.msra.mxu0 %v12965_v63  ;;  %v12983_v63 = vpack.c.bf16 %v11560_v31, %v11559_v11  ;;  %v12901_v31 = vpack.c.bf16 %v11482_v56, %v11481_v55  ;;  %v11527_v55 = vld [vmem:[%s17450_s7 + $0x6f0] sm:$0xff]  ;;  %v11528_v56 = vld [vmem:[%s17450_s7 + $0x6f8] sm:$0xff] }
 0x66d   : > { %12824 = vmatpush3.bf16.msra.mxu1 %v12823_v1  ;;  %12967 = vmatprep.subr.bf16.mxu0 %v13799_v22  ;;  %v12847_v1 = vpack.c.bf16 %v11432_v61, %v11431_v60  ;;  %v11638_v60 = vld [vmem:[%s17450_s7 + $0xa58] sm:$0xff] }
 0x66e   : > { %12826 = vmatprep.subr.bf16.mxu1 %v12825_v7  ;;  %v12849_v7 = vpack.c.bf16 %v11450_v2, %v11449_v62  ;;  %v11483_v62 = vld [vmem:[%s17450_s7 + $0x590] sm:$0xff]  ;;  %v11484_v2 = vld [vmem:[%s17450_s7 + $0x598] sm:$0xff] }
 0x670   : > { %9032 = vmatmul.mubr.f32.vlgmr.msra.gmra.mrb[46].mxu1 %v8951_v0  ;;  %12969 = vmatpush1.bf16.msra.mxu0 %v12968_v5  ;;  %v12986_v5 = vpack.c.bf16 %v11562_v6, %v11561_v3  ;;  %v12853_v0 = vpack.c.bf16 %v11452_v17, %v11451_v16  ;;  %v12905_v6 = vpack.c.bf16 %v11484_v2, %v11483_v62  ;;  %v11485_v16 = vld [vmem:[%s17450_s7 + $0x5a0] sm:$0xff]  ;;  %v11486_v17 = vld [vmem:[%s17450_s7 + $0x5a8] sm:$0xff]  ;;  %v11512_v62 = vld [vmem:[%s17450_s7 + $0x678] sm:$0xff] }
 0x671   : > { %12828 = vmatpush3.bf16.msra.mxu1 %v12827_v4  ;;  %9101 = vmatprep.mubr.f32.mxu1 %v8954_v32  ;;  %v12851_v4 = vpack.c.bf16 %v11434_v15, %v11433_v13  ;;  %v11494_v32 = vld [vmem:[%s17450_s7 + $0x5e8] sm:$0xff]  ;;  %v12909_v10 = vpack.c.bf16 %v11486_v17, %v11485_v16  ;;  %v11701_v2 = vld [vmem:[%s17450_s7 + $0xc40] sm:$0xff] }
 0x672   : > { %12970 = vmatprep.subr.bf16.mxu0 %v13799_v22  ;;  %12830 = vmatprep.subr.bf16.mxu1 %v12829_v12  ;;  %v11435_v12 = vld [vmem:[%s17450_s7 + $0x420] sm:$0xff]  ;;  %v11640_v13 = vld [vmem:[%s17450_s7 + $0xa68] sm:$0xff] }
 0x673   : > { %v11685_v16 = vld [vmem:[%s17450_s7 + $0xbc0] sm:$0xff]  ;;  %v11686_v17 = vld [vmem:[%s17450_s7 + $0xbc8] sm:$0xff] }
 0x674   : > { %12972 = vmatpush1.bf16.msra.mxu0 %v12971_v20  ;;  %v12855_v20 = vpack.c.bf16 %v11436_v14, %v11435_v12  ;;  %v11642_v12 = vld [vmem:[%s17450_s7 + $0xa78] sm:$0xff] }
 0x675   : > { %12832 = vmatpush3.bf16.msra.mxu1 %v12831_v21  ;;  %12973 = vmatprep.subr.bf16.mxu0 %v13799_v22  ;;  %v11631_v21 = vld [vmem:[%s17450_s7 + $0xa20] sm:$0xff] }
 0x676   : > { %12834 = vmatprep.subr.bf16.mxu1 %v12833_v29  ;;  %v12891_v29 = vpack.c.bf16 %v11494_v32, %v11493_v18  ;;  %v11487_v18 = vld [vmem:[%s17450_s7 + $0x5b0] sm:$0xff]  ;;  %v11488_v32 = vld [vmem:[%s17450_s7 + $0x5b8] sm:$0xff] }
 0x678   : > { %12975 = vmatpush1.bf16.msra.mxu0 %v12974_v37  ;;  %v13057_v37 = vpack.c.bf16 %v11632_v27, %v11631_v21  ;;  %v12913_v21 = vpack.c.bf16 %v11488_v32, %v11487_v18  ;;  %v11643_v27 = vld [vmem:[%s17450_s7 + $0xa80] sm:$0xff]  ;;  %v13121_v18 = vpack.c.bf16 %v11686_v17, %v11685_v16  ;;  %v9583_v32 = vrot.slane %v15354_v43, 3  ;;  %v11712_v16 = vld [vmem:[%s17450_s7 + $0xc98] sm:$0xff]  ;;  %v11539_v17 = vld [vmem:[%s17450_s7 + $0x750] sm:$0xff] }
 0x679   : > { %12836 = vmatpush3.bf16.msra.mxu1 %v12835_v38  ;;  %12976 = vmatprep.subr.bf16.mxu0 %v13799_v22  ;;  %v12893_v38 = vpack.c.bf16 %v11478_v34, %v11477_v30  ;;  %v11489_v30 = vld [vmem:[%s17450_s7 + $0x5c0] sm:$0xff]  ;;  %v11490_v34 = vld [vmem:[%s17450_s7 + $0x5c8] sm:$0xff] }
 0x67a   : > { %12838 = vmatprep.subr.bf16.mxu1 %v12837_v41  ;;  %v8953_v41 = vrot.slane %v15505_v26, 1 }
 0x67c   : > { %12978 = vmatpush1.bf16.msra.mxu0 %v12977_v48  ;;  %v11497_v48 = vld [vmem:[%s17450_s7 + $0x600] sm:$0xff] }
 0x67d   : > { %12840 = vmatpush3.bf16.msra.mxu1 %v12839_v49  ;;  %12979 = vmatprep.subr.bf16.mxu0 %v13799_v22  ;;  %v11498_v49 = vld [vmem:[%s17450_s7 + $0x608] sm:$0xff] }
 0x67e   : > { %12842 = vmatprep.subr.bf16.mxu1 %v12841_v52  ;;  %v11635_v52 = vld [vmem:[%s17450_s7 + $0xa40] sm:$0xff]  ;;  %v12899_v54 = vpack.c.bf16 %v11498_v49, %v11497_v48  ;;  %v13078_v48 = vpack.c.bf16 %v11646_v40, %v11645_v39 }
 0x67f   : > { %v13063_v11 = vpack.c.bf16 %v11636_v53, %v11635_v52  ;;  %v11509_v53 = vld [vmem:[%s17450_s7 + $0x660] sm:$0xff] }
 0x680   : > { %12981 = vmatpush1.bf16.msra.mxu0 %v12980_v58  ;;  %v11499_v58 = vld [vmem:[%s17450_s7 + $0x610] sm:$0xff] }
 0x681   : > { %12844 = vmatpush3.bf16.msra.mxu1 %v12843_v9  ;;  %12982 = vmatprep.subr.bf16.mxu0 %v13799_v22  ;;  %v11500_v9 = vld [vmem:[%s17450_s7 + $0x618] sm:$0xff] }
 0x682   : > { %12846 = vmatprep.subr.bf16.mxu1 %v12845_v59  ;;  %v11637_v59 = vld [vmem:[%s17450_s7 + $0xa50] sm:$0xff]  ;;  %v12903_v61 = vpack.c.bf16 %v11500_v9, %v11499_v58 }
 0x683   : > { %v13066_v3 = vpack.c.bf16 %v11638_v60, %v11637_v59  ;;  %v11511_v59 = vld [vmem:[%s17450_s7 + $0x670] sm:$0xff]  ;;  %v9265_v60 = vrot.slane %v15318_v24, 2 }
 0x684   : > { %12984 = vmatpush1.bf16.msra.mxu0 %v12983_v63  ;;  %v11501_v63 = vld [vmem:[%s17450_s7 + $0x620] sm:$0xff] }
 0x685   : > { %12848 = vmatpush3.bf16.msra.mxu1 %v12847_v1  ;;  %12985 = vmatprep.subr.bf16.mxu0 %v13799_v22  ;;  %v11502_v1 = vld [vmem:[%s17450_s7 + $0x628] sm:$0xff] }
 0x686   : > { %12850 = vmatprep.subr.bf16.mxu1 %v12849_v7  ;;  %v11639_v7 = vld [vmem:[%s17450_s7 + $0xa60] sm:$0xff]  ;;  %v12907_v15 = vpack.c.bf16 %v11502_v1, %v11501_v63  ;;  %v11702_v63 = vld [vmem:[%s17450_s7 + $0xc48] sm:$0xff]  ;;  %v9268_v1 = vrot.slane %v15352_v42, 2 }
 0x687   : > { %v13069_v8 = vpack.c.bf16 %v11640_v13, %v11639_v7  ;;  %v12929_v13 = vpack.c.bf16 %v11512_v62, %v11511_v59  ;;  %v11710_v59 = vld [vmem:[%s17450_s7 + $0xc88] sm:$0xff] }
 0x688   : > { %12988 = vmatpush1.bf16.msk.msra.mxu0 %vm15265_vm15, %v12986_v5  ;;  %v11503_v5 = vld [vmem:[%s17450_s7 + $0x630] sm:$0xff] }
 0x689   : > { %12852 = vmatpush3.bf16.msra.mxu1 %v12851_v4  ;;  %13053 = vmatprep.subr.bf16.mxu0 %v13799_v22  ;;  %v11504_v4 = vld [vmem:[%s17450_s7 + $0x638] sm:$0xff] }
 0x68a   : > { %12854 = vmatprep.subr.bf16.mxu1 %v12853_v0  ;;  %v11641_v0 = vld [vmem:[%s17450_s7 + $0xa70] sm:$0xff]  ;;  %v12911_v14 = vpack.c.bf16 %v11504_v4, %v11503_v5  ;;  %v11513_v5 = vld [vmem:[%s17450_s7 + $0x680] sm:$0xff] }
 0x68b   : > { %9486 = vmatmul.mubr.f32.vlgmr.msra.gmra.mrb[12].mxu0 %v9269_v19  ;;  %v11506_v19 = vld [vmem:[%s17450_s7 + $0x648] sm:$0xff] }
 0x68c   : > { %13055 = vmatpush1.bf16.msra.mxu0 %v13054_v33  ;;  %11652 = vmatprep.mubr.msk.f32.mxu0 %vm8641_vm0, %v9584_v28  ;;  %v11505_v33 = vld [vmem:[%s17450_s7 + $0x640] sm:$0xff]  ;;  %v11644_v28 = vld [vmem:[%s17450_s7 + $0xa88] sm:$0xff] }
 0x68d   : > { %12856 = vmatpush3.bf16.msra.mxu1 %v12855_v20  ;;  %13056 = vmatprep.subr.bf16.mxu0 %v13799_v22  ;;  %v13072_v20 = vpack.c.bf16 %v11642_v12, %v11641_v0  ;;  %v11704_v0 = vld [vmem:[%s17450_s7 + $0xc58] sm:$0xff]  ;;  %v11531_v12 = vld [vmem:[%s17450_s7 + $0x710] sm:$0xff] }
 0x68e   : > { %12892 = vmatprep.subr.bf16.mxu1 %v12891_v29  ;;  %v12915_v29 = vpack.c.bf16 %v11506_v19, %v11505_v33 }
 0x690   : > { %9102 = vmatmul.mubr.f32.vlgmr.msra.gmra.mrb[48].mxu1 %v8953_v41  ;;  %13058 = vmatpush1.bf16.msra.mxu0 %v13057_v37  ;;  %v13075_v37 = vpack.c.bf16 %v11644_v28, %v11643_v27  ;;  %v12919_v41 = vpack.c.bf16 %v11508_v36, %v11507_v35  ;;  %v11515_v27 = vld [vmem:[%s17450_s7 + $0x690] sm:$0xff]  ;;  %v9896_v28 = vrot.slane %v15352_v42, 4  ;;  %v11706_v35 = vld [vmem:[%s17450_s7 + $0xc68] sm:$0xff]  ;;  %v11533_v36 = vld [vmem:[%s17450_s7 + $0x720] sm:$0xff] }
 0x691   : > { %12894 = vmatpush3.bf16.msra.mxu1 %v12893_v38  ;;  %9345 = vmatprep.mubr.f32.mxu1 %v9266_v47  ;;  %v12917_v38 = vpack.c.bf16 %v11490_v34, %v11489_v30  ;;  %v11526_v47 = vld [vmem:[%s17450_s7 + $0x6e8] sm:$0xff]  ;;  %v11516_v30 = vld [vmem:[%s17450_s7 + $0x698] sm:$0xff]  ;;  %v11705_v34 = vld [vmem:[%s17450_s7 + $0xc60] sm:$0xff] }
 0x692   : > { %13059 = vmatprep.subr.bf16.mxu0 %v13799_v22  ;;  %12896 = vmatprep.subr.bf16.mxu1 %v12895_v44  ;;  %v11491_v44 = vld [vmem:[%s17450_s7 + $0x5d0] sm:$0xff]  ;;  %v12923_v52 = vpack.c.bf16 %v11526_v47, %v11525_v46  ;;  %v12937_v39 = vpack.c.bf16 %v11516_v30, %v11515_v27  ;;  %v13127_v40 = vpack.c.bf16 %v11706_v35, %v11705_v34  ;;  %v11518_v47 = vld [vmem:[%s17450_s7 + $0x6a8] sm:$0xff]  ;;  %v11697_v30 = vld [vmem:[%s17450_s7 + $0xc20] sm:$0xff] }
 0x693   : > { %v12921_v49 = vpack.c.bf16 %v11492_v45, %v11491_v44  ;;  %v11690_v44 = vld [vmem:[%s17450_s7 + $0xbe8] sm:$0xff]  ;;  %v11517_v45 = vld [vmem:[%s17450_s7 + $0x6a0] sm:$0xff] }
 0x694   : > { %13061 = vmatpush1.bf16.msra.mxu0 %v13060_v50  ;;  %v11647_v50 = vld [vmem:[%s17450_s7 + $0xaa0] sm:$0xff]  ;;  %v11698_v34 = vld [vmem:[%s17450_s7 + $0xc28] sm:$0xff] }
 0x695   : > { %12898 = vmatpush3.bf16.msra.mxu1 %v12897_v51  ;;  %13062 = vmatprep.subr.bf16.mxu0 %v13799_v22  ;;  %v11648_v51 = vld [vmem:[%s17450_s7 + $0xaa8] sm:$0xff] }
 0x696   : > { %12900 = vmatprep.subr.bf16.mxu1 %v12899_v54  ;;  %v11510_v54 = vld [vmem:[%s17450_s7 + $0x668] sm:$0xff]  ;;  %v13081_v58 = vpack.c.bf16 %v11648_v51, %v11647_v50  ;;  %v11535_v50 = vld [vmem:[%s17450_s7 + $0x730] sm:$0xff]  ;;  %v11536_v51 = vld [vmem:[%s17450_s7 + $0x738] sm:$0xff] }
 0x697   : > { %v12925_v9 = vpack.c.bf16 %v11510_v54, %v11509_v53  ;;  %v12941_v53 = vpack.c.bf16 %v11518_v47, %v11517_v45  ;;  %v11700_v47 = vld [vmem:[%s17450_s7 + $0xc38] sm:$0xff] }
 0x698   : > { %13064 = vmatpush1.bf16.msra.mxu0 %v13063_v11  ;;  %v11649_v11 = vld [vmem:[%s17450_s7 + $0xab0] sm:$0xff] }
 0x699   : > { %12902 = vmatpush3.bf16.msra.mxu1 %v12901_v31  ;;  %13065 = vmatprep.subr.bf16.mxu0 %v13799_v22  ;;  %v11650_v31 = vld [vmem:[%s17450_s7 + $0xab8] sm:$0x7] }
 0x69a   : > { %12904 = vmatprep.subr.bf16.mxu1 %v12903_v61  ;;  %v12927_v61 = vpack.c.bf16 %v11528_v56, %v11527_v55  ;;  %v13084_v7 = vpack.c.bf16 %v11650_v31, %v11649_v11  ;;  %v11691_v55 = vld [vmem:[%s17450_s7 + $0xbf0] sm:$0xff]  ;;  %v11692_v56 = vld [vmem:[%s17450_s7 + $0xbf8] sm:$0xff]  ;;  %v11709_v31 = vld [vmem:[%s17450_s7 + $0xc80] sm:$0xff] }
 0x69b   : > { %v11520_v11 = vld [vmem:[%s17450_s7 + $0x6b8] sm:$0xff]  ;;  %v13133_v62 = vpack.c.bf16 %v11692_v56, %v11691_v55 }
 0x69c   : > { %13067 = vmatpush1.bf16.msra.mxu0 %v13066_v3  ;;  %v11529_v3 = vld [vmem:[%s17450_s7 + $0x700] sm:$0xff]  ;;  %v11586_v55 = vld [vmem:[%s17450_s7 + $0x8b8] sm:$0xff] }
 0x69d   : > { %12906 = vmatpush3.bf16.msra.mxu1 %v12905_v6  ;;  %13068 = vmatprep.subr.bf16.mxu0 %v13799_v22  ;;  %v11530_v6 = vld [vmem:[%s17450_s7 + $0x708] sm:$0xff] }
 0x69e   : > { %12908 = vmatprep.subr.bf16.mxu1 %v12907_v15  ;;  %v13119_v15 = vpack.c.bf16 %v11702_v63, %v11701_v2  ;;  %v12931_v4 = vpack.c.bf16 %v11530_v6, %v11529_v3  ;;  %v13135_v63 = vpack.c.bf16 %v11710_v59, %v11709_v31  ;;  %v11694_v3 = vld [vmem:[%s17450_s7 + $0xc08] sm:$0xff]  ;;  %v11521_v6 = vld [vmem:[%s17450_s7 + $0x6c0] sm:$0xff]  ;;  %v11569_v59 = vld [vmem:[%s17450_s7 + $0x830] sm:$0xff] }
 0x6a0   : > { %13070 = vmatpush1.bf16.msra.mxu0 %v13069_v8  ;;  %v11514_v8 = vld [vmem:[%s17450_s7 + $0x688] sm:$0xff] }
 0x6a1   : > { %12910 = vmatpush3.bf16.msra.mxu1 %v12909_v10  ;;  %13071 = vmatprep.subr.bf16.mxu0 %v13799_v22  ;;  %v11703_v10 = vld [vmem:[%s17450_s7 + $0xc50] sm:$0xff]  ;;  %v12933_v33 = vpack.c.bf16 %v11514_v8, %v11513_v5  ;;  %v11540_v5 = vld [vmem:[%s17450_s7 + $0x758] sm:$0xff] }
 0x6a2   : > { %12912 = vmatprep.subr.bf16.mxu1 %v12911_v14  ;;  %v11532_v14 = vld [vmem:[%s17450_s7 + $0x718] sm:$0xff]  ;;  %v13123_v19 = vpack.c.bf16 %v11704_v0, %v11703_v10  ;;  %v11695_v0 = vld [vmem:[%s17450_s7 + $0xc10] sm:$0xff] }
 0x6a4   : > { %13073 = vmatpush1.bf16.msra.mxu0 %v13072_v20  ;;  %v11687_v20 = vld [vmem:[%s17450_s7 + $0xbd0] sm:$0xff] }
 0x6a5   : > { %12914 = vmatpush3.bf16.msra.mxu1 %v12913_v21  ;;  %13074 = vmatprep.subr.bf16.mxu0 %v13799_v22  ;;  %v11688_v21 = vld [vmem:[%s17450_s7 + $0xbd8] sm:$0xff] }
 0x6a6   : > { %12916 = vmatprep.subr.bf16.mxu1 %v12915_v29  ;;  %v12935_v29 = vpack.c.bf16 %v11532_v14, %v11531_v12  ;;  %v11696_v12 = vld [vmem:[%s17450_s7 + $0xc18] sm:$0xff]  ;;  %v11523_v14 = vld [vmem:[%s17450_s7 + $0x6d0] sm:$0xff] }
 0x6a7   : > { %v13141_v27 = vpack.c.bf16 %v11696_v12, %v11695_v0  ;;  %v11722_v0 = vld [vmem:[%s17450_s7 + $0xce8] sm:$0xff] }
 0x6a8   : > { %13076 = vmatpush1.bf16.msra.mxu0 %v13075_v37  ;;  %v11534_v37 = vld [vmem:[%s17450_s7 + $0x728] sm:$0xff] }
 0x6a9   : > { %12918 = vmatpush3.bf16.msra.mxu1 %v12917_v38  ;;  %13077 = vmatprep.subr.bf16.mxu0 %v13799_v22  ;;  %v13125_v38 = vpack.c.bf16 %v11688_v21, %v11687_v20  ;;  %v12939_v46 = vpack.c.bf16 %v11534_v37, %v11533_v36  ;;  %v11581_v20 = vld [vmem:[%s17450_s7 + $0x890] sm:$0xff]  ;;  %v11582_v21 = vld [vmem:[%s17450_s7 + $0x898] sm:$0xff] }
 0x6aa   : > { %12920 = vmatprep.subr.bf16.mxu1 %v12919_v41  ;;  %v11689_v41 = vld [vmem:[%s17450_s7 + $0xbe0] sm:$0xff]  ;;  %v12989_v35 = vpack.c.bf16 %v11582_v21, %v11581_v20  ;;  %v11565_v36 = vld [vmem:[%s17450_s7 + $0x810] sm:$0xff]  ;;  %v11566_v37 = vld [vmem:[%s17450_s7 + $0x818] sm:$0xff] }
 0x6ab   : > { %v12991_v45 = vpack.c.bf16 %v11566_v37, %v11565_v36  ;;  %v11723_v21 = vld [vmem:[%s17450_s7 + $0xcf0] sm:$0xff] }
 0x6ac   : > { %13079 = vmatpush1.bf16.msra.mxu0 %v13078_v48  ;;  %v11707_v48 = vld [vmem:[%s17450_s7 + $0xc70] sm:$0xff] }
 0x6ad   : > { %12922 = vmatpush3.bf16.msra.mxu1 %v12921_v49  ;;  %13080 = vmatprep.subr.bf16.mxu0 %v13799_v22  ;;  %v11708_v49 = vld [vmem:[%s17450_s7 + $0xc78] sm:$0xff] }
 0x6ae   : > { %12924 = vmatprep.subr.bf16.mxu1 %v12923_v52  ;;  %v13129_v52 = vpack.c.bf16 %v11690_v44, %v11689_v41  ;;  %v13131_v54 = vpack.c.bf16 %v11708_v49, %v11707_v48  ;;  %v11584_v41 = vld [vmem:[%s17450_s7 + $0x8a8] sm:$0xff]  ;;  %v13145_v44 = vpack.c.bf16 %v11698_v34, %v11697_v30  ;;  %v9267_v48 = vrot.slane %v15505_v26, 2  ;;  %v11593_v34 = vld [vmem:[%s17450_s7 + $0x8f0] sm:$0xff] }
 0x6af   : > { %v11576_v30 = vld [vmem:[%s17450_s7 + $0x868] sm:$0xff] }
 0x6b0   : > { %9346 = vmatmul.mubr.f32.vlgmr.msra.gmra.mrb[50].mxu1 %v9265_v60  ;;  %13082 = vmatpush1.bf16.msra.mxu0 %v13081_v58  ;;  %v11519_v58 = vld [vmem:[%s17450_s7 + $0x6b0] sm:$0xff]  ;;  %v11537_v60 = vld [vmem:[%s17450_s7 + $0x740] sm:$0xff] }
 0x6b1   : > { %12926 = vmatpush3.bf16.msra.mxu1 %v12925_v9  ;;  %9415 = vmatprep.mubr.f32.mxu1 %v9268_v1  ;;  %v12943_v9 = vpack.c.bf16 %v11536_v51, %v11535_v50  ;;  %v12945_v2 = vpack.c.bf16 %v11520_v11, %v11519_v58  ;;  %v11693_v1 = vld [vmem:[%s17450_s7 + $0xc00] sm:$0xff]  ;;  %v11718_v11 = vld [vmem:[%s17450_s7 + $0xcc8] sm:$0xff] }
 0x6b2   : > { %13083 = vmatprep.subr.bf16.mxu0 %v13799_v22  ;;  %12928 = vmatprep.subr.bf16.mxu1 %v12927_v61  ;;  %v11538_v61 = vld [vmem:[%s17450_s7 + $0x748] sm:$0xff]  ;;  %v11567_v51 = vld [vmem:[%s17450_s7 + $0x820] sm:$0xff] }
 0x6b4   : > { %13086 = vmatpush1.bf16.msk.msra.mxu0 %vm15265_vm15, %v13084_v7  ;;  %v12947_v7 = vpack.c.bf16 %v11538_v61, %v11537_v60  ;;  %v11570_v60 = vld [vmem:[%s17450_s7 + $0x838] sm:$0xff]  ;;  %v11587_v61 = vld [vmem:[%s17450_s7 + $0x8c0] sm:$0xff] }
 0x6b5   : > { %12930 = vmatpush3.bf16.msra.mxu1 %v12929_v13  ;;  %13120 = vmatprep.subr.bf16.mxu0 %v13119_v15  ;;  %v11522_v13 = vld [vmem:[%s17450_s7 + $0x6c8] sm:$0xff]  ;;  %v11711_v15 = vld [vmem:[%s17450_s7 + $0xc90] sm:$0xff] }
 0x6b6   : > { %12932 = vmatprep.subr.bf16.mxu1 %v12931_v4  ;;  %v13137_v4 = vpack.c.bf16 %v11694_v3, %v11693_v1  ;;  %v12949_v8 = vpack.c.bf16 %v11522_v13, %v11521_v6  ;;  %v13139_v10 = vpack.c.bf16 %v11712_v16, %v11711_v15  ;;  %v12999_v1 = vpack.c.bf16 %v11570_v60, %v11569_v59  ;;  %v11719_v3 = vld [vmem:[%s17450_s7 + $0xcd0] sm:$0xff]  ;;  %v11720_v6 = vld [vmem:[%s17450_s7 + $0xcd8] sm:$0xff]  ;;  %v11571_v15 = vld [vmem:[%s17450_s7 + $0x840] sm:$0xff] }
 0x6b7   : > { %9800 = vmatmul.mubr.f32.vlgmr.msra.gmra.mrb[12].mxu0 %v9583_v32  ;;  %v11524_v32 = vld [vmem:[%s17450_s7 + $0x6d8] sm:$0xff]  ;;  %v11572_v16 = vld [vmem:[%s17450_s7 + $0x848] sm:$0xff]  ;;  %v11597_v59 = vld [vmem:[%s17450_s7 + $0x910] sm:$0xff] }
 0x6b8   : > { %13122 = vmatpush3.bf16.msra.mxu0 %v13121_v18  ;;  %10043 = vmatprep.mubr.f32.mxu0 %v9896_v28  ;;  %v12951_v18 = vpack.c.bf16 %v11540_v5, %v11539_v17  ;;  %v12953_v28 = vpack.c.bf16 %v11524_v32, %v11523_v14  ;;  %v11589_v17 = vld [vmem:[%s17450_s7 + $0x8d0] sm:$0xff]  ;;  %v11590_v5 = vld [vmem:[%s17450_s7 + $0x8d8] sm:$0xff]  ;;  %v11591_v32 = vld [vmem:[%s17450_s7 + $0x8e0] sm:$0xff] }
 0x6b9   : > { %12934 = vmatpush3.bf16.msra.mxu1 %v12933_v33  ;;  %13124 = vmatprep.subr.bf16.mxu0 %v13123_v19  ;;  %v11713_v33 = vld [vmem:[%s17450_s7 + $0xca0] sm:$0xff]  ;;  %v11714_v19 = vld [vmem:[%s17450_s7 + $0xca8] sm:$0xff]  ;;  %v13005_v12 = vpack.c.bf16 %v11590_v5, %v11589_v17  ;;  %v11573_v14 = vld [vmem:[%s17450_s7 + $0x850] sm:$0xff] }
 0x6ba   : > { %12936 = vmatprep.subr.bf16.mxu1 %v12935_v29  ;;  %v13143_v29 = vpack.c.bf16 %v11714_v19, %v11713_v33  ;;  %v11592_v33 = vld [vmem:[%s17450_s7 + $0x8e8] sm:$0xff]  ;;  %v11598_v60 = vld [vmem:[%s17450_s7 + $0x918] sm:$0xff]  ;;  %v11617_v17 = vld [vmem:[%s17450_s7 + $0x9b0] sm:$0xff] }
 0x6bb   : > { %v11618_v5 = vld [vmem:[%s17450_s7 + $0x9b8] sm:$0xff] }
 0x6bc   : > { %13126 = vmatpush3.bf16.msra.mxu0 %v13125_v38  ;;  %v11715_v38 = vld [vmem:[%s17450_s7 + $0xcb0] sm:$0xff] }
 0x6bd   : > { %12938 = vmatpush3.bf16.msra.mxu1 %v12937_v39  ;;  %13128 = vmatprep.subr.bf16.mxu0 %v13127_v40  ;;  %v11716_v39 = vld [vmem:[%s17450_s7 + $0xcb8] sm:$0xff]  ;;  %v11583_v40 = vld [vmem:[%s17450_s7 + $0x8a0] sm:$0xff] }
 0x6be   : > { %12940 = vmatprep.subr.bf16.mxu1 %v12939_v46  ;;  %v11699_v46 = vld [vmem:[%s17450_s7 + $0xc30] sm:$0xff]  ;;  %v13147_v49 = vpack.c.bf16 %v11716_v39, %v11715_v38  ;;  %v12993_v50 = vpack.c.bf16 %v11584_v41, %v11583_v40  ;;  %v11725_v38 = vld [vmem:[%s17450_s7 + $0xd00] sm:$0xff]  ;;  %v11726_v39 = vld [vmem:[%s17450_s7 + $0xd08] sm:$0xff] }
 0x6bf   : > { %v13149_v56 = vpack.c.bf16 %v11700_v47, %v11699_v46  ;;  %v11577_v41 = vld [vmem:[%s17450_s7 + $0x870] sm:$0xff]  ;;  %v11596_v46 = vld [vmem:[%s17450_s7 + $0x908] sm:$0xff]  ;;  %v13164_v47 = vpack.c.bf16 %v11726_v39, %v11725_v38  ;;  %v11737_v38 = vld [vmem:[%s17450_s7 + $0xd60] sm:$0xff] }
 0x6c0   : > { %13130 = vmatpush3.bf16.msra.mxu0 %v13129_v52  ;;  %v11568_v52 = vld [vmem:[%s17450_s7 + $0x828] sm:$0xff] }
 0x6c1   : > { %12942 = vmatpush3.bf16.msra.mxu1 %v12941_v53  ;;  %13132 = vmatprep.subr.bf16.mxu0 %v13131_v54  ;;  %v9580_v53 = vrot.slane %v15320_v25, 3  ;;  %v11585_v54 = vld [vmem:[%s17450_s7 + $0x8b0] sm:$0xff]  ;;  %v12995_v58 = vpack.c.bf16 %v11568_v52, %v11567_v51  ;;  %v11579_v52 = vld [vmem:[%s17450_s7 + $0x880] sm:$0xff]  ;;  %v11738_v39 = vld [vmem:[%s17450_s7 + $0xd68] sm:$0x7] }
 0x6c2   : > { %12944 = vmatprep.subr.bf16.mxu1 %v12943_v9  ;;  %v11717_v9 = vld [vmem:[%s17450_s7 + $0xcc0] sm:$0xff]  ;;  %v12997_v31 = vpack.c.bf16 %v11586_v55, %v11585_v54  ;;  %v11613_v54 = vld [vmem:[%s17450_s7 + $0x990] sm:$0xff]  ;;  %v11614_v55 = vld [vmem:[%s17450_s7 + $0x998] sm:$0xff] }
 0x6c4   : > { %13134 = vmatpush3.bf16.msra.mxu0 %v13133_v62  ;;  %v11588_v62 = vld [vmem:[%s17450_s7 + $0x8c8] sm:$0xff] }
 0x6c5   : > { %12946 = vmatpush3.bf16.msra.mxu1 %v12945_v2  ;;  %13136 = vmatprep.subr.bf16.mxu0 %v13135_v63  ;;  %v13152_v2 = vpack.c.bf16 %v11718_v11, %v11717_v9  ;;  %v9895_v63 = vrot.slane %v15505_v26, 4  ;;  %v13001_v13 = vpack.c.bf16 %v11588_v62, %v11587_v61  ;;  %v11729_v9 = vld [vmem:[%s17450_s7 + $0xd20] sm:$0xff]  ;;  %v11730_v11 = vld [vmem:[%s17450_s7 + $0xd28] sm:$0xff] }
 0x6c6   : > { %12948 = vmatprep.subr.bf16.mxu1 %v12947_v7  ;;  %v9898_v7 = vrot.slane %v15316_v23, 4  ;;  %v11615_v61 = vld [vmem:[%s17450_s7 + $0x9a0] sm:$0xff]  ;;  %v11616_v62 = vld [vmem:[%s17450_s7 + $0x9a8] sm:$0xff] }
 0x6c8   : > { %13138 = vmatpush3.bf16.msra.mxu0 %v13137_v4  ;;  %v13155_v4 = vpack.c.bf16 %v11720_v6, %v11719_v3  ;;  %v11732_v3 = vld [vmem:[%s17450_s7 + $0xd38] sm:$0xff]  ;;  %v9579_v6 = vrot.slane %v15318_v24, 3 }
 0x6c9   : > { %12950 = vmatpush3.bf16.msra.mxu1 %v12949_v8  ;;  %13140 = vmatprep.subr.bf16.mxu0 %v13139_v10  ;;  %v13003_v8 = vpack.c.bf16 %v11572_v16, %v11571_v15  ;;  %v11721_v10 = vld [vmem:[%s17450_s7 + $0xce0] sm:$0xff]  ;;  %v11600_v15 = vld [vmem:[%s17450_s7 + $0x928] sm:$0xff]  ;;  %v9582_v16 = vrot.slane %v15352_v42, 3 }
 0x6ca   : > { %12952 = vmatprep.subr.bf16.mxu1 %v12951_v18  ;;  %v11574_v18 = vld [vmem:[%s17450_s7 + $0x858] sm:$0xff]  ;;  %v13158_v19 = vpack.c.bf16 %v11722_v0, %v11721_v10  ;;  %v11733_v10 = vld [vmem:[%s17450_s7 + $0xd40] sm:$0xff]  ;;  %v11734_v0 = vld [vmem:[%s17450_s7 + $0xd48] sm:$0xff] }
 0x6cb   : > { %v13007_v20 = vpack.c.bf16 %v11574_v18, %v11573_v14  ;;  %v11601_v14 = vld [vmem:[%s17450_s7 + $0x930] sm:$0xff]  ;;  %v11602_v18 = vld [vmem:[%s17450_s7 + $0x938] sm:$0xff] }
 0x6cc   : > { %13142 = vmatpush3.bf16.msra.mxu0 %v13141_v27  ;;  %v11724_v27 = vld [vmem:[%s17450_s7 + $0xcf8] sm:$0xff] }
 0x6cd   : > { %12954 = vmatpush3.bf16.msra.mxu1 %v12953_v28  ;;  %13144 = vmatprep.subr.bf16.mxu0 %v13143_v29  ;;  %v13009_v28 = vpack.c.bf16 %v11592_v33, %v11591_v32  ;;  %v11575_v29 = vld [vmem:[%s17450_s7 + $0x860] sm:$0xff]  ;;  %v13161_v36 = vpack.c.bf16 %v11724_v27, %v11723_v21  ;;  %v11620_v33 = vld [vmem:[%s17450_s7 + $0x9c8] sm:$0xff]  ;;  %v11735_v21 = vld [vmem:[%s17450_s7 + $0xd50] sm:$0xff] }
 0x6ce   : > { %12990 = vmatprep.subr.bf16.mxu1 %v12989_v35  ;;  %v11594_v35 = vld [vmem:[%s17450_s7 + $0x8f8] sm:$0xff]  ;;  %v13011_v37 = vpack.c.bf16 %v11576_v30, %v11575_v29  ;;  %v11619_v32 = vld [vmem:[%s17450_s7 + $0x9c0] sm:$0xff]  ;;  %v11604_v30 = vld [vmem:[%s17450_s7 + $0x948] sm:$0xff] }
 0x6cf   : > { %v13013_v40 = vpack.c.bf16 %v11594_v35, %v11593_v34  ;;  %v11736_v27 = vld [vmem:[%s17450_s7 + $0xd58] sm:$0xff]  ;;  %v11603_v29 = vld [vmem:[%s17450_s7 + $0x940] sm:$0xff]  ;;  %v11621_v34 = vld [vmem:[%s17450_s7 + $0x9d0] sm:$0xff] }
 0x6d0   : > { %9416 = vmatmul.mubr.f32.vlgmr.msra.gmra.mrb[52].mxu1 %v9267_v48  ;;  %13146 = vmatpush3.bf16.msra.mxu0 %v13145_v44  ;;  %v11578_v44 = vld [vmem:[%s17450_s7 + $0x878] sm:$0xff] }
 0x6d1   : > { %12992 = vmatpush3.bf16.msra.mxu1 %v12991_v45  ;;  %9659 = vmatprep.mubr.f32.mxu1 %v9580_v53  ;;  %v11595_v45 = vld [vmem:[%s17450_s7 + $0x900] sm:$0xff]  ;;  %v13015_v48 = vpack.c.bf16 %v11578_v44, %v11577_v41  ;;  %v11580_v53 = vld [vmem:[%s17450_s7 + $0x888] sm:$0xff]  ;;  %v11622_v35 = vld [vmem:[%s17450_s7 + $0x9d8] sm:$0xff] }
 0x6d2   : > { %13148 = vmatprep.subr.bf16.mxu0 %v13147_v49  ;;  %12994 = vmatprep.subr.bf16.mxu1 %v12993_v50  ;;  %v11727_v49 = vld [vmem:[%s17450_s7 + $0xd10] sm:$0xff]  ;;  %v11728_v50 = vld [vmem:[%s17450_s7 + $0xd18] sm:$0xff]  ;;  %v13017_v51 = vpack.c.bf16 %v11596_v46, %v11595_v45  ;;  %v11623_v45 = vld [vmem:[%s17450_s7 + $0x9e0] sm:$0xff] }
 0x6d3   : > { %v11605_v41 = vld [vmem:[%s17450_s7 + $0x950] sm:$0xff]  ;;  %v11606_v44 = vld [vmem:[%s17450_s7 + $0x958] sm:$0xff]  ;;  %v11624_v46 = vld [vmem:[%s17450_s7 + $0x9e8] sm:$0xff] }
 0x6d4   : > { %13150 = vmatpush3.bf16.msra.mxu0 %v13149_v56  ;;  %v13167_v56 = vpack.c.bf16 %v11728_v50, %v11727_v49  ;;  %v11805_v49 = vld [vmem:[%s17450_s7 + $0xf70] sm:$0xff]  ;;  %v11806_v50 = vld [vmem:[%s17450_s7 + $0xf78] sm:$0xff] }
 0x6d5   : > { %12996 = vmatpush3.bf16.msra.mxu1 %v12995_v58  ;;  %13151 = vmatprep.subr.bf16.mxu0 %v13799_v22  ;;  %v13019_v58 = vpack.c.bf16 %v11580_v53, %v11579_v52  ;;  %v11607_v52 = vld [vmem:[%s17450_s7 + $0x960] sm:$0xff]  ;;  %v11608_v53 = vld [vmem:[%s17450_s7 + $0x968] sm:$0xff] }
 0x6d6   : > { %12998 = vmatprep.subr.bf16.mxu1 %v12997_v31  ;;  %v13021_v31 = vpack.c.bf16 %v11614_v55, %v11613_v54  ;;  %v11625_v54 = vld [vmem:[%s17450_s7 + $0x9f0] sm:$0xff]  ;;  %v11626_v55 = vld [vmem:[%s17450_s7 + $0x9f8] sm:$0xff] }
 0x6d7   : > { %10044 = vmatmul.mubr.f32.vlgmr.msra.gmra.mrb[14].mxu0 %v9895_v63  ;;  %v13023_v63 = vpack.c.bf16 %v11598_v60, %v11597_v59  ;;  %v10212_v59 = vrot.slane %v15316_v23, 5  ;;  %v13045_v60 = vpack.c.bf16 %v11626_v55, %v11625_v54  ;;  %v11817_v54 = vld [vmem:[%s17450_s7 + $0xfd0] sm:$0xff]  ;;  %v11818_v55 = vld [vmem:[%s17450_s7 + $0xfd8] sm:$0xff] }
 0x6d8   : > { %13153 = vmatpush1.bf16.msra.mxu0 %v13152_v2  ;;  %11740 = vmatprep.mubr.msk.f32.mxu0 %vm8641_vm0, %v9898_v7  ;;  %v13170_v2 = vpack.c.bf16 %v11730_v11, %v11729_v9  ;;  %v13025_v7 = vpack.c.bf16 %v11616_v62, %v11615_v61  ;;  %v13043_v9 = vpack.c.bf16 %v11608_v53, %v11607_v52  ;;  %v11807_v11 = vld [vmem:[%s17450_s7 + $0xf80] sm:$0xff]  ;;  %v11609_v61 = vld [vmem:[%s17450_s7 + $0x970] sm:$0xff]  ;;  %v11610_v62 = vld [vmem:[%s17450_s7 + $0x978] sm:$0xff] }
 0x6d9   : > { %13000 = vmatpush3.bf16.msra.mxu1 %v12999_v1  ;;  %13154 = vmatprep.subr.bf16.mxu0 %v13799_v22  ;;  %v11731_v1 = vld [vmem:[%s17450_s7 + $0xd30] sm:$0xff] }
 0x6da   : > { %13002 = vmatprep.subr.bf16.mxu1 %v13001_v13  ;;  %v11599_v13 = vld [vmem:[%s17450_s7 + $0x920] sm:$0xff] }
 0x6dc   : > { %13156 = vmatpush1.bf16.msra.mxu0 %v13155_v4  ;;  %v13173_v4 = vpack.c.bf16 %v11732_v3, %v11731_v1  ;;  %v11628_v1 = vld [vmem:[%s17450_s7 + $0xa08] sm:$0xff] }
 0x6dd   : > { %13004 = vmatpush3.bf16.msra.mxu1 %v13003_v8  ;;  %13157 = vmatprep.subr.bf16.mxu0 %v13799_v22  ;;  %v13027_v8 = vpack.c.bf16 %v11600_v15, %v11599_v13  ;;  %v13047_v13 = vpack.c.bf16 %v11610_v62, %v11609_v61  ;;  %v11809_v15 = vld [vmem:[%s17450_s7 + $0xf90] sm:$0xff]  ;;  %v11819_v61 = vld [vmem:[%s17450_s7 + $0xfe0] sm:$0xff]  ;;  %v11820_v62 = vld [vmem:[%s17450_s7 + $0xfe8] sm:$0xff] }
 0x6de   : > { %13006 = vmatprep.subr.bf16.mxu1 %v13005_v12  ;;  %v13029_v12 = vpack.c.bf16 %v11618_v5, %v11617_v17  ;;  %v11611_v5 = vld [vmem:[%s17450_s7 + $0x980] sm:$0xff] }
 0x6e0   : > { %13159 = vmatpush1.bf16.msra.mxu0 %v13158_v19  ;;  %v13176_v19 = vpack.c.bf16 %v11734_v0, %v11733_v10  ;;  %v11670_v10 = vld [vmem:[%s17450_s7 + $0xb48] sm:$0xff] }
 0x6e1   : > { %13008 = vmatpush3.bf16.msra.mxu1 %v13007_v20  ;;  %13160 = vmatprep.subr.bf16.mxu0 %v13799_v22  ;;  %v13031_v20 = vpack.c.bf16 %v11602_v18, %v11601_v14  ;;  %v11811_v14 = vld [vmem:[%s17450_s7 + $0xfa0] sm:$0xff]  ;;  %v11812_v18 = vld [vmem:[%s17450_s7 + $0xfa8] sm:$0xff] }
 0x6e2   : > { %13010 = vmatprep.subr.bf16.mxu1 %v13009_v28  ;;  %v13033_v28 = vpack.c.bf16 %v11620_v33, %v11619_v32  ;;  %v11653_v33 = vld [vmem:[%s17450_s7 + $0xac0] sm:$0xff] }
 0x6e4   : > { %13162 = vmatpush1.bf16.msra.mxu0 %v13161_v36  ;;  %v13179_v36 = vpack.c.bf16 %v11736_v27, %v11735_v21  ;;  %v11672_v21 = vld [vmem:[%s17450_s7 + $0xb58] sm:$0xff]  ;;  %v13259_v27 = vpack.c.bf16 %v11812_v18, %v11811_v14  ;;  %v11823_v18 = vld [vmem:[%s17450_s7 + $0x1000] sm:$0xff] }
 0x6e5   : > { %13012 = vmatpush3.bf16.msra.mxu1 %v13011_v37  ;;  %13163 = vmatprep.subr.bf16.mxu0 %v13799_v22  ;;  %v13035_v37 = vpack.c.bf16 %v11604_v30, %v11603_v29  ;;  %v11813_v29 = vld [vmem:[%s17450_s7 + $0xfb0] sm:$0xff]  ;;  %v11814_v30 = vld [vmem:[%s17450_s7 + $0xfb8] sm:$0xff] }
 0x6e6   : > { %13014 = vmatprep.subr.bf16.mxu1 %v13013_v40  ;;  %v13037_v40 = vpack.c.bf16 %v11622_v35, %v11621_v34  ;;  %v9581_v34 = vrot.slane %v15505_v26, 3 }
 0x6e8   : > { %13165 = vmatpush1.bf16.msra.mxu0 %v13164_v47  ;;  %v13182_v47 = vpack.c.bf16 %v11738_v39, %v11737_v38  ;;  %v9894_v38 = vrot.slane %v15320_v25, 4  ;;  %v11673_v39 = vld [vmem:[%s17450_s7 + $0xb60] sm:$0xff] }
 0x6e9   : > { %13016 = vmatpush3.bf16.msra.mxu1 %v13015_v48  ;;  %13166 = vmatprep.subr.bf16.mxu0 %v13799_v22  ;;  %v13039_v48 = vpack.c.bf16 %v11606_v44, %v11605_v41  ;;  %v13262_v41 = vpack.c.bf16 %v11814_v30, %v11813_v29 }
 0x6ea   : > { %13018 = vmatprep.subr.bf16.mxu1 %v13017_v51  ;;  %v13041_v51 = vpack.c.bf16 %v11624_v46, %v11623_v45  ;;  %v11815_v45 = vld [vmem:[%s17450_s7 + $0xfc0] sm:$0xff]  ;;  %v11816_v46 = vld [vmem:[%s17450_s7 + $0xfc8] sm:$0xff] }
 0x6eb   : > { %v13265_v52 = vpack.c.bf16 %v11816_v46, %v11815_v45  ;;  %v11758_v45 = vld [vmem:[%s17450_s7 + $0xdf8] sm:$0xff] }
 0x6ec   : > { %13168 = vmatpush1.bf16.msra.mxu0 %v13167_v56  ;;  %v13250_v56 = vpack.c.bf16 %v11806_v50, %v11805_v49  ;;  %v11658_v49 = vld [vmem:[%s17450_s7 + $0xae8] sm:$0xff]  ;;  %v11675_v50 = vld [vmem:[%s17450_s7 + $0xb70] sm:$0xff] }
 0x6ed   : > { %13020 = vmatpush3.bf16.msra.mxu1 %v13019_v58  ;;  %13169 = vmatprep.subr.bf16.mxu0 %v13799_v22  ;;  %v9897_v58 = vrot.slane %v15354_v43, 4 }
 0x6ee   : > { %13022 = vmatprep.subr.bf16.mxu1 %v13021_v31  ;;  %v11808_v31 = vld [vmem:[%s17450_s7 + $0xf88] sm:$0xff] }
 0x6f0   : > { %9660 = vmatmul.mubr.f32.vlgmr.msra.gmra.mrb[54].mxu1 %v9579_v6  ;;  %13171 = vmatpush1.bf16.msra.mxu0 %v13170_v2  ;;  %v13253_v6 = vpack.c.bf16 %v11808_v31, %v11807_v11  ;;  %v11677_v11 = vld [vmem:[%s17450_s7 + $0xb80] sm:$0xff]  ;;  %v11678_v31 = vld [vmem:[%s17450_s7 + $0xb88] sm:$0xff] }
 0x6f1   : > { %13024 = vmatpush3.bf16.msra.mxu1 %v13023_v63  ;;  %9729 = vmatprep.mubr.f32.mxu1 %v9582_v16  ;;  %v11627_v63 = vld [vmem:[%s17450_s7 + $0xa00] sm:$0xff]  ;;  %v11810_v16 = vld [vmem:[%s17450_s7 + $0xf98] sm:$0xff] }
 0x6f2   : > { %13172 = vmatprep.subr.bf16.mxu0 %v13799_v22  ;;  %13026 = vmatprep.subr.bf16.mxu1 %v13025_v7  ;;  %v13049_v17 = vpack.c.bf16 %v11628_v1, %v11627_v63  ;;  %v13256_v0 = vpack.c.bf16 %v11810_v16, %v11809_v15  ;;  %v11661_v63 = vld [vmem:[%s17450_s7 + $0xb00] sm:$0xff]  ;;  %v11662_v1 = vld [vmem:[%s17450_s7 + $0xb08] sm:$0xff]  ;;  %v11821_v16 = vld [vmem:[%s17450_s7 + $0xff0] sm:$0xff] }
 0x6f3   : > { %v13105_v15 = vpack.c.bf16 %v11662_v1, %v11661_v63  ;;  %v10208_v63 = vrot.slane %v15320_v25, 5 }
 0x6f4   : > { %13174 = vmatpush1.bf16.msra.mxu0 %v13173_v4  ;;  %v11612_v4 = vld [vmem:[%s17450_s7 + $0x988] sm:$0xff] }
 0x6f5   : > { %13028 = vmatpush3.bf16.msra.mxu1 %v13027_v8  ;;  %13175 = vmatprep.subr.bf16.mxu0 %v13799_v22  ;;  %v11669_v8 = vld [vmem:[%s17450_s7 + $0xb40] sm:$0xff] }
 0x6f6   : > { %13030 = vmatprep.subr.bf16.mxu1 %v13029_v12  ;;  %v13051_v12 = vpack.c.bf16 %v11612_v4, %v11611_v5  ;;  %v13087_v32 = vpack.c.bf16 %v11670_v10, %v11669_v8  ;;  %v11663_v4 = vld [vmem:[%s17450_s7 + $0xb10] sm:$0xff]  ;;  %v11664_v8 = vld [vmem:[%s17450_s7 + $0xb18] sm:$0xff]  ;;  %v11681_v10 = vld [vmem:[%s17450_s7 + $0xba0] sm:$0xff] }
 0x6f7   : > { %v13109_v14 = vpack.c.bf16 %v11664_v8, %v11663_v4  ;;  %v11764_v4 = vld [vmem:[%s17450_s7 + $0xe28] sm:$0xff] }
 0x6f8   : > { %13177 = vmatpush1.bf16.msra.mxu0 %v13176_v19  ;;  %v11654_v19 = vld [vmem:[%s17450_s7 + $0xac8] sm:$0xff] }
 0x6f9   : > { %13032 = vmatpush3.bf16.msra.mxu1 %v13031_v20  ;;  %13178 = vmatprep.subr.bf16.mxu0 %v13799_v22  ;;  %v11671_v20 = vld [vmem:[%s17450_s7 + $0xb50] sm:$0xff] }
 0x6fa   : > { %13034 = vmatprep.subr.bf16.mxu1 %v13033_v28  ;;  %v13089_v28 = vpack.c.bf16 %v11654_v19, %v11653_v33  ;;  %v13091_v35 = vpack.c.bf16 %v11672_v21, %v11671_v20  ;;  %v11665_v19 = vld [vmem:[%s17450_s7 + $0xb20] sm:$0xff]  ;;  %v11666_v20 = vld [vmem:[%s17450_s7 + $0xb28] sm:$0xff] }
 0x6fc   : > { %13180 = vmatpush1.bf16.msra.mxu0 %v13179_v36  ;;  %v11655_v36 = vld [vmem:[%s17450_s7 + $0xad0] sm:$0xff] }
 0x6fd   : > { %13036 = vmatpush3.bf16.msra.mxu1 %v13035_v37  ;;  %13181 = vmatprep.subr.bf16.mxu0 %v13799_v22  ;;  %v11656_v37 = vld [vmem:[%s17450_s7 + $0xad8] sm:$0xff] }
 0x6fe   : > { %13038 = vmatprep.subr.bf16.mxu1 %v13037_v40  ;;  %v11674_v40 = vld [vmem:[%s17450_s7 + $0xb68] sm:$0xff]  ;;  %v13093_v44 = vpack.c.bf16 %v11656_v37, %v11655_v36  ;;  %v11825_v36 = vld [vmem:[%s17450_s7 + $0x1010] sm:$0xff]  ;;  %v11826_v37 = vld [vmem:[%s17450_s7 + $0x1018] sm:$0x7] }
 0x6ff   : > { %v13280_v46 = vpack.c.bf16 %v11826_v37, %v11825_v36  ;;  %v11768_v36 = vld [vmem:[%s17450_s7 + $0xe48] sm:$0xff] }
 0x700   : > { %13184 = vmatpush1.bf16.msk.msra.mxu0 %vm15265_vm15, %v13182_v47  ;;  %v13095_v47 = vpack.c.bf16 %v11674_v40, %v11673_v39  ;;  %v11667_v39 = vld [vmem:[%s17450_s7 + $0xb30] sm:$0xff]  ;;  %v11668_v40 = vld [vmem:[%s17450_s7 + $0xb38] sm:$0xff] }
 0x701   : > { %13040 = vmatpush3.bf16.msra.mxu1 %v13039_v48  ;;  %13249 = vmatprep.subr.bf16.mxu0 %v13799_v22  ;;  %v11657_v48 = vld [vmem:[%s17450_s7 + $0xae0] sm:$0xff] }
 0x702   : > { %13042 = vmatprep.subr.bf16.mxu1 %v13041_v51  ;;  %v11676_v51 = vld [vmem:[%s17450_s7 + $0xb78] sm:$0xff]  ;;  %v13097_v53 = vpack.c.bf16 %v11658_v49, %v11657_v48  ;;  %v11893_v48 = vld [vmem:[%s17450_s7 + $0x1220] sm:$0xff] }
 0x703   : > { %10114 = vmatmul.mubr.f32.vlgmr.msra.gmra.mrb[12].mxu0 %v9897_v58  ;;  %v12077_v2 = vpop.f32.mrb[42].mxu1  ;;  %v11659_v58 = vld [vmem:[%s17450_s7 + $0xaf0] sm:$0xff] }
 0x704   : > { %13251 = vmatpush1.bf16.msra.mxu0 %v13250_v56  ;;  %11828 = vmatprep.mubr.msk.f32.mxu0 %vm8641_vm0, %v10212_v59  ;;  %v12078_v3 = vpop.f32.mrb[43].mxu1  ;;  %v13099_v56 = vpack.c.bf16 %v11676_v51, %v11675_v50  ;;  %v13268_v59 = vpack.c.bf16 %v11818_v55, %v11817_v54  ;;  %v11741_v50 = vld [vmem:[%s17450_s7 + $0xd70] sm:$0xff]  ;;  %v11742_v51 = vld [vmem:[%s17450_s7 + $0xd78] sm:$0xff]  ;;  %v11760_v54 = vld [vmem:[%s17450_s7 + $0xe08] sm:$0xff]  ;;  %v10211_v55 = vrot.slane %v15354_v43, 5 }
 0x705   : > { %v16448_v7 = vadd.f32 %v12078_v3, %v12077_v2  ;;  %13044 = vmatpush3.bf16.msra.mxu1 %v13043_v9  ;;  %13252 = vmatprep.subr.bf16.mxu0 %v13799_v22  ;;  %v11660_v9 = vld [vmem:[%s17450_s7 + $0xaf8] sm:$0xff]  ;;  %v13103_v2 = vpack.c.bf16 %v11678_v31, %v11677_v11  ;;  %v11679_v3 = vld [vmem:[%s17450_s7 + $0xb90] sm:$0xff]  ;;  %v9893_v11 = vrot.slane %v15318_v24, 4  ;;  %v11743_v31 = vld [vmem:[%s17450_s7 + $0xd80] sm:$0xff] }
 0x706   : > { %13046 = vmatprep.subr.bf16.mxu1 %v13045_v60  ;;  %v13101_v60 = vpack.c.bf16 %v11660_v9, %v11659_v58  ;;  %v11895_v58 = vld [vmem:[%s17450_s7 + $0x1230] sm:$0xff]  ;;  %v11896_v9 = vld [vmem:[%s17450_s7 + $0x1238] sm:$0xff] }
 0x707   : > { %v13351_v1 = vpack.c.bf16 %v11896_v9, %v11895_v58  ;;  %v11772_v58 = vld [vmem:[%s17450_s7 + $0xe68] sm:$0xff] }
 0x708   : > { %13254 = vmatpush1.bf16.msra.mxu0 %v13253_v6  ;;  %v11680_v6 = vld [vmem:[%s17450_s7 + $0xb98] sm:$0xff] }
 0x709   : > { %13048 = vmatpush3.bf16.msra.mxu1 %v13047_v13  ;;  %13255 = vmatprep.subr.bf16.mxu0 %v13799_v22  ;;  %v13271_v13 = vpack.c.bf16 %v11820_v62, %v11819_v61  ;;  %v13107_v5 = vpack.c.bf16 %v11680_v6, %v11679_v3  ;;  %v11761_v62 = vld [vmem:[%s17450_s7 + $0xe10] sm:$0xff]  ;;  %v11897_v6 = vld [vmem:[%s17450_s7 + $0x1240] sm:$0xff] }
 0x70a   : > { %13050 = vmatprep.subr.bf16.mxu1 %v13049_v17  ;;  %v11822_v17 = vld [vmem:[%s17450_s7 + $0xff8] sm:$0xff] }
 0x70c   : > { %13257 = vmatpush1.bf16.msra.mxu0 %v13256_v0  ;;  %v11682_v0 = vld [vmem:[%s17450_s7 + $0xba8] sm:$0xff] }
 0x70d   : > { %13052 = vmatpush3.bf16.msra.mxu1 %v13051_v12  ;;  %13258 = vmatprep.subr.bf16.mxu0 %v13799_v22  ;;  %v13274_v12 = vpack.c.bf16 %v11822_v17, %v11821_v16  ;;  %v13111_v33 = vpack.c.bf16 %v11682_v0, %v11681_v10  ;;  %v11745_v16 = vld [vmem:[%s17450_s7 + $0xd90] sm:$0xff]  ;;  %v11746_v17 = vld [vmem:[%s17450_s7 + $0xd98] sm:$0xff] }
 0x70e   : > { %13088 = vmatprep.subr.bf16.mxu1 %v13087_v32  ;;  %v11824_v32 = vld [vmem:[%s17450_s7 + $0x1008] sm:$0xff]  ;;  %v13195_v10 = vpack.c.bf16 %v11746_v17, %v11745_v16  ;;  %v11899_v0 = vld [vmem:[%s17450_s7 + $0x1250] sm:$0xff] }
 0x70f   : > { %v13277_v30 = vpack.c.bf16 %v11824_v32, %v11823_v18  ;;  %v11747_v18 = vld [vmem:[%s17450_s7 + $0xda0] sm:$0xff]  ;;  %v11748_v32 = vld [vmem:[%s17450_s7 + $0xda8] sm:$0xff] }
 0x710   : > { %9730 = vmatmul.mubr.f32.vlgmr.msra.gmra.mrb[56].mxu1 %v9581_v34  ;;  %13260 = vmatpush1.bf16.msra.mxu0 %v13259_v27  ;;  %v11683_v27 = vld [vmem:[%s17450_s7 + $0xbb0] sm:$0xff]  ;;  %v11910_v16 = vld [vmem:[%s17450_s7 + $0x12a8] sm:$0xff] }
 0x711   : > { %13090 = vmatpush3.bf16.msra.mxu1 %v13089_v28  ;;  %9973 = vmatprep.mubr.f32.mxu1 %v9894_v38  ;;  %v11684_v28 = vld [vmem:[%s17450_s7 + $0xbb8] sm:$0xff] }
 0x712   : > { %13261 = vmatprep.subr.bf16.mxu0 %v13799_v22  ;;  %13092 = vmatprep.subr.bf16.mxu1 %v13091_v35  ;;  %v13113_v35 = vpack.c.bf16 %v11666_v20, %v11665_v19  ;;  %v13115_v38 = vpack.c.bf16 %v11684_v28, %v11683_v27  ;;  %v11766_v19 = vld [vmem:[%s17450_s7 + $0xe38] sm:$0xff]  ;;  %v11901_v27 = vld [vmem:[%s17450_s7 + $0x1260] sm:$0xff]  ;;  %v11902_v28 = vld [vmem:[%s17450_s7 + $0x1268] sm:$0xff] }
 0x713   : > { %v13360_v37 = vpack.c.bf16 %v11902_v28, %v11901_v27  ;;  %v11793_v27 = vld [vmem:[%s17450_s7 + $0xf10] sm:$0xff]  ;;  %v11794_v28 = vld [vmem:[%s17450_s7 + $0xf18] sm:$0xff] }
 0x714   : > { %13263 = vmatpush1.bf16.msra.mxu0 %v13262_v41 }
 0x715   : > { %13094 = vmatpush3.bf16.msra.mxu1 %v13093_v44  ;;  %13264 = vmatprep.subr.bf16.mxu0 %v13799_v22  ;;  %v11757_v44 = vld [vmem:[%s17450_s7 + $0xdf0] sm:$0xff] }
 0x716   : > { %13096 = vmatprep.subr.bf16.mxu1 %v13095_v47  ;;  %v13117_v47 = vpack.c.bf16 %v11668_v40, %v11667_v39  ;;  %v13185_v49 = vpack.c.bf16 %v11758_v45, %v11757_v44  ;;  %v11903_v39 = vld [vmem:[%s17450_s7 + $0x1270] sm:$0xff]  ;;  %v11904_v40 = vld [vmem:[%s17450_s7 + $0x1278] sm:$0xff]  ;;  %v11751_v45 = vld [vmem:[%s17450_s7 + $0xdc0] sm:$0xff] }
 0x718   : > { %13266 = vmatpush1.bf16.msra.mxu0 %v13265_v52 }
 0x719   : > { %13098 = vmatpush3.bf16.msra.mxu1 %v13097_v53  ;;  %13267 = vmatprep.subr.bf16.mxu0 %v13799_v22  ;;  %v11759_v53 = vld [vmem:[%s17450_s7 + $0xe00] sm:$0xff] }
 0x71a   : > { %13100 = vmatprep.subr.bf16.mxu1 %v13099_v56  ;;  %v13187_v56 = vpack.c.bf16 %v11742_v51, %v11741_v50  ;;  %v13189_v61 = vpack.c.bf16 %v11760_v54, %v11759_v53  ;;  %v11905_v50 = vld [vmem:[%s17450_s7 + $0x1280] sm:$0xff]  ;;  %v11906_v51 = vld [vmem:[%s17450_s7 + $0x1288] sm:$0xff]  ;;  %v11753_v53 = vld [vmem:[%s17450_s7 + $0xdd0] sm:$0xff] }
 0x71b   : > { %v11754_v54 = vld [vmem:[%s17450_s7 + $0xdd8] sm:$0xff] }
 0x71c   : > { %13269 = vmatpush1.bf16.msra.mxu0 %v13268_v59  ;;  %v11744_v59 = vld [vmem:[%s17450_s7 + $0xd88] sm:$0xff] }
 0x71d   : > { %13102 = vmatpush3.bf16.msra.mxu1 %v13101_v60  ;;  %13270 = vmatprep.subr.bf16.mxu0 %v13799_v22  ;;  %v10526_v60 = vrot.slane %v15316_v23, 6  ;;  %v13191_v3 = vpack.c.bf16 %v11744_v59, %v11743_v31  ;;  %v13211_v59 = vpack.c.bf16 %v11754_v54, %v11753_v53  ;;  %v11967_v53 = vld [vmem:[%s17450_s7 + $0x1460] sm:$0xff]  ;;  %v11968_v54 = vld [vmem:[%s17450_s7 + $0x1468] sm:$0xff] }
 0x71e   : > { %13104 = vmatprep.subr.bf16.mxu1 %v13103_v2  ;;  %v11762_v2 = vld [vmem:[%s17450_s7 + $0xe18] sm:$0xff] }
 0x720   : > { %13272 = vmatpush1.bf16.msra.mxu0 %v13271_v13  ;;  %v11898_v13 = vld [vmem:[%s17450_s7 + $0x1248] sm:$0xff] }
 0x721   : > { %13106 = vmatpush3.bf16.msra.mxu1 %v13105_v15  ;;  %13273 = vmatprep.subr.bf16.mxu0 %v13799_v22  ;;  %v13193_v15 = vpack.c.bf16 %v11762_v2, %v11761_v62  ;;  %v13354_v8 = vpack.c.bf16 %v11898_v13, %v11897_v6  ;;  %v11755_v2 = vld [vmem:[%s17450_s7 + $0xde0] sm:$0xff] }
 0x722   : > { %13108 = vmatprep.subr.bf16.mxu1 %v13107_v5  ;;  %v11763_v5 = vld [vmem:[%s17450_s7 + $0xe20] sm:$0xff] }
 0x723   : > { %v12112_v21 = vpop.f32.mrb[44].mxu1 }
 0x724   : > { %v12113_v29 = vpop.f32.mrb[45].mxu1  ;;  %13275 = vmatpush1.bf16.msra.mxu0 %v13274_v12  ;;  %v11900_v12 = vld [vmem:[%s17450_s7 + $0x1258] sm:$0xff] }
 0x725   : > { %v12114_v34 = vadd.f32 %v12113_v29, %v12112_v21  ;;  %13110 = vmatpush3.bf16.msra.mxu1 %v13109_v14  ;;  %13276 = vmatprep.subr.bf16.mxu0 %v13799_v22  ;;  %v13197_v14 = vpack.c.bf16 %v11764_v4, %v11763_v5  ;;  %v13357_v20 = vpack.c.bf16 %v11900_v12, %v11899_v0  ;;  %v11773_v5 = vld [vmem:[%s17450_s7 + $0xe70] sm:$0xff]  ;;  %v11774_v4 = vld [vmem:[%s17450_s7 + $0xe78] sm:$0xff] }
 0x726   : > { %13112 = vmatprep.subr.bf16.mxu1 %v13111_v33  ;;  %v11765_v33 = vld [vmem:[%s17450_s7 + $0xe30] sm:$0xff]  ;;  %v13199_v21 = vpack.c.bf16 %v11748_v32, %v11747_v18  ;;  %v13219_v12 = vpack.c.bf16 %v11774_v4, %v11773_v5  ;;  %v11912_v18 = vld [vmem:[%s17450_s7 + $0x12b8] sm:$0xff]  ;;  %v10207_v32 = vrot.slane %v15318_v24, 5 }
 0x727   : > { %v16618_v41 = vadd.f32 %v12114_v34, %v16448_v7  ;;  %v11894_v7 = vld [vmem:[%s17450_s7 + $0x1228] sm:$0xff]  ;;  %v13201_v29 = vpack.c.bf16 %v11766_v19, %v11765_v33  ;;  %v11750_v34 = vld [vmem:[%s17450_s7 + $0xdb8] sm:$0xff]  ;;  %v11775_v19 = vld [vmem:[%s17450_s7 + $0xe80] sm:$0xff] }
 0x728   : > { %13278 = vmatpush1.bf16.msra.mxu0 %v13277_v30  ;;  %v13348_v52 = vpack.c.bf16 %v11894_v7, %v11893_v48  ;;  %v11749_v30 = vld [vmem:[%s17450_s7 + $0xdb0] sm:$0xff]  ;;  %v11770_v48 = vld [vmem:[%s17450_s7 + $0xe58] sm:$0xff]  ;;  %v13363_v7 = vpack.c.bf16 %v11904_v40, %v11903_v39 }
 0x729   : > { %13114 = vmatpush3.bf16.msra.mxu1 %v13113_v35  ;;  %13279 = vmatprep.subr.bf16.mxu0 %v13799_v22  ;;  %v11767_v35 = vld [vmem:[%s17450_s7 + $0xe40] sm:$0xff]  ;;  %v11965_v39 = vld [vmem:[%s17450_s7 + $0x1450] sm:$0xff]  ;;  %v11966_v40 = vld [vmem:[%s17450_s7 + $0x1458] sm:$0xff] }
 0x72a   : > { %13116 = vmatprep.subr.bf16.mxu1 %v13115_v38  ;;  %v13203_v38 = vpack.c.bf16 %v11750_v34, %v11749_v30  ;;  %v13205_v44 = vpack.c.bf16 %v11768_v36, %v11767_v35  ;;  %v11913_v34 = vld [vmem:[%s17450_s7 + $0x12c0] sm:$0xff]  ;;  %v11914_v35 = vld [vmem:[%s17450_s7 + $0x12c8] sm:$0x7]  ;;  %v11777_v36 = vld [vmem:[%s17450_s7 + $0xe90] sm:$0xff] }
 0x72b   : > { %v11953_v4 = vld [vmem:[%s17450_s7 + $0x13f0] sm:$0xff] }
 0x72c   : > { %13282 = vmatpush1.bf16.msk.msra.mxu0 %vm15265_vm15, %v13280_v46  ;;  %v11752_v46 = vld [vmem:[%s17450_s7 + $0xdc8] sm:$0xff] }
 0x72d   : > { %13118 = vmatpush3.bf16.msra.mxu1 %v13117_v47  ;;  %13347 = vmatprep.subr.bf16.mxu0 %v13799_v22  ;;  %v11769_v47 = vld [vmem:[%s17450_s7 + $0xe50] sm:$0xff] }
 0x72e   : > { %13186 = vmatprep.subr.bf16.mxu1 %v13185_v49  ;;  %v13207_v49 = vpack.c.bf16 %v11752_v46, %v11751_v45  ;;  %v11796_v45 = vld [vmem:[%s17450_s7 + $0xf28] sm:$0xff]  ;;  %v13378_v46 = vpack.c.bf16 %v11914_v35, %v11913_v34  ;;  %v11786_v34 = vld [vmem:[%s17450_s7 + $0xed8] sm:$0xff]  ;;  %v11973_v35 = vld [vmem:[%s17450_s7 + $0x1490] sm:$0xff] }
 0x72f   : > { %10428 = vmatmul.mubr.f32.vlgmr.msra.gmra.mrb[12].mxu0 %v10211_v55 }
 0x730   : > { %9974 = vmatmul.mubr.f32.vlgmr.msra.gmra.mrb[58].mxu1 %v9893_v11  ;;  %13349 = vmatpush1.bf16.msra.mxu0 %v13348_v52  ;;  %v13209_v52 = vpack.c.bf16 %v11770_v48, %v11769_v47  ;;  %v13366_v11 = vpack.c.bf16 %v11906_v51, %v11905_v50  ;;  %v13413_v48 = vpack.c.bf16 %v11966_v40, %v11965_v39  ;;  %v11779_v50 = vld [vmem:[%s17450_s7 + $0xea0] sm:$0xff]  ;;  %v11804_v39 = vld [vmem:[%s17450_s7 + $0xf68] sm:$0xff] }
 0x731   : > { %11916 = vmatprep.mubr.msk.f32.mxu0 %vm8641_vm0, %v10526_v60  ;;  %13188 = vmatpush3.bf16.msra.mxu1 %v13187_v56  ;;  %v11771_v56 = vld [vmem:[%s17450_s7 + $0xe60] sm:$0xff]  ;;  %v11907_v60 = vld [vmem:[%s17450_s7 + $0x1290] sm:$0xff] }
 0x732   : > { %10287 = vmatprep.mubr.f32.mxu1 %v10208_v63  ;;  %13350 = vmatprep.subr.bf16.mxu0 %v13799_v22  ;;  %v13213_v62 = vpack.c.bf16 %v11772_v58, %v11771_v56  ;;  %v11756_v63 = vld [vmem:[%s17450_s7 + $0xde8] sm:$0xff]  ;;  %v11798_v56 = vld [vmem:[%s17450_s7 + $0xf38] sm:$0xff]  ;;  %v8554_v40 = vld [vmem:[%s17451_s8] sm:$0x1] }
 0x733   : > { %13190 = vmatprep.subr.bf16.mxu1 %v13189_v61  ;;  %v11908_v61 = vld [vmem:[%s17450_s7 + $0x1298] sm:$0xff]  ;;  %v13215_v13 = vpack.c.bf16 %v11756_v63, %v11755_v2  ;;  %v10838_v2 = vrot.slane %v15352_v42, 7 }
 0x734   : > { %13352 = vmatpush1.bf16.msra.mxu0 %v13351_v1  ;;  %v11789_v1 = vld [vmem:[%s17450_s7 + $0xef0] sm:$0xff]  ;;  %v13369_v6 = vpack.c.bf16 %v11908_v61, %v11907_v60  ;;  %v11951_v60 = vld [vmem:[%s17450_s7 + $0x13e0] sm:$0xff]  ;;  %v11952_v61 = vld [vmem:[%s17450_s7 + $0x13e8] sm:$0xff] }
 0x735   : > { %13192 = vmatpush3.bf16.msra.mxu1 %v13191_v3  ;;  %13353 = vmatprep.subr.bf16.mxu0 %v13799_v22  ;;  %v11790_v3 = vld [vmem:[%s17450_s7 + $0xef8] sm:$0xff] }
 0x736   : > { %13194 = vmatprep.subr.bf16.mxu1 %v13193_v15  ;;  %v11909_v15 = vld [vmem:[%s17450_s7 + $0x12a0] sm:$0xff]  ;;  %v13217_v17 = vpack.c.bf16 %v11790_v3, %v11789_v1  ;;  %v11782_v1 = vld [vmem:[%s17450_s7 + $0xeb8] sm:$0xff]  ;;  %v11969_v3 = vld [vmem:[%s17450_s7 + $0x1470] sm:$0xff] }
 0x737   : > { %v13372_v0 = vpack.c.bf16 %v11910_v16, %v11909_v15  ;;  %v11800_v15 = vld [vmem:[%s17450_s7 + $0xf48] sm:$0xff]  ;;  %v13419_v16 = vpack.c.bf16 %v11952_v61, %v11951_v60 }
 0x738   : > { %13355 = vmatpush1.bf16.msra.mxu0 %v13354_v8  ;;  %v11791_v8 = vld [vmem:[%s17450_s7 + $0xf00] sm:$0xff] }
 0x739   : > { %13196 = vmatpush3.bf16.msra.mxu1 %v13195_v10  ;;  %13356 = vmatprep.subr.bf16.mxu0 %v13799_v22  ;;  %v11792_v10 = vld [vmem:[%s17450_s7 + $0xf08] sm:$0xff] }
 0x73a   : > { %13198 = vmatprep.subr.bf16.mxu1 %v13197_v14  ;;  %v11911_v14 = vld [vmem:[%s17450_s7 + $0x12b0] sm:$0xff]  ;;  %v13221_v33 = vpack.c.bf16 %v11792_v10, %v11791_v8  ;;  %v11954_v8 = vld [vmem:[%s17450_s7 + $0x13f8] sm:$0xff]  ;;  %v11783_v10 = vld [vmem:[%s17450_s7 + $0xec0] sm:$0xff] }
 0x73c   : > { %13358 = vmatpush1.bf16.msra.mxu0 %v13357_v20  ;;  %v11776_v20 = vld [vmem:[%s17450_s7 + $0xe88] sm:$0xff] }
 0x73d   : > { %13200 = vmatpush3.bf16.msra.mxu1 %v13199_v21  ;;  %13359 = vmatprep.subr.bf16.mxu0 %v13799_v22  ;;  %v10210_v21 = vrot.slane %v15352_v42, 5  ;;  %v13223_v30 = vpack.c.bf16 %v11776_v20, %v11775_v19  ;;  %v13423_v19 = vpack.c.bf16 %v11954_v8, %v11953_v4  ;;  %v11831_v4 = vld [vmem:[%s17450_s7 + $0x1030] sm:$0xff]  ;;  %v10209_v8 = vrot.slane %v15505_v26, 5 }
 0x73e   : > { %13202 = vmatprep.subr.bf16.mxu1 %v13201_v29  ;;  %v13375_v29 = vpack.c.bf16 %v11912_v18, %v11911_v14  ;;  %v11971_v14 = vld [vmem:[%s17450_s7 + $0x1480] sm:$0xff]  ;;  %v11972_v18 = vld [vmem:[%s17450_s7 + $0x1488] sm:$0xff] }
 0x740   : > { %13361 = vmatpush1.bf16.msra.mxu0 %v13360_v37  ;;  %v13225_v37 = vpack.c.bf16 %v11794_v28, %v11793_v27  ;;  %v11955_v27 = vld [vmem:[%s17450_s7 + $0x1400] sm:$0xff]  ;;  %v11956_v28 = vld [vmem:[%s17450_s7 + $0x1408] sm:$0xff] }
 0x741   : > { %13204 = vmatpush3.bf16.msra.mxu1 %v13203_v38  ;;  %13362 = vmatprep.subr.bf16.mxu0 %v13799_v22  ;;  %v11778_v38 = vld [vmem:[%s17450_s7 + $0xe98] sm:$0xff] }
 0x742   : > { %13206 = vmatprep.subr.bf16.mxu1 %v13205_v44  ;;  %v11795_v44 = vld [vmem:[%s17450_s7 + $0xf20] sm:$0xff]  ;;  %v13227_v47 = vpack.c.bf16 %v11778_v38, %v11777_v36  ;;  %v11974_v36 = vld [vmem:[%s17450_s7 + $0x1498] sm:$0xff] }
 0x743   : > { %v12147_v55 = vpop.f32.mrb[46].mxu1  ;;  %v13229_v51 = vpack.c.bf16 %v11796_v45, %v11795_v44  ;;  %v11803_v38 = vld [vmem:[%s17450_s7 + $0xf60] sm:$0xff]  ;;  %v13427_v45 = vpack.c.bf16 %v11956_v28, %v11955_v27 }
 0x744   : > { %v12148_v9 = vpop.f32.mrb[47].mxu1  ;;  %13364 = vmatpush1.bf16.msra.mxu0 %v13363_v7  ;;  %v11949_v7 = vld [vmem:[%s17450_s7 + $0x13d0] sm:$0xff]  ;;  %v11963_v28 = vld [vmem:[%s17450_s7 + $0x1440] sm:$0xff] }
 0x745   : > { %v16766_v31 = vadd.f32 %v12148_v9, %v12147_v55  ;;  %13208 = vmatpush3.bf16.msra.mxu1 %v13207_v49  ;;  %13365 = vmatprep.subr.bf16.mxu0 %v13799_v22  ;;  %v11950_v49 = vld [vmem:[%s17450_s7 + $0x13d8] sm:$0xff]  ;;  %v11797_v55 = vld [vmem:[%s17450_s7 + $0xf30] sm:$0xff]  ;;  %v10525_v9 = vrot.slane %v15354_v43, 6 }
 0x746   : > { %13210 = vmatprep.subr.bf16.mxu1 %v13209_v52  ;;  %v11780_v52 = vld [vmem:[%s17450_s7 + $0xea8] sm:$0xff]  ;;  %v13415_v58 = vpack.c.bf16 %v11950_v49, %v11949_v7  ;;  %v13233_v63 = vpack.c.bf16 %v11798_v56, %v11797_v55  ;;  %v11957_v7 = vld [vmem:[%s17450_s7 + $0x1410] sm:$0xff]  ;;  %v11958_v49 = vld [vmem:[%s17450_s7 + $0x1418] sm:$0xff]  ;;  %v13479_v55 = vadd.f32 %v16618_v41, %v8554_v40 }
 0x747   : > { %v11959_v41 = vld [vmem:[%s17450_s7 + $0x1420] sm:$0xff]  ;;  %v11981_v40 = vld [vmem:[%s17450_s7 + $0x14d0] sm:$0xff] }
 0x748   : > { %13367 = vmatpush1.bf16.msra.mxu0 %v13366_v11  ;;  %v13231_v11 = vpack.c.bf16 %v11780_v52, %v11779_v50  ;;  %v11787_v50 = vld [vmem:[%s17450_s7 + $0xee0] sm:$0xff]  ;;  %v11788_v52 = vld [vmem:[%s17450_s7 + $0xee8] sm:$0xff] }
 0x749   : > { %13212 = vmatpush3.bf16.msra.mxu1 %v13211_v59  ;;  %13368 = vmatprep.subr.bf16.mxu0 %v13799_v22  ;;  %v13417_v59 = vpack.c.bf16 %v11968_v54, %v11967_v53  ;;  %v11975_v53 = vld [vmem:[%s17450_s7 + $0x14a0] sm:$0xff]  ;;  %v11976_v54 = vld [vmem:[%s17450_s7 + $0x14a8] sm:$0xff]  ;;  %v13247_v60 = vpack.c.bf16 %v11788_v52, %v11787_v50  ;;  %v10837_v50 = vrot.slane %v15505_v26, 7 }
 0x74a   : > { %13214 = vmatprep.subr.bf16.mxu1 %v13213_v62  ;;  %v11781_v62 = vld [vmem:[%s17450_s7 + $0xeb0] sm:$0xff]  ;;  %v13433_v61 = vpack.c.bf16 %v11976_v54, %v11975_v53  ;;  %v11983_v52 = vld [vmem:[%s17450_s7 + $0x14e0] sm:$0xff]  ;;  %v11984_v53 = vld [vmem:[%s17450_s7 + $0x14e8] sm:$0xff]  ;;  %v10840_v54 = vrot.slane %v15316_v23, 7 }
 0x74b   : > { %v13449_v23 = vpack.c.bf16 %v11984_v53, %v11983_v52  ;;  %v11881_v52 = vld [vmem:[%s17450_s7 + $0x11c0] sm:$0xff]  ;;  %v11882_v53 = vld [vmem:[%s17450_s7 + $0x11c8] sm:$0xff] }
 0x74c   : > { %13370 = vmatpush1.bf16.msra.mxu0 %v13369_v6  ;;  %v11970_v6 = vld [vmem:[%s17450_s7 + $0x1478] sm:$0xff] }
 0x74d   : > { %13216 = vmatpush3.bf16.msra.mxu1 %v13215_v13  ;;  %13371 = vmatprep.subr.bf16.mxu0 %v13799_v22  ;;  %v11799_v13 = vld [vmem:[%s17450_s7 + $0xf40] sm:$0xff]  ;;  %v13421_v5 = vpack.c.bf16 %v11970_v6, %v11969_v3  ;;  %v11978_v3 = vld [vmem:[%s17450_s7 + $0x14b8] sm:$0xff]  ;;  %v11847_v6 = vld [vmem:[%s17450_s7 + $0x10b0] sm:$0xff] }
 0x74e   : > { %13218 = vmatprep.subr.bf16.mxu1 %v13217_v17  ;;  %v13235_v17 = vpack.c.bf16 %v11782_v1, %v11781_v62  ;;  %v11977_v1 = vld [vmem:[%s17450_s7 + $0x14b0] sm:$0xff] }
 0x750   : > { %10288 = vmatmul.mubr.f32.vlgmr.msra.gmra.mrb[60].mxu1 %v10207_v32  ;;  %13373 = vmatpush1.bf16.msra.mxu0 %v13372_v0  ;;  %v13237_v0 = vpack.c.bf16 %v11800_v15, %v11799_v13  ;;  %v11801_v32 = vld [vmem:[%s17450_s7 + $0xf50] sm:$0xff]  ;;  %v11848_v13 = vld [vmem:[%s17450_s7 + $0x10b8] sm:$0xff] }
 0x751   : > { %13220 = vmatpush3.bf16.msra.mxu1 %v13219_v12  ;;  %10357 = vmatprep.mubr.f32.mxu1 %v10210_v21  ;;  %v11784_v12 = vld [vmem:[%s17450_s7 + $0xec8] sm:$0xff]  ;;  %v13425_v21 = vpack.c.bf16 %v11972_v18, %v11971_v14  ;;  %v11979_v14 = vld [vmem:[%s17450_s7 + $0x14c0] sm:$0xff] }
 0x752   : > { %13374 = vmatprep.subr.bf16.mxu0 %v13799_v22  ;;  %13222 = vmatprep.subr.bf16.mxu1 %v13221_v33  ;;  %v11802_v33 = vld [vmem:[%s17450_s7 + $0xf58] sm:$0xff]  ;;  %v13239_v20 = vpack.c.bf16 %v11784_v12, %v11783_v10  ;;  %v13437_v10 = vpack.c.bf16 %v11978_v3, %v11977_v1  ;;  %v11980_v18 = vld [vmem:[%s17450_s7 + $0x14c8] sm:$0xff] }
 0x753   : > { %v11832_v12 = vld [vmem:[%s17450_s7 + $0x1038] sm:$0xff]  ;;  %v13441_v27 = vpack.c.bf16 %v11980_v18, %v11979_v14  ;;  %v11858_v1 = vld [vmem:[%s17450_s7 + $0x1108] sm:$0xff] }
 0x754   : > { %13376 = vmatpush1.bf16.msra.mxu0 %v13375_v29  ;;  %v11785_v29 = vld [vmem:[%s17450_s7 + $0xed0] sm:$0xff] }
 0x755   : > { %13224 = vmatpush3.bf16.msra.mxu1 %v13223_v30  ;;  %13377 = vmatprep.subr.bf16.mxu0 %v13799_v22  ;;  %v13241_v30 = vpack.c.bf16 %v11802_v33, %v11801_v32  ;;  %v10522_v32 = vrot.slane %v15320_v25, 6  ;;  %v11849_v33 = vld [vmem:[%s17450_s7 + $0x10c0] sm:$0xff] }
 0x756   : > { %13226 = vmatprep.subr.bf16.mxu1 %v13225_v37 }
 0x758   : > { %13380 = vmatpush1.bf16.msk.msra.mxu0 %vm15265_vm15, %v13378_v46 }
 0x759   : > { %13228 = vmatpush3.bf16.msra.mxu1 %v13227_v47  ;;  %13414 = vmatprep.subr.bf16.mxu0 %v13413_v48  ;;  %v13243_v47 = vpack.c.bf16 %v11786_v34, %v11785_v29  ;;  %v13429_v48 = vpack.c.bf16 %v11974_v36, %v11973_v35  ;;  %v11964_v29 = vld [vmem:[%s17450_s7 + $0x1448] sm:$0xff]  ;;  %v11833_v34 = vld [vmem:[%s17450_s7 + $0x1040] sm:$0xff]  ;;  %v11851_v36 = vld [vmem:[%s17450_s7 + $0x10d0] sm:$0xff] }
 0x75a   : > { %13230 = vmatprep.subr.bf16.mxu1 %v13229_v51  ;;  %v13245_v51 = vpack.c.bf16 %v11804_v39, %v11803_v38  ;;  %v11834_v35 = vld [vmem:[%s17450_s7 + $0x1048] sm:$0xff]  ;;  %v13443_v38 = vpack.c.bf16 %v11964_v29, %v11963_v28 }
 0x75b   : > { %10742 = vmatmul.mubr.f32.vlgmr.msra.gmra.mrb[12].mxu0 %v10525_v9  ;;  %v11846_v9 = vld [vmem:[%s17450_s7 + $0x10a8] sm:$0xff]  ;;  %v13293_v39 = vpack.c.bf16 %v11834_v35, %v11833_v34  ;;  %v11991_v34 = vld [vmem:[%s17450_s7 + $0x1520] sm:$0xff] }
 0x75c   : > { %13416 = vmatpush3.bf16.msra.mxu0 %v13415_v58  ;;  %10985 = vmatprep.mubr.f32.mxu0 %v10838_v2  ;;  %v11845_v58 = vld [vmem:[%s17450_s7 + $0x10a0] sm:$0xff]  ;;  %v11878_v28 = vld [vmem:[%s17450_s7 + $0x11a8] sm:$0xff] }
 0x75d   : > { %13232 = vmatpush3.bf16.msra.mxu1 %v13231_v11  ;;  %13418 = vmatprep.subr.bf16.mxu0 %v13417_v59  ;;  %v13431_v11 = vpack.c.bf16 %v11958_v49, %v11957_v7  ;;  %v13283_v62 = vpack.c.bf16 %v11846_v9, %v11845_v58  ;;  %v11829_v2 = vld [vmem:[%s17450_s7 + $0x1020] sm:$0xff]  ;;  %v11854_v7 = vld [vmem:[%s17450_s7 + $0x10e8] sm:$0xff]  ;;  %v11855_v9 = vld [vmem:[%s17450_s7 + $0x10f0] sm:$0xff] }
 0x75e   : > { %13234 = vmatprep.subr.bf16.mxu1 %v13233_v63  ;;  %v11830_v63 = vld [vmem:[%s17450_s7 + $0x1028] sm:$0xff] }
 0x75f   : > { %v11838_v58 = vld [vmem:[%s17450_s7 + $0x1068] sm:$0xff] }
 0x760   : > { %13420 = vmatpush3.bf16.msra.mxu0 %v13419_v16  ;;  %v13285_v16 = vpack.c.bf16 %v11830_v63, %v11829_v2  ;;  %v11840_v2 = vld [vmem:[%s17450_s7 + $0x1078] sm:$0xff]  ;;  %v11857_v63 = vld [vmem:[%s17450_s7 + $0x1100] sm:$0xff]  ;;  %v11992_v35 = vld [vmem:[%s17450_s7 + $0x1528] sm:$0xff] }
 0x761   : > { %13236 = vmatpush3.bf16.msra.mxu1 %v13235_v17  ;;  %13422 = vmatprep.subr.bf16.mxu0 %v13421_v5  ;;  %v11961_v17 = vld [vmem:[%s17450_s7 + $0x1430] sm:$0xff]  ;;  %v11962_v5 = vld [vmem:[%s17450_s7 + $0x1438] sm:$0xff] }
 0x762   : > { %13238 = vmatprep.subr.bf16.mxu1 %v13237_v0  ;;  %v13287_v0 = vpack.c.bf16 %v11848_v13, %v11847_v6  ;;  %v11987_v13 = vld [vmem:[%s17450_s7 + $0x1500] sm:$0xff] }
 0x763   : > { %v12182_v37 = vpop.f32.mrb[48].mxu1 }
 0x764   : > { %v12183_v44 = vpop.f32.mrb[49].mxu1  ;;  %13424 = vmatpush3.bf16.msra.mxu0 %v13423_v19  ;;  %v11850_v19 = vld [vmem:[%s17450_s7 + $0x10c8] sm:$0xff] }
 0x765   : > { %v12184_v46 = vadd.f32 %v12183_v44, %v12182_v37  ;;  %13240 = vmatpush3.bf16.msra.mxu1 %v13239_v20  ;;  %13426 = vmatprep.subr.bf16.mxu0 %v13425_v21  ;;  %v13439_v20 = vpack.c.bf16 %v11962_v5, %v11961_v17  ;;  %v13289_v21 = vpack.c.bf16 %v11832_v12, %v11831_v4  ;;  %v11852_v37 = vld [vmem:[%s17450_s7 + $0x10d8] sm:$0xff]  ;;  %v11841_v17 = vld [vmem:[%s17450_s7 + $0x1080] sm:$0xff]  ;;  %v11842_v5 = vld [vmem:[%s17450_s7 + $0x1088] sm:$0xff] }
 0x766   : > { %13242 = vmatprep.subr.bf16.mxu1 %v13241_v30  ;;  %v13291_v30 = vpack.c.bf16 %v11850_v19, %v11849_v33  ;;  %v11982_v44 = vld [vmem:[%s17450_s7 + $0x14d8] sm:$0xff]  ;;  %v13309_v18 = vpack.c.bf16 %v11842_v5, %v11841_v17  ;;  %v12000_v17 = vld [vmem:[%s17450_s7 + $0x1568] sm:$0xff] }
 0x767   : > { %v9104_v56 = vadd.f32 %v12184_v46, %v16766_v31  ;;  %v11960_v31 = vld [vmem:[%s17450_s7 + $0x1428] sm:$0xff]  ;;  %v11835_v46 = vld [vmem:[%s17450_s7 + $0x1050] sm:$0xff]  ;;  %v13446_v49 = vpack.c.bf16 %v11982_v44, %v11981_v40  ;;  %v11990_v33 = vld [vmem:[%s17450_s7 + $0x1518] sm:$0xff]  ;;  %v13461_v44 = vpack.c.bf16 %v11992_v35, %v11991_v34 }
 0x768   : > { %13428 = vmatpush3.bf16.msra.mxu0 %v13427_v45  ;;  %v13435_v15 = vpack.c.bf16 %v11960_v31, %v11959_v41  ;;  %v13295_v45 = vpack.c.bf16 %v11852_v37, %v11851_v36  ;;  %v11986_v41 = vld [vmem:[%s17450_s7 + $0x14f8] sm:$0xff]  ;;  %v11861_v37 = vld [vmem:[%s17450_s7 + $0x1120] sm:$0xff] }
 0x769   : > { %v16982_v59 = vadd.f32 %v13479_v55, %v9104_v56  ;;  %13244 = vmatpush3.bf16.msra.mxu1 %v13243_v47  ;;  %13430 = vmatprep.subr.bf16.mxu0 %v13429_v48  ;;  %v11836_v47 = vld [vmem:[%s17450_s7 + $0x1058] sm:$0xff]  ;;  %v11853_v48 = vld [vmem:[%s17450_s7 + $0x10e0] sm:$0xff] }
 0x76a   : > { %13246 = vmatprep.subr.bf16.mxu1 %v13245_v51  ;;  %v13297_v51 = vpack.c.bf16 %v11836_v47, %v11835_v46  ;;  %v13299_v55 = vpack.c.bf16 %v11854_v7, %v11853_v48  ;;  %v11837_v56 = vld [vmem:[%s17450_s7 + $0x1060] sm:$0xff]  ;;  %v11880_v40 = vld [vmem:[%s17450_s7 + $0x11b8] sm:$0xff]  ;;  %v11993_v46 = vld [vmem:[%s17450_s7 + $0x1530] sm:$0xff]  ;;  %v10521_v48 = vrot.slane %v15318_v24, 6 }
 0x76b   : > { %v11994_v47 = vld [vmem:[%s17450_s7 + $0x1538] sm:$0xff]  ;;  %v11873_v35 = vld [vmem:[%s17450_s7 + $0x1180] sm:$0xff] }
 0x76c   : > { %13432 = vmatpush3.bf16.msra.mxu0 %v13431_v11  ;;  %v11856_v11 = vld [vmem:[%s17450_s7 + $0x10f8] sm:$0xff] }
 0x76d   : > { %13248 = vmatpush3.bf16.msra.mxu1 %v13247_v60  ;;  %13434 = vmatprep.subr.bf16.mxu0 %v13433_v61  ;;  %v13301_v60 = vpack.c.bf16 %v11838_v58, %v11837_v56  ;;  %v11985_v61 = vld [vmem:[%s17450_s7 + $0x14f0] sm:$0xff]  ;;  %v13303_v31 = vpack.c.bf16 %v11856_v11, %v11855_v9  ;;  %v11995_v56 = vld [vmem:[%s17450_s7 + $0x1540] sm:$0xff]  ;;  %v13323_v58 = vpack.c.bf16 %v11882_v53, %v11881_v52  ;;  %v11866_v11 = vld [vmem:[%s17450_s7 + $0x1148] sm:$0xff] }
 0x76e   : > { %13284 = vmatprep.subr.bf16.mxu1 %v13283_v62  ;;  %v11839_v62 = vld [vmem:[%s17450_s7 + $0x1070] sm:$0xff]  ;;  %v13452_v3 = vpack.c.bf16 %v11986_v41, %v11985_v61  ;;  %v11865_v9 = vld [vmem:[%s17450_s7 + $0x1140] sm:$0xff]  ;;  %v11918_v53 = vld [vmem:[%s17450_s7 + $0x12d8] sm:$0xff] }
 0x76f   : > { %v13305_v6 = vpack.c.bf16 %v11840_v2, %v11839_v62  ;;  %v13325_v41 = vpack.c.bf16 %v11866_v11, %v11865_v9  ;;  %v11998_v62 = vld [vmem:[%s17450_s7 + $0x1558] sm:$0xff]  ;;  %v11919_v11 = vld [vmem:[%s17450_s7 + $0x12e0] sm:$0xff] }
 0x770   : > { %10358 = vmatmul.mubr.f32.vlgmr.msra.gmra.mrb[62].mxu1 %v10209_v8  ;;  %13436 = vmatpush3.bf16.msra.mxu0 %v13435_v15  ;;  %v11988_v15 = vld [vmem:[%s17450_s7 + $0x1508] sm:$0xff]  ;;  %v11859_v8 = vld [vmem:[%s17450_s7 + $0x1110] sm:$0xff] }
 0x771   : > { %13286 = vmatpush3.bf16.msra.mxu1 %v13285_v16  ;;  %10601 = vmatprep.mubr.f32.mxu1 %v10522_v32  ;;  %v13307_v16 = vpack.c.bf16 %v11858_v1, %v11857_v63  ;;  %v13455_v12 = vpack.c.bf16 %v11988_v15, %v11987_v13  ;;  %v11989_v32 = vld [vmem:[%s17450_s7 + $0x1510] sm:$0xff]  ;;  %v11868_v1 = vld [vmem:[%s17450_s7 + $0x1158] sm:$0xff] }
 0x772   : > { %13438 = vmatprep.subr.bf16.mxu0 %v13437_v10  ;;  %13288 = vmatprep.subr.bf16.mxu1 %v13287_v0  ;;  %v11860_v10 = vld [vmem:[%s17450_s7 + $0x1118] sm:$0xff]  ;;  %v13458_v29 = vpack.c.bf16 %v11990_v33, %v11989_v32  ;;  %v11867_v63 = vld [vmem:[%s17450_s7 + $0x1150] sm:$0xff] }
 0x773   : > { %v13311_v19 = vpack.c.bf16 %v11860_v10, %v11859_v8  ;;  %v13329_v15 = vpack.c.bf16 %v11868_v1, %v11867_v63  ;;  %v11870_v8 = vld [vmem:[%s17450_s7 + $0x1168] sm:$0xff]  ;;  %v11887_v10 = vld [vmem:[%s17450_s7 + $0x11f0] sm:$0xff]  ;;  %v12002_v33 = vld [vmem:[%s17450_s7 + $0x1578] sm:$0x7] }
 0x774   : > { %13440 = vmatpush3.bf16.msra.mxu0 %v13439_v20  ;;  %v11843_v20 = vld [vmem:[%s17450_s7 + $0x1090] sm:$0xff]  ;;  %v11940_v63 = vld [vmem:[%s17450_s7 + $0x1388] sm:$0xff] }
 0x775   : > { %13290 = vmatpush3.bf16.msra.mxu1 %v13289_v21  ;;  %13442 = vmatprep.subr.bf16.mxu0 %v13441_v27  ;;  %v11844_v21 = vld [vmem:[%s17450_s7 + $0x1098] sm:$0xff]  ;;  %v11877_v27 = vld [vmem:[%s17450_s7 + $0x11a0] sm:$0xff]  ;;  %v12001_v32 = vld [vmem:[%s17450_s7 + $0x1570] sm:$0xff] }
 0x776   : > { %13292 = vmatprep.subr.bf16.mxu1 %v13291_v30  ;;  %v13313_v30 = vpack.c.bf16 %v11844_v21, %v11843_v20  ;;  %v13315_v36 = vpack.c.bf16 %v11878_v28, %v11877_v27  ;;  %v11871_v20 = vld [vmem:[%s17450_s7 + $0x1170] sm:$0xff]  ;;  %v11872_v21 = vld [vmem:[%s17450_s7 + $0x1178] sm:$0xff]  ;;  %v11889_v27 = vld [vmem:[%s17450_s7 + $0x1200] sm:$0xff] }
 0x777   : > { %v11890_v28 = vld [vmem:[%s17450_s7 + $0x1208] sm:$0xff] }
 0x778   : > { %13444 = vmatpush3.bf16.msra.mxu0 %v13443_v38  ;;  %v11862_v38 = vld [vmem:[%s17450_s7 + $0x1128] sm:$0xff]  ;;  %v13339_v34 = vpack.c.bf16 %v11890_v28, %v11889_v27  ;;  %v11929_v28 = vld [vmem:[%s17450_s7 + $0x1330] sm:$0xff] }
 0x779   : > { %13294 = vmatpush3.bf16.msra.mxu1 %v13293_v39  ;;  %13445 = vmatprep.subr.bf16.mxu0 %v13799_v22  ;;  %v11879_v39 = vld [vmem:[%s17450_s7 + $0x11b0] sm:$0xff] }
 0x77a   : > { %13296 = vmatprep.subr.bf16.mxu1 %v13295_v45  ;;  %v13317_v45 = vpack.c.bf16 %v11862_v38, %v11861_v37  ;;  %v13319_v7 = vpack.c.bf16 %v11880_v40, %v11879_v39  ;;  %v11891_v38 = vld [vmem:[%s17450_s7 + $0x1210] sm:$0xff] }
 0x77b   : > { %10986 = vmatmul.mubr.f32.vlgmr.msra.gmra.mrb[16].mxu0 %v10837_v50  ;;  %v11864_v50 = vld [vmem:[%s17450_s7 + $0x1138] sm:$0xff] }
 0x77c   : > { %13447 = vmatpush1.bf16.msra.mxu0 %v13446_v49  ;;  %12004 = vmatprep.mubr.msk.f32.mxu0 %vm8641_vm0, %v10840_v54  ;;  %v11863_v49 = vld [vmem:[%s17450_s7 + $0x1130] sm:$0xff]  ;;  %v13464_v54 = vpack.c.bf16 %v11994_v47, %v11993_v46 }
 0x77d   : > { %13298 = vmatpush3.bf16.msra.mxu1 %v13297_v51  ;;  %13448 = vmatprep.subr.bf16.mxu0 %v13799_v22  ;;  %v10524_v51 = vrot.slane %v15352_v42, 6  ;;  %v11996_v42 = vld [vmem:[%s17450_s7 + $0x1548] sm:$0xff]  ;;  %v11875_v47 = vld [vmem:[%s17450_s7 + $0x1190] sm:$0xff] }
 0x77e   : > { %13300 = vmatprep.subr.bf16.mxu1 %v13299_v55  ;;  %v13321_v55 = vpack.c.bf16 %v11864_v50, %v11863_v49  ;;  %v13467_v61 = vpack.c.bf16 %v11996_v42, %v11995_v56 }
 0x780   : > { %13450 = vmatpush1.bf16.msra.mxu0 %v13449_v23  ;;  %v11883_v23 = vld [vmem:[%s17450_s7 + $0x11d0] sm:$0xff] }
 0x781   : > { %13302 = vmatpush3.bf16.msra.mxu1 %v13301_v60  ;;  %13451 = vmatprep.subr.bf16.mxu0 %v13799_v22  ;;  %v11884_v60 = vld [vmem:[%s17450_s7 + $0x11d8] sm:$0xff] }
 0x782   : > { %13304 = vmatprep.subr.bf16.mxu1 %v13303_v31  ;;  %v11997_v31 = vld [vmem:[%s17450_s7 + $0x1550] sm:$0xff]  ;;  %v13327_v2 = vpack.c.bf16 %v11884_v60, %v11883_v23  ;;  %v11920_v23 = vld [vmem:[%s17450_s7 + $0x12e8] sm:$0xff]  ;;  %v10836_v60 = vrot.slane %v15320_v25, 7  ;;  %v11922_v25 = vld [vmem:[%s17450_s7 + $0x12f8] sm:$0xff] }
 0x783   : > { %v12217_v4 = vpop.f32.mrb[50].mxu1  ;;  %v13470_v13 = vpack.c.bf16 %v11998_v62, %v11997_v31  ;;  %v11921_v62 = vld [vmem:[%s17450_s7 + $0x12f0] sm:$0xff] }
 0x784   : > { %v12218_v0 = vpop.f32.mrb[51].mxu1  ;;  %13453 = vmatpush1.bf16.msra.mxu0 %v13452_v3  ;;  %v11885_v3 = vld [vmem:[%s17450_s7 + $0x11e0] sm:$0xff]  ;;  %v13391_v1 = vpack.c.bf16 %v11922_v25, %v11921_v62 }
 0x785   : > { %v17130_v14 = vadd.f32 %v12218_v0, %v12217_v4  ;;  %13306 = vmatpush3.bf16.msra.mxu1 %v13305_v6  ;;  %13454 = vmatprep.subr.bf16.mxu0 %v13799_v22  ;;  %v11886_v6 = vld [vmem:[%s17450_s7 + $0x11e8] sm:$0xff]  ;;  %v11869_v4 = vld [vmem:[%s17450_s7 + $0x1160] sm:$0xff]  ;;  %v11888_v0 = vld [vmem:[%s17450_s7 + $0x11f8] sm:$0xff] }
 0x786   : > { %13308 = vmatprep.subr.bf16.mxu1 %v13307_v16  ;;  %v11999_v16 = vld [vmem:[%s17450_s7 + $0x1560] sm:$0xff]  ;;  %v13331_v5 = vpack.c.bf16 %v11886_v6, %v11885_v3 }
 0x787   : > { %v11923_v6 = vld [vmem:[%s17450_s7 + $0x1300] sm:$0xff] }
 0x788   : > { %13456 = vmatpush1.bf16.msra.mxu0 %v13455_v12  ;;  %v13473_v12 = vpack.c.bf16 %v12000_v17, %v11999_v16  ;;  %v11942_v16 = vld [vmem:[%s17450_s7 + $0x1398] sm:$0xff] }
 0x789   : > { %13310 = vmatpush3.bf16.msra.mxu1 %v13309_v18  ;;  %13457 = vmatprep.subr.bf16.mxu0 %v13799_v22  ;;  %v13333_v18 = vpack.c.bf16 %v11870_v8, %v11869_v4  ;;  %v11925_v4 = vld [vmem:[%s17450_s7 + $0x1310] sm:$0xff]  ;;  %v11926_v8 = vld [vmem:[%s17450_s7 + $0x1318] sm:$0xff] }
 0x78a   : > { %13312 = vmatprep.subr.bf16.mxu1 %v13311_v19  ;;  %v13335_v19 = vpack.c.bf16 %v11888_v0, %v11887_v10  ;;  %v11943_v10 = vld [vmem:[%s17450_s7 + $0x13a0] sm:$0xff]  ;;  %v11944_v0 = vld [vmem:[%s17450_s7 + $0x13a8] sm:$0xff] }
 0x78c   : > { %13459 = vmatpush1.bf16.msra.mxu0 %v13458_v29  ;;  %v13476_v29 = vpack.c.bf16 %v12002_v33, %v12001_v32  ;;  %v11927_v32 = vld [vmem:[%s17450_s7 + $0x1320] sm:$0xff]  ;;  %v11928_v33 = vld [vmem:[%s17450_s7 + $0x1328] sm:$0xff] }
 0x78d   : > { %13314 = vmatpush3.bf16.msra.mxu1 %v13313_v30  ;;  %13460 = vmatprep.subr.bf16.mxu0 %v13799_v22  ;;  %v13337_v30 = vpack.c.bf16 %v11872_v21, %v11871_v20  ;;  %v11946_v20 = vld [vmem:[%s17450_s7 + $0x13b8] sm:$0xff]  ;;  %v13403_v21 = vpack.c.bf16 %v11928_v33, %v11927_v32 }
 0x78e   : > { %13316 = vmatprep.subr.bf16.mxu1 %v13315_v36  ;;  %v11874_v36 = vld [vmem:[%s17450_s7 + $0x1188] sm:$0xff] }
 0x790   : > { %10602 = vmatmul.mubr.f32.vlgmr.msra.gmra.mrb[64].mxu1 %v10521_v48  ;;  %13462 = vmatpush1.bf16.msra.mxu0 %v13461_v44  ;;  %v10839_v44 = vrot.slane %v15354_v43, 7  ;;  %v11876_v48 = vld [vmem:[%s17450_s7 + $0x1198] sm:$0xff] }
 0x791   : > { %13318 = vmatpush3.bf16.msra.mxu1 %v13317_v45  ;;  %10671 = vmatprep.mubr.f32.mxu1 %v10524_v51  ;;  %v13341_v45 = vpack.c.bf16 %v11874_v36, %v11873_v35  ;;  %v11934_v43 = vld [vmem:[%s17450_s7 + $0x1358] sm:$0xff]  ;;  %v13345_v50 = vpack.c.bf16 %v11876_v48, %v11875_v47  ;;  %v11948_v35 = vld [vmem:[%s17450_s7 + $0x13c8] sm:$0xff] }
 0x792   : > { %13463 = vmatprep.subr.bf16.mxu0 %v13799_v22  ;;  %13320 = vmatprep.subr.bf16.mxu1 %v13319_v7  ;;  %v13381_v52 = vpack.c.bf16 %v11934_v43, %v11933_v57 }
 0x794   : > { %13465 = vmatpush1.bf16.msra.mxu0 %v13464_v54 }
 0x795   : > { %13322 = vmatpush3.bf16.msra.mxu1 %v13321_v55  ;;  %13466 = vmatprep.subr.bf16.mxu0 %v13799_v22  ;;  %v11935_v55 = vld [vmem:[%s17450_s7 + $0x1360] sm:$0xff] }
 0x796   : > { %13324 = vmatprep.subr.bf16.mxu1 %v13323_v58  ;;  %v10523_v58 = vrot.slane %v15505_v26, 6  ;;  %v11938_v26 = vld [vmem:[%s17450_s7 + $0x1378] sm:$0xff] }
 0x798   : > { %13468 = vmatpush1.bf16.msra.mxu0 %v13467_v61  ;;  %v11937_v61 = vld [vmem:[%s17450_s7 + $0x1370] sm:$0xff] }
 0x799   : > { %13326 = vmatpush3.bf16.msra.mxu1 %v13325_v41  ;;  %13469 = vmatprep.subr.bf16.mxu0 %v13799_v22  ;;  %v13387_v41 = vpack.c.bf16 %v11920_v23, %v11919_v11  ;;  %v13389_v31 = vpack.c.bf16 %v11938_v26, %v11937_v61 }
 0x79a   : > { %13328 = vmatprep.subr.bf16.mxu1 %v13327_v2  ;;  %v11939_v2 = vld [vmem:[%s17450_s7 + $0x1380] sm:$0xff] }
 0x79b   : > { %v13393_v3 = vpack.c.bf16 %v11940_v63, %v11939_v2 }
 0x79c   : > { %13471 = vmatpush1.bf16.msra.mxu0 %v13470_v13  ;;  %v11924_v13 = vld [vmem:[%s17450_s7 + $0x1308] sm:$0xff] }
 0x79d   : > { %13330 = vmatpush3.bf16.msra.mxu1 %v13329_v15  ;;  %13472 = vmatprep.subr.bf16.mxu0 %v13799_v22  ;;  %v11941_v15 = vld [vmem:[%s17450_s7 + $0x1390] sm:$0xff]  ;;  %v13395_v17 = vpack.c.bf16 %v11924_v13, %v11923_v6 }
 0x79e   : > { %13332 = vmatprep.subr.bf16.mxu1 %v13331_v5  ;;  %v13397_v5 = vpack.c.bf16 %v11942_v16, %v11941_v15 }
 0x7a0   : > { %13474 = vmatpush1.bf16.msra.mxu0 %v13473_v12  ;;  %v13399_v12 = vpack.c.bf16 %v11926_v8, %v11925_v4 }
 0x7a1   : > { %13334 = vmatpush3.bf16.msra.mxu1 %v13333_v18  ;;  %13475 = vmatprep.subr.bf16.mxu0 %v13799_v22  ;;  %v11892_v22 = vld [vmem:[%s17450_s7 + $0x1218] sm:$0xff]  ;;  %v13401_v18 = vpack.c.bf16 %v11944_v0, %v11943_v10 }
 0x7a2   : > { %13336 = vmatprep.subr.bf16.mxu1 %v13335_v19  ;;  %v13343_v46 = vpack.c.bf16 %v11892_v22, %v11891_v38  ;;  %v11945_v19 = vld [vmem:[%s17450_s7 + $0x13b0] sm:$0xff] }
 0x7a3   : > { %v12252_v37 = vpop.f32.mrb[52].mxu1  ;;  %v13405_v27 = vpack.c.bf16 %v11946_v20, %v11945_v19 }
 0x7a4   : > { %v12253_v39 = vpop.f32.mrb[53].mxu1  ;;  %13478 = vmatpush1.bf16.msk.msra.mxu0 %vm15265_vm15, %v13476_v29  ;;  %v11930_v29 = vld [vmem:[%s17450_s7 + $0x1338] sm:$0xff] }
 0x7a5   : > { %v12254_v40 = vadd.f32 %v12253_v39, %v12252_v37  ;;  %13338 = vmatpush3.bf16.msra.mxu1 %v13337_v30  ;;  %v13407_v38 = vpack.c.bf16 %v11930_v29, %v11929_v28  ;;  %v11931_v39 = vld [vmem:[%s17450_s7 + $0x1340] sm:$0xff] }
 0x7a6   : > { %13340 = vmatprep.subr.bf16.mxu1 %v13339_v34  ;;  %v11947_v34 = vld [vmem:[%s17450_s7 + $0x13c0] sm:$0xff] }
 0x7a7   : > { %v9418_v7 = vadd.f32 %v12254_v40, %v17130_v14  ;;  %11056 = vmatmul.mubr.f32.vlgmr.msra.gmra.mrb[12].mxu0 %v10839_v44  ;;  %v11917_v14 = vld [vmem:[%s17450_s7 + $0x12d0] sm:$0xff]  ;;  %v13409_v22 = vpack.c.bf16 %v11948_v35, %v11947_v34  ;;  %v11932_v40 = vld [vmem:[%s17450_s7 + $0x1348] sm:$0xff] }
 0x7a8   : > { %v13383_v42 = vpack.c.bf16 %v11918_v53, %v11917_v14  ;;  %v13411_v44 = vpack.c.bf16 %v11932_v40, %v11931_v39 }
 0x7a9   : > { %v17297_v49 = vadd.f32 %v16982_v59, %v9418_v7  ;;  %13342 = vmatpush3.bf16.msra.mxu1 %v13341_v45  ;;  %v11936_v59 = vld [vmem:[%s17450_s7 + $0x1368] sm:$0xff]  ;;  %v10835_v45 = vrot.slane %v15318_v24, 7 }
 0x7aa   : > { %v12392_v51 = vpop.f32.mrb[14].mxu0  ;;  %13344 = vmatprep.subr.bf16.mxu1 %v13343_v46  ;;  %v13385_v9 = vpack.c.bf16 %v11936_v59, %v11935_v55 }
 0x7ab   : > { %v12393_v54 = vpop.f32.mrb[15].mxu0 }
 0x7ac   : > { %v17311_v56 = vadd.f32 %v12393_v54, %v12392_v51 }
 0x7ad   : > { %13346 = vmatpush3.bf16.msra.mxu1 %v13345_v50 }
 0x7ae   : > { %13382 = vmatprep.subr.bf16.mxu1 %v13381_v52 }
 0x7b0   : > { %10672 = vmatmul.mubr.f32.vlgmr.msra.gmra.mrb[66].mxu1 %v10523_v58 }
 0x7b1   : > { %13384 = vmatpush3.bf16.msra.mxu1 %v13383_v42  ;;  %10915 = vmatprep.mubr.f32.mxu1 %v10836_v60 }
 0x7b2   : > { %13386 = vmatprep.subr.bf16.mxu1 %v13385_v9 }
 0x7b5   : > { %13388 = vmatpush3.bf16.msra.mxu1 %v13387_v41 }
 0x7b6   : > { %13390 = vmatprep.subr.bf16.mxu1 %v13389_v31 }
 0x7b9   : > { %13392 = vmatpush3.bf16.msra.mxu1 %v13391_v1 }
 0x7ba   : > { %13394 = vmatprep.subr.bf16.mxu1 %v13393_v3 }
 0x7bd   : > { %13396 = vmatpush3.bf16.msra.mxu1 %v13395_v17 }
 0x7be   : > { %13398 = vmatprep.subr.bf16.mxu1 %v13397_v5 }
 0x7c1   : > { %13400 = vmatpush3.bf16.msra.mxu1 %v13399_v12 }
 0x7c2   : > { %13402 = vmatprep.subr.bf16.mxu1 %v13401_v18 }
 0x7c3   : > { %v12287_v30 = vpop.f32.mrb[54].mxu1 }
 0x7c4   : > { %v12288_v36 = vpop.f32.mrb[55].mxu1 }
 0x7c5   : > { %v12289_v37 = vadd.f32 %v12288_v36, %v12287_v30  ;;  %13404 = vmatpush3.bf16.msra.mxu1 %v13403_v21 }
 0x7c6   : > { %13406 = vmatprep.subr.bf16.mxu1 %v13405_v27 }
 0x7c9   : > { %13408 = vmatpush3.bf16.msra.mxu1 %v13407_v38 }
 0x7ca   : > { %13410 = vmatprep.subr.bf16.mxu1 %v13409_v22 }
 0x7cd   : > { %13412 = vmatpush3.bf16.msra.mxu1 %v13411_v44 }
 0x7d0   : > { %10916 = vmatmul.mubr.f32.vlgmr.msra.gmra.mrb[68].mxu1 %v10835_v45 }
 0x7e3   : > { %v12322_v46 = vpop.f32.mrb[56].mxu1 }
 0x7e4   : > { %v12323_v47 = vpop.f32.mrb[57].mxu1 }
 0x7e5   : > { %v12324_v48 = vadd.f32 %v12323_v47, %v12322_v46 }
 0x7e7   : > { %v9732_v7 = vadd.f32 %v12324_v48, %v12289_v37 }
 0x7e9   : > { %v13482_v57 = vadd.f32 %v17297_v49, %v9732_v7 }
 0x803   : > { %v12357_v43 = vpop.f32.mrb[58].mxu1 }
 0x804   : > { %v12358_v50 = vpop.f32.mrb[59].mxu1 }
 0x805   : > { %v12359_v51 = vadd.f32 %v12358_v50, %v12357_v43 }
 0x807   : > { %v10046_v52 = vadd.f32 %v17311_v56, %v12359_v51 }
 0x809   : > { %v13483_v14 = vadd.f32 %v13482_v57, %v10046_v52 }
 0x823   : > { %v12427_v53 = vpop.f32.mrb[60].mxu1 }
 0x824   : > { %v12428_v54 = vpop.f32.mrb[61].mxu1 }
 0x825   : > { %v12429_v55 = vadd.f32 %v12428_v54, %v12427_v53 }
 0x843   : > { %v12462_v59 = vpop.f32.mrb[62].mxu1 }
 0x844   : > { %v12463_v42 = vpop.f32.mrb[63].mxu1 }
 0x845   : > { %v12464_v58 = vadd.f32 %v12463_v42, %v12462_v59 }
 0x847   : > { %v10360_v24 = vadd.f32 %v12464_v58, %v12429_v55 }
 0x849   : > { %v13484_v9 = vadd.f32 %v13483_v14, %v10360_v24 }
 0x84e   : > { %v12602_v11 = vpop.f32.mrb[16].mxu0 }
 0x84f   : > { %v12603_v23 = vpop.f32.mrb[17].mxu0 }
 0x850   : > { %v12604_v60 = vadd.f32 %v12603_v23, %v12602_v11 }
 0x863   : > { %v12497_v49 = vpop.f32.mrb[64].mxu1 }
 0x864   : > { %v12498_v61 = vpop.f32.mrb[65].mxu1 }
 0x865   : > { %v12499_v26 = vadd.f32 %v12498_v61, %v12497_v49 }
 0x87a   : > { %v11057_v41 = vpop.f32.mrb[12].mxu0 }
 0x87b   : > { %v11059_v31 = vpop.f32.mrb[13].mxu0 }
 0x883   : > { %v12532_v56 = vpop.f32.mrb[66].mxu1 }
 0x884   : > { %v12533_v62 = vpop.f32.mrb[67].mxu1 }
 0x885   : > { %v12534_v25 = vadd.f32 %v12533_v62, %v12532_v56 }
 0x887   : > { %v10674_v2 = vadd.f32 %v12534_v25, %v12499_v26 }
 0x889   : > { %v13485_v63 = vadd.f32 %v13484_v9, %v10674_v2 }
 0x8a3   : > { %v12567_v1 = vpop.f32.mrb[68].mxu1 }
 0x8a4   : > { %v12568_v3 = vpop.f32.mrb[69].mxu1 }
 0x8a5   : > { %v12569_v6 = vadd.f32 %v12568_v3, %v12567_v1 }
 0x8a7   : > { %v10988_v13 = vadd.f32 %v12604_v60, %v12569_v6 }
 0x8a9   : > { %v13486_v15 = vadd.f32 %v13485_v63, %v10988_v13 }
 0x8ab   : > { %v13487_v16 = vadd.f32 %v13486_v15, %v11057_v41 }
 0x8ad   : > { %11063 = vst.msk [vmem:[%s324_s29] sm:$0x1] %vm11062_vm1, %v13487_v16 }
 0x8ae   : > { %13737 = shalt.err (!%p13734_p3)
}
 0x8af   : > { %s13738_s25 = scalar_lea.hbm %s17401_s21, 16  ;;  %s13742_s29 = scalar_lea.hbm %s17452_s9, 32 }
 0x8b0   : > { %p13739_p4 = scmp.ne.s32.totalorder %s17401_s21, %s13738_s25  ;;  %p13743_p9 = scmp.lt.u32.totalorder %s17401_s21, %s17452_s9 }
 0x8b1   : > { %p13744_p10 = scmp.lt.u32.totalorder %s13742_s29, %s13738_s25  ;;  %p13746_p12 = scmp.lt.u32.totalorder %s13738_s25, %s17401_s21 }
 0x8b2   : > { %p13740_p7 = pnand %p13739_p4, %p13890_p5 }
 0x8b3   : > { %p13745_p11 = por %p13744_p10, %p13743_p9 }
 0x8b4   : > { %p13741_p8 = pneg %p13740_p7 }
 0x8b5   : > { %p13747_p13 = por %p13746_p12, %p13745_p11 }
 0x8b7   : > { %p13748_p0 = pnand %p13747_p13, %p13741_p8 }
 0x8b9   : > { %13751 = shalt.err (!%p13748_p0)
}
 0x8ba   : > { %13646 = dma.vmem_to_hbm [thread:$0]  (%p13890_p5), %s17403_s14, 16, %s17401_s21, %s11065_s26  }
 0x8bb PF: > { %p13652_p1 = scmp.ge.s32.totalorder %s13786_s12, 2  ;;  %s11089_s22 = sand.u32 1, %s13774_s30  }
 0x8bc   : > { %s11090_s13 = scalar_lea.sflag [#allocation3], %s11089_s22 }
 0x8bd   : > { %p13649_p2 = pnand %p13652_p1, %p13894_p6 }
 0x8bf   : > { %13769 = dma.done.wait (!%p13649_p2), %s11090_s13, 16  }
 0x8c0   : > { %13771 = vsyncadd (!%p13649_p2), %s11090_s13, 4294967280  ;;  %p19_p3 = scmp.ge.s32.totalorder %s13877_s15, 4   ;;  %s17457_s30 = smov %s13778_s10 }
 0x8c1   : > { %s17458_s10 = smov %s13782_s11  ;;  %s17459_s11 = smov %s13888_s18 }
 0x8c2   : > { %s17460_s12 = smov %s13877_s15  ;;  %21 = sbr.rel (!%p19_p3) target bundleno = 3 (0x3), region = 122 }
 0x8c9   :  { %11094 = vsyncpa [#allocation3], 1 }
 0x8ca   :  { %11096 = vsyncpa [#allocation3 + $0x1], 1 }

</bundles_post_ra>
